<compile_context>
chip_gen: v7x
topology: tpu7x:2x2x1
jax: 0.10.0
libtpu: 0.0.40
codegen_flags: <defaults>
</compile_context>

<pallas_src>
import jax
import jax.numpy as jnp
from jax.experimental import pallas as pl
from jax.experimental.pallas import tpu as pltpu


# ----------------------------- Pallas kernel -------------------------------

def domain_classifier_kernel(x_ref, w1_ref, b1_ref, w2_ref, b2_ref,
                             w3t_ref, b3_ref, o_ref):
    """Fused 3-layer MLP + sigmoid, one batch tile per grid step.

    x_ref:   (TN, D)   flattened features (D = in_channel * in_dim * in_dim)
    w1_ref:  (D, H1)   b1_ref: (1, H1)
    w2_ref:  (H1, H2)  b2_ref: (1, H2)
    w3t_ref: (1, H2)   last Linear's weight, stored transposed (row vector)
    b3_ref:  (1, 1)
    o_ref:   (TN, 1)   sigmoid probabilities
    """
    x = x_ref[...]

    # Linear(D -> H1) + ReLU   (MXU matmul, f32 accumulate)
    h1 = jnp.dot(x, w1_ref[...], preferred_element_type=jnp.float32)
    h1 = jnp.maximum(h1 + b1_ref[...], 0.0)

    # Linear(H1 -> H2) + ReLU
    h2 = jnp.dot(h1, w2_ref[...], preferred_element_type=jnp.float32)
    h2 = jnp.maximum(h2 + b2_ref[...], 0.0)

    # Linear(H2 -> 1): out_features == 1, so do a VPU broadcast-multiply and a
    # lane reduction instead of a degenerate width-1 MXU matmul.
    logit = jnp.sum(h2 * w3t_ref[...], axis=-1, keepdims=True) + b3_ref[...]

    # Sigmoid (exp goes to the EUP slot).
    o_ref[...] = 1.0 / (1.0 + jnp.exp(-logit))


# ------------------------------ host wrapper -------------------------------

def domain_classifier(x, params, *, block_n=8):
    """Matches DomainClassifier.forward: sigmoid(fc(x)), fc = 3-layer MLP."""
    N, D = x.shape
    H1 = params["w1"].shape[1]
    H2 = params["w2"].shape[1]
    assert N % block_n == 0, (N, block_n)
    grid = (N // block_n,)

    return pl.pallas_call(
        domain_classifier_kernel,
        out_shape=jax.ShapeDtypeStruct((N, 1), jnp.float32),
        grid=grid,
        in_specs=[
            pl.BlockSpec((block_n, D), lambda i: (i, 0)),   # x tile
            pl.BlockSpec((D, H1), lambda i: (0, 0)),        # w1 (grid-invariant)
            pl.BlockSpec((1, H1), lambda i: (0, 0)),        # b1
            pl.BlockSpec((H1, H2), lambda i: (0, 0)),       # w2
            pl.BlockSpec((1, H2), lambda i: (0, 0)),        # b2
            pl.BlockSpec((1, H2), lambda i: (0, 0)),        # w3 (transposed)
            pl.BlockSpec((1, 1), lambda i: (0, 0)),         # b3
        ],
        out_specs=pl.BlockSpec((block_n, 1), lambda i: (i, 0)),
        compiler_params=pltpu.CompilerParams(
            dimension_semantics=("parallel",)),             # shards over v7x's 2 TCs
    )(x, params["w1"], params["b1"], params["w2"], params["b2"],
      params["w3t"], params["b3"])


# -------------------------- deterministic params ---------------------------

def init_params(key, in_channel=64, out_channel=256, in_dim=7):
    D = in_channel * in_dim * in_dim          # 3136
    H1 = out_channel                          # 256
    H2 = out_channel // 2                     # 128
    k1, k2, k3, k4, k5, k6 = jax.random.split(key, 6)
    w1 = jax.random.normal(k1, (D, H1), jnp.float32) / jnp.sqrt(float(D))
    b1 = 0.05 * jax.random.normal(k2, (1, H1), jnp.float32)
    w2 = jax.random.normal(k3, (H1, H2), jnp.float32) / jnp.sqrt(float(H1))
    b2 = 0.05 * jax.random.normal(k4, (1, H2), jnp.float32)
    w3t = jax.random.normal(k5, (1, H2), jnp.float32) / jnp.sqrt(float(H2))
    b3 = 0.05 * jax.random.normal(k6, (1, 1), jnp.float32)
    return {"w1": w1, "b1": b1, "w2": w2, "b2": b2, "w3t": w3t, "b3": b3}


# ---------------------------- pure-JAX reference ----------------------------

def ref_forward(x, p):
    h1 = jnp.maximum(x @ p["w1"] + p["b1"], 0.0)
    h2 = jnp.maximum(h1 @ p["w2"] + p["b2"], 0.0)
    logit = h2 @ p["w3t"].T + p["b3"]
    return jax.nn.sigmoid(logit)


# ----------------------------------- main -----------------------------------

if __name__ == "__main__":
    key = jax.random.PRNGKey(0)
    kx, kp = jax.random.split(key)

    in_channel, out_channel, in_dim = 64, 256, 7     # module defaults
    N = 16                                           # small batch, 2 grid tiles of 8
    x = jax.random.normal(kx, (N, in_channel * in_dim * in_dim), jnp.float32)
    params = init_params(kp, in_channel, out_channel, in_dim)

    fwd = jax.jit(domain_classifier)
    out = jax.block_until_ready(fwd(x, params))
    assert out.shape == (N, 1), out.shape

    ref = ref_forward(x, params)
    assert jnp.allclose(out, ref, atol=1e-5, rtol=1e-5), float(
        jnp.max(jnp.abs(out - ref)))

    print("KERNEL_OK")
</pallas_src>

<mosaic_0001>
module attributes {stable_mosaic.version = 11 : i64} {
  func.func @domain_classifier_kernel(%arg0: i32, %arg1: memref<8x3136xf32, #tpu.memory_space<vmem>>, %arg2: memref<3136x256xf32, #tpu.memory_space<vmem>>, %arg3: memref<1x256xf32, #tpu.memory_space<vmem>>, %arg4: memref<256x128xf32, #tpu.memory_space<vmem>>, %arg5: memref<1x128xf32, #tpu.memory_space<vmem>>, %arg6: memref<1x128xf32, #tpu.memory_space<vmem>>, %arg7: memref<1x1xf32, #tpu.memory_space<vmem>>, %arg8: memref<8x1xf32, #tpu.memory_space<vmem>>) attributes {dimension_semantics = [#tpu.dimension_semantics<parallel>], iteration_bounds = array<i64: 2>, scalar_prefetch = 0 : i64, scratch_operands = 0 : i64, tpu.core_type = #tpu.core_type<tc>, window_params = [{transform_indices = @transform_0, window_bounds = array<i64: 8, 3136>}, {pipeline_mode = #tpu.pipeline_mode<synchronous>, transform_indices = @transform_1, window_bounds = array<i64: 3136, 256>}, {pipeline_mode = #tpu.pipeline_mode<synchronous>, transform_indices = @transform_2, window_bounds = array<i64: 1, 256>}, {pipeline_mode = #tpu.pipeline_mode<synchronous>, transform_indices = @transform_3, window_bounds = array<i64: 256, 128>}, {pipeline_mode = #tpu.pipeline_mode<synchronous>, transform_indices = @transform_4, window_bounds = array<i64: 1, 128>}, {pipeline_mode = #tpu.pipeline_mode<synchronous>, transform_indices = @transform_5, window_bounds = array<i64: 1, 128>}, {pipeline_mode = #tpu.pipeline_mode<synchronous>, transform_indices = @transform_6, window_bounds = array<i64: 1, 1>}, {transform_indices = @transform_7, window_bounds = array<i64: 8, 1>}]} {
    %c0 = arith.constant 0 : index
    %c0_0 = arith.constant 0 : index
    %0 = vector.load %arg1[%c0, %c0_0] : memref<8x3136xf32, #tpu.memory_space<vmem>>, vector<8x3136xf32>
    %c0_1 = arith.constant 0 : index
    %c0_2 = arith.constant 0 : index
    %1 = vector.load %arg2[%c0_1, %c0_2] : memref<3136x256xf32, #tpu.memory_space<vmem>>, vector<3136x256xf32>
    %cst = arith.constant dense<0.000000e+00> : vector<8x256xf32>
    %2 = tpu.matmul %0, %1, %cst {dimension_numbers = #tpu.dot_dimension_numbers<[1], [0], [0], [1], [0, 0, 1, 1], [], []>} : vector<8x3136xf32>, vector<3136x256xf32>, vector<8x256xf32> -> vector<8x256xf32>
    %c0_3 = arith.constant 0 : index
    %c0_4 = arith.constant 0 : index
    %3 = vector.load %arg3[%c0_3, %c0_4] : memref<1x256xf32, #tpu.memory_space<vmem>>, vector<1x256xf32>
    %4 = vector.broadcast %3 : vector<1x256xf32> to vector<8x256xf32>
    %5 = arith.addf %2, %4 : vector<8x256xf32>
    %cst_5 = arith.constant 0.000000e+00 : f32
    %6 = vector.broadcast %cst_5 : f32 to vector<8x256xf32>
    %7 = arith.maximumf %5, %6 : vector<8x256xf32>
    %c0_6 = arith.constant 0 : index
    %c0_7 = arith.constant 0 : index
    %8 = vector.load %arg4[%c0_6, %c0_7] : memref<256x128xf32, #tpu.memory_space<vmem>>, vector<256x128xf32>
    %cst_8 = arith.constant dense<0.000000e+00> : vector<8x128xf32>
    %9 = tpu.matmul %7, %8, %cst_8 {dimension_numbers = #tpu.dot_dimension_numbers<[1], [0], [0], [1], [0, 0, 1, 1], [], []>} : vector<8x256xf32>, vector<256x128xf32>, vector<8x128xf32> -> vector<8x128xf32>
    %c0_9 = arith.constant 0 : index
    %c0_10 = arith.constant 0 : index
    %10 = vector.load %arg5[%c0_9, %c0_10] : memref<1x128xf32, #tpu.memory_space<vmem>>, vector<1x128xf32>
    %11 = vector.broadcast %10 : vector<1x128xf32> to vector<8x128xf32>
    %12 = arith.addf %9, %11 : vector<8x128xf32>
    %cst_11 = arith.constant 0.000000e+00 : f32
    %13 = vector.broadcast %cst_11 : f32 to vector<8x128xf32>
    %14 = arith.maximumf %12, %13 : vector<8x128xf32>
    %c0_12 = arith.constant 0 : index
    %c0_13 = arith.constant 0 : index
    %15 = vector.load %arg6[%c0_12, %c0_13] : memref<1x128xf32, #tpu.memory_space<vmem>>, vector<1x128xf32>
    %16 = vector.broadcast %15 : vector<1x128xf32> to vector<8x128xf32>
    %17 = arith.mulf %14, %16 : vector<8x128xf32>
    %cst_14 = arith.constant dense<0.000000e+00> : vector<8xf32>
    %18 = vector.multi_reduction <add>, %17, %cst_14 [1] : vector<8x128xf32> to vector<8xf32>
    %19 = vector.shape_cast %18 : vector<8xf32> to vector<8x1xf32>
    %c0_15 = arith.constant 0 : index
    %c0_16 = arith.constant 0 : index
    %20 = vector.load %arg7[%c0_15, %c0_16] : memref<1x1xf32, #tpu.memory_space<vmem>>, vector<1x1xf32>
    %21 = vector.broadcast %20 : vector<1x1xf32> to vector<8x1xf32>
    %22 = arith.addf %19, %21 : vector<8x1xf32>
    %cst_17 = arith.constant 0.000000e+00 : f32
    %23 = vector.broadcast %cst_17 : f32 to vector<8x1xf32>
    %24 = arith.subf %23, %22 : vector<8x1xf32>
    %25 = math.exp %24 : vector<8x1xf32>
    %cst_18 = arith.constant 1.000000e+00 : f32
    %26 = vector.broadcast %cst_18 : f32 to vector<8x1xf32>
    %27 = arith.addf %26, %25 : vector<8x1xf32>
    %cst_19 = arith.constant 1.000000e+00 : f32
    %28 = vector.broadcast %cst_19 : f32 to vector<8x1xf32>
    %29 = arith.divf %28, %27 : vector<8x1xf32>
    %c0_20 = arith.constant 0 : index
    %c0_21 = arith.constant 0 : index
    %30 = vector.load %arg8[%c0_20, %c0_21] : memref<8x1xf32, #tpu.memory_space<vmem>>, vector<8x1xf32>
    tpu.vector_store %arg8[%c0_20, %c0_21], %29 {strides = array<i32>} : memref<8x1xf32, #tpu.memory_space<vmem>>, vector<8x1xf32>,
    return
  }
  func.func @transform_0(%arg0: i32) -> (i32, i32) {
    %c0_i32 = arith.constant 0 : i32
    %c0_i32_0 = arith.constant 0 : i32
    return %arg0, %c0_i32 : i32, i32
  }
  func.func @transform_1(%arg0: i32) -> (i32, i32) {
    %c0_i32 = arith.constant 0 : i32
    %c0_i32_0 = arith.constant 0 : i32
    %c0_i32_1 = arith.constant 0 : i32
    return %c0_i32, %c0_i32_0 : i32, i32
  }
  func.func @transform_2(%arg0: i32) -> (i32, i32) {
    %c0_i32 = arith.constant 0 : i32
    %c0_i32_0 = arith.constant 0 : i32
    %c0_i32_1 = arith.constant 0 : i32
    return %c0_i32, %c0_i32_0 : i32, i32
  }
  func.func @transform_3(%arg0: i32) -> (i32, i32) {
    %c0_i32 = arith.constant 0 : i32
    %c0_i32_0 = arith.constant 0 : i32
    %c0_i32_1 = arith.constant 0 : i32
    return %c0_i32, %c0_i32_0 : i32, i32
  }
  func.func @transform_4(%arg0: i32) -> (i32, i32) {
    %c0_i32 = arith.constant 0 : i32
    %c0_i32_0 = arith.constant 0 : i32
    %c0_i32_1 = arith.constant 0 : i32
    return %c0_i32, %c0_i32_0 : i32, i32
  }
  func.func @transform_5(%arg0: i32) -> (i32, i32) {
    %c0_i32 = arith.constant 0 : i32
    %c0_i32_0 = arith.constant 0 : i32
    %c0_i32_1 = arith.constant 0 : i32
    return %c0_i32, %c0_i32_0 : i32, i32
  }
  func.func @transform_6(%arg0: i32) -> (i32, i32) {
    %c0_i32 = arith.constant 0 : i32
    %c0_i32_0 = arith.constant 0 : i32
    %c0_i32_1 = arith.constant 0 : i32
    return %c0_i32, %c0_i32_0 : i32, i32
  }
  func.func @transform_7(%arg0: i32) -> (i32, i32) {
    %c0_i32 = arith.constant 0 : i32
    %c0_i32_0 = arith.constant 0 : i32
    return %arg0, %c0_i32 : i32, i32
  }
}

</mosaic_0001>

<bundles_post_ra>
// kernel: domain_classifier.1
= control target key start
LH: loop header
LB: loop body
LE: loop exit
PB: predicated region body
PF: predicated region fallthrough
CT: control target
= control target key end

     0   :  { %s3910_s0 = inlined_call_operand.hbm [shape: f32[16,3136], index: 0, kind: input, shape index: {}]   ;;  %s3911_s1 = inlined_call_operand.hbm [shape: f32[3136,256], index: 1, kind: input, shape index: {}]   ;;  %s3912_s2 = inlined_call_operand.hbm [shape: f32[1,256], index: 2, kind: input, shape index: {}]   ;;  %s3913_s3 = inlined_call_operand.hbm [shape: f32[256,128], index: 3, kind: input, shape index: {}]   ;;  %s3914_s4 = inlined_call_operand.hbm [shape: f32[1,128], index: 4, kind: input, shape index: {}]   ;;  %s3915_s5 = inlined_call_operand.hbm [shape: f32[1,128], index: 5, kind: input, shape index: {}]   ;;  %s3916_s6 = inlined_call_operand.<no memory space> [shape: f32[1,1], index: 6, kind: input, shape index: {}]   ;;  %s3917_s7 = inlined_call_operand.vmem [shape: f32[16,1], index: 7, kind: output, shape index: {}]  }
   0x1   :  { %v12_v0 = vstv %s3916_s6 }
   0x2   :  { %13 = vst [vmem:[#allocation2] sm:$0x1] %v12_v0 }
   0x3   :  { %14 = vsyncpa [#allocation4], 0 }
   0x4   :  { %16 = vsyncpa [#allocation4 + $0x1], 0 }
   0x5   :  { %17 = vsyncpa [#allocation6], 0 }
   0x6   :  { %18 = vsyncpa [#allocation9], 0 }
   0x7   :  { %19 = vsyncpa [#allocation12], 0  ;;  %s3636_s26 = smov 0   ;;  %s3638_s27 = smov 0  }
   0x8   :  { %s3640_s28 = smov 0   ;;  %s3642_s29 = smov 0  }
   0x9 LB: > { %s3582_s6 = smov [#allocation5]   ;;  %s3657_s8 = sadd.s32 4294967295, %s3580_s29   ;;  %s3580_s29 = sphi %s3642_s29, %s3936_s29   ;;  %s3576_s28 = sphi %s3640_s28, %s3935_s28   ;;  %s3572_s27 = sphi %s3638_s27, %s3934_s27   ;;  %s3568_s26 = sphi %s3636_s26, %s3933_s26  }
   0xa   : > { %s220_s30 = sshll.u32 %s3582_s6, 4  ;;  %p2364_p0 = scmp.ge.s32.totalorder %s3580_s29, 1  ;;  %s3662_s30 = int_to_ptr.vmem [resolvable:$true] %s220_s30 }
   0xb   : > { %p3918_p1 = scmp.eq.s32.totalorder %s3657_s8, 0  ;;  %p208_p2 = scmp.lt.s32.totalorder %s3580_s29, 3 }
   0xc   : > { %s3583_s10 = smov [#allocation8]   ;;  %s3584_s13 = smov [#allocation7]  }
   0xd   : > { %p3664_p3 = pnand %p2364_p0, %p208_p2  ;;  %s244_s11 = sshll.u32 %s3583_s10, 4  ;;  %s3676_s11 = int_to_ptr.vmem [resolvable:$true] %s244_s11 }
   0xe   : > { %s3678_s14 = sshll.u32 %s3584_s13, 4  ;;  %s3364_s17 = scalar_lea.hbm %s3911_s1, 100352  ;;  %s235_s14 = int_to_ptr.vmem [resolvable:$true] %s3678_s14 }
   0xf   : > { %s3920_s9 = scalar_select %p3664_p3, 1, 0 }
  0x10   : > { %p3287_p4 = pneg %p3664_p3  ;;  %p3365_p6 = scmp.ne.s32.totalorder %s3911_s1, %s3364_s17 }
  0x11   : > { %p3371_p10 = scmp.lt.u32.totalorder %s3364_s17, %s3911_s1 }
  0x12   : > { %p3672_p5 = pnand %p3287_p4, %p3918_p1 }
  0x14   : > { %p3688_p7 = pneg %p3672_p5 }
  0x16   : > { %p3367_p8 = pnand %p3688_p7, %p3365_p6 }
  0x18   : > { %p3368_p9 = pneg %p3367_p8 }
  0x1a   : > { %p3373_p11 = pnand %p3371_p10, %p3368_p9 }
  0x1c   : > { %3376 = shalt.err (!%p3373_p11)
}
  0x1d   : > { %s3377_s23 = scalar_lea.vmem %s3662_s30, 100352  ;;  %p3385_p2 = scmp.lt.s32.totalorder %s3662_s30, %s3662_s30 }
  0x1e   : > { %p3378_p12 = scmp.ne.s32.totalorder %s3662_s30, %s3377_s23  ;;  %p3386_p4 = scmp.lt.s32.totalorder %s3377_s23, %s3377_s23 }
  0x20   : > { %p3380_p13 = pnand %p3378_p12, %p3688_p7  ;;  %p3387_p6 = por %p3386_p4, %p3385_p2 }
  0x22   : > { %p3381_p0 = pneg %p3380_p13 }
  0x24   : > { %p3388_p8 = pnand %p3387_p6, %p3381_p0 }
  0x26   : > { %3391 = shalt.err (!%p3388_p8)
}
  0x27   : > { %s3585_s24 = smov 256   ;;  %s3586_s25 = smov 16  }
  0x28   : > { %3290 = dma.hbm_to_vmem [thread:$0]  (!%p3672_p5), %s3911_s1, 100352, %s3662_s30, [#allocation6], %s3585_s24, %s3585_s24, %s3586_s25  }
  0x29   : > { %s3392_s16 = scalar_lea.hbm %s3913_s3, 4096 }
  0x2a   : > { %p3393_p9 = scmp.ne.s32.totalorder %s3913_s3, %s3392_s16  ;;  %p3399_p12 = scmp.lt.u32.totalorder %s3392_s16, %s3913_s3 }
  0x2c   : > { %p3395_p10 = pnand %p3393_p9, %p3688_p7 }
  0x2e   : > { %p3396_p11 = pneg %p3395_p10 }
  0x30   : > { %p3401_p13 = pnand %p3399_p12, %p3396_p11 }
  0x32   : > { %3404 = shalt.err (!%p3401_p13)
}
  0x33   : > { %s3405_s30 = scalar_lea.vmem %s3676_s11, 4096  ;;  %p3413_p6 = scmp.lt.s32.totalorder %s3676_s11, %s3676_s11 }
  0x34   : > { %p3406_p0 = scmp.ne.s32.totalorder %s3676_s11, %s3405_s30  ;;  %p3414_p8 = scmp.lt.s32.totalorder %s3405_s30, %s3405_s30 }
  0x36   : > { %p3408_p2 = pnand %p3406_p0, %p3688_p7  ;;  %p3415_p9 = por %p3414_p8, %p3413_p6 }
  0x38   : > { %p3409_p4 = pneg %p3408_p2 }
  0x3a   : > { %p3416_p10 = pnand %p3415_p9, %p3409_p4 }
  0x3c   : > { %3419 = shalt.err (!%p3416_p10)
}
  0x3d   : > { %s3587_s22 = smov 128   ;;  %s3588_s23 = smov 8  }
  0x3e   : > { %3296 = dma.hbm_to_vmem [thread:$0]  (!%p3672_p5), %s3913_s3, 4096, %s3676_s11, [#allocation9], %s3587_s22, %s3587_s22, %s3588_s23  }
  0x3f   : > { %s3420_s13 = scalar_lea.hbm %s3912_s2, 32 }
  0x40   : > { %p3421_p11 = scmp.ne.s32.totalorder %s3912_s2, %s3420_s13  ;;  %p3427_p0 = scmp.lt.u32.totalorder %s3420_s13, %s3912_s2 }
  0x42   : > { %p3423_p12 = pnand %p3421_p11, %p3688_p7 }
  0x44   : > { %p3424_p13 = pneg %p3423_p12 }
  0x46   : > { %p3429_p2 = pnand %p3427_p0, %p3424_p13 }
  0x48   : > { %3432 = shalt.err (!%p3429_p2)
}
  0x49   : > { %s3433_s19 = scalar_lea.vmem %s235_s14, 32  ;;  %p3441_p9 = scmp.lt.s32.totalorder %s235_s14, %s235_s14 }
  0x4a   : > { %p3434_p4 = scmp.ne.s32.totalorder %s235_s14, %s3433_s19  ;;  %p3442_p10 = scmp.lt.s32.totalorder %s3433_s19, %s3433_s19 }
  0x4c   : > { %p3436_p6 = pnand %p3434_p4, %p3688_p7  ;;  %p3443_p1 = por %p3442_p10, %p3441_p9 }
  0x4e   : > { %p3437_p8 = pneg %p3436_p6 }
  0x50   : > { %p3444_p3 = pnand %p3443_p1, %p3437_p8 }
  0x52   : > { %3447 = shalt.err (!%p3444_p3)
}
  0x53   : > { %3293 = dma.hbm_to_vmem [thread:$0]  (!%p3672_p5), %s3912_s2, 32, %s235_s14, [#allocation6]  }
  0x54   : > { %s3589_s30 = smov [#allocation10]   ;;  %s3590_s23 = smov [#allocation11]  }
  0x55   : > { %s258_s22 = sshll.u32 %s3589_s30, 4  ;;  %s269_s24 = sshll.u32 %s3590_s23, 4  ;;  %s259_s22 = int_to_ptr.vmem [resolvable:$true] %s258_s22  ;;  %s270_s24 = int_to_ptr.vmem [resolvable:$true] %s269_s24 }
  0x56   : > { %s3448_s10 = scalar_lea.hbm %s3914_s4, 16 }
  0x57   : > { %p3449_p1 = scmp.ne.s32.totalorder %s3914_s4, %s3448_s10  ;;  %p3455_p12 = scmp.lt.u32.totalorder %s3448_s10, %s3914_s4 }
  0x59   : > { %p3451_p3 = pnand %p3449_p1, %p3688_p7 }
  0x5b   : > { %p3452_p11 = pneg %p3451_p3 }
  0x5d   : > { %p3457_p13 = pnand %p3455_p12, %p3452_p11 }
  0x5f   : > { %3460 = shalt.err (!%p3457_p13)
}
  0x60   : > { %s3461_s14 = scalar_lea.vmem %s259_s22, 16  ;;  %s3468_s18 = scalar_lea.vmem %s259_s22, 32 }
  0x61   : > { %p3462_p0 = scmp.ne.s32.totalorder %s259_s22, %s3461_s14  ;;  %p3469_p6 = scmp.lt.s32.totalorder %s259_s22, %s259_s22 }
  0x62   : > { %p3470_p8 = scmp.lt.s32.totalorder %s3468_s18, %s3461_s14 }
  0x63   : > { %p3464_p2 = pnand %p3462_p0, %p3688_p7 }
  0x64   : > { %p3471_p9 = por %p3470_p8, %p3469_p6 }
  0x65   : > { %p3465_p4 = pneg %p3464_p2 }
  0x67   : > { %p3472_p10 = pnand %p3471_p9, %p3465_p4 }
  0x69   : > { %3475 = shalt.err (!%p3472_p10)
}
  0x6a   : > { %3299 = dma.hbm_to_vmem [thread:$0]  (!%p3672_p5), %s3914_s4, 16, %s259_s22, [#allocation9]  }
  0x6b   : > { %s3476_s23 = scalar_lea.hbm %s3915_s5, 16 }
  0x6c   : > { %p3477_p1 = scmp.ne.s32.totalorder %s3915_s5, %s3476_s23  ;;  %p3483_p12 = scmp.lt.u32.totalorder %s3476_s23, %s3915_s5 }
  0x6e   : > { %p3479_p3 = pnand %p3477_p1, %p3688_p7 }
  0x70   : > { %p3480_p11 = pneg %p3479_p3 }
  0x72   : > { %p3485_p13 = pnand %p3483_p12, %p3480_p11 }
  0x74   : > { %3488 = shalt.err (!%p3485_p13)
}
  0x75   : > { %s3489_s15 = scalar_lea.vmem %s270_s24, 16  ;;  %s3496_s22 = scalar_lea.vmem %s270_s24, 32 }
  0x76   : > { %p3490_p0 = scmp.ne.s32.totalorder %s270_s24, %s3489_s15  ;;  %p3497_p6 = scmp.lt.s32.totalorder %s270_s24, %s270_s24 }
  0x77   : > { %p3498_p8 = scmp.lt.s32.totalorder %s3496_s22, %s3489_s15 }
  0x78   : > { %p3492_p2 = pnand %p3490_p0, %p3688_p7 }
  0x79   : > { %p3499_p9 = por %p3498_p8, %p3497_p6 }
  0x7a   : > { %p3493_p4 = pneg %p3492_p2 }
  0x7c   : > { %p3500_p10 = pnand %p3499_p9, %p3493_p4 }
  0x7e   : > { %3503 = shalt.err (!%p3500_p10)
}
  0x7f   : > { %3302 = dma.hbm_to_vmem [thread:$0]  (!%p3672_p5), %s3915_s5, 16, %s270_s24, [#allocation12]  }
  0x80   : > { %s3788_s20 = sadd.s32 1, %s3580_s29   ;;  %s32_s14 = sadd.s32 1, %s3576_s28 }
  0x81   : > { %s29_s12 = ssub.s32 %s3580_s29, %s3788_s20  ;;  %p39_p1 = scmp.ne.s32.totalorder %s3576_s28, %s3572_s27 }
  0x82   : > { %p30_p7 = scmp.eq.s32.totalorder %s29_s12, 0  ;;  %p40_p3 = scmp.eq.s32.totalorder %s3580_s29, 0 }
  0x83   : > { %p45_p11 = scmp.ne.s32.totalorder %s3572_s27, %s3568_s26  ;;  %p3923_p13 = scmp.eq.s32.totalorder %s3657_s8, 0 }
  0x84   : > { %s3799_s18 = scalar_select %p30_p7, %s3576_s28, %s32_s14  }
  0x85   : > { %p41_p12 = por %p40_p3, %p39_p1  ;;  %p3803_p0 = por %p3923_p13, %p45_p11 }
  0x86   : > { %p3312_p2 = scmp.lt.s32.totalorder %s3580_s29, 2  ;;  %s283_s11 = sand.u32 1, %s3576_s28  }
  0x87   : > { %s3262_s24 = smul.u32 200, %s283_s11  ;;  %s3509_s16 = scalar_lea.hbm %s3910_s0, 6400 }
  0x88   : > { %s3263_s21 = smul.u32 3200, %s3580_s29  ;;  %p3810_p5 = pnand %p3312_p2, %p41_p12 }
  0x89   : > { %s287_s6 = scalar_lea.vmem [#allocation3], %s3262_s24  ;;  %s284_s29 = scalar_lea.sflag [#allocation4], %s283_s11 }
  0x8a   : > { %s3817_s26 = scalar_lea.hbm %s3910_s0, %s3263_s21  ;;  %s295_s10 = sshll.u32 %s287_s6, 4  ;;  %s3819_s10 = int_to_ptr.vmem [resolvable:$true] %s295_s10 }
  0x8b   : > { %s3504_s13 = scalar_lea.hbm %s3817_s26, 3200  ;;  %p3506_p6 = pneg %p3810_p5 }
  0x8c   : > { %p3505_p4 = scmp.ne.s32.totalorder %s3817_s26, %s3504_s13  ;;  %p3510_p10 = scmp.lt.u32.totalorder %s3817_s26, %s3910_s0 }
  0x8d   : > { %p3511_p7 = scmp.lt.u32.totalorder %s3509_s16, %s3504_s13  ;;  %p3513_p3 = scmp.lt.u32.totalorder %s3504_s13, %s3817_s26 }
  0x8e   : > { %p3507_p8 = pnand %p3506_p6, %p3505_p4 }
  0x8f   : > { %p3512_p1 = por %p3511_p7, %p3510_p10 }
  0x90   : > { %p3508_p9 = pneg %p3507_p8 }
  0x91   : > { %p3514_p11 = por %p3513_p3, %p3512_p1 }
  0x93   : > { %p3515_p12 = pnand %p3514_p11, %p3508_p9 }
  0x95   : > { %3518 = shalt.err (!%p3515_p12)
}
  0x96   : > { %s3519_s14 = scalar_lea.vmem %s3819_s10, 3200  ;;  %s3591_s11 = smov [#allocation3]  }
  0x97   : > { %p3520_p13 = scmp.ne.s32.totalorder %s3819_s10, %s3519_s14  ;;  %s3524_s24 = sshll.u32 %s3591_s11, 4  ;;  %s3525_s24 = int_to_ptr.vmem [resolvable:$false] %s3524_s24 }
  0x98   : > { %s3526_s21 = scalar_lea.vmem %s3525_s24, 6400  ;;  %p3527_p8 = scmp.lt.s32.totalorder %s3819_s10, %s3525_s24 }
  0x99   : > { %p3522_p2 = pnand %p3520_p13, %p3506_p6  ;;  %p3528_p10 = scmp.lt.s32.totalorder %s3526_s21, %s3519_s14 }
  0x9b   : > { %p3523_p4 = pneg %p3522_p2  ;;  %p3529_p7 = por %p3528_p10, %p3527_p8 }
  0x9d   : > { %p3530_p1 = pnand %p3529_p7, %p3523_p4 }
  0x9f   : > { %3533 = shalt.err (!%p3530_p1)
}
  0xa0   : > { %3306 = dma.hbm_to_vmem [thread:$0]  (!%p3810_p5), %s3817_s26, 3200, %s3819_s10, %s284_s29  }
  0xa1   : > { %p3926_p9 = scmp.ne.s32.totalorder %s3920_s9, 0 }
  0xa2   : > { %s306_s23 = sand.u32 (!%p3926_p9), 1, %s3572_s27  }
  0xa3   : > { %304 = sbr.rel (%p3926_p9) target bundleno = 1198 (0x4ae), region = 48  ;;  %s307_s6 = scalar_lea.sflag (!%p3926_p9), [#allocation4], %s306_s23 }
  0xa4   : > { %s3264_s25 = smul.u32 (!%p3926_p9), 200, %s306_s23 }
  0xa6   : > { %s3849_s13 = scalar_lea.vmem (!%p3926_p9), [#allocation3], %s3264_s25 }
  0xaa   : > { %3551 = dma.done.wait (%p3803_p0), %s307_s6, 3200  }
  0xab   : > { %3553 = vsyncadd (%p3803_p0), %s307_s6, 4294964096  ;;  %p3927_p6 = scmp.eq.s32.totalorder %s3657_s8, 0 }
  0xad   : > { %3555 = dma.done.wait (%p3927_p6), [#allocation6], 100384   ;;  %p3928_p5 = pmov %p3927_p6 }
  0xaf   : > { %3557 = vsyncadd (%p3928_p5), [#allocation6], 4294866912  ;;  %p3929_p3 = pmov %p3928_p5 }
  0xb1   : > { %3559 = dma.done.wait (%p3929_p3), [#allocation9], 4112   ;;  %p3930_p11 = pmov %p3929_p3 }
  0xb2   : > { %p3931_p12 = pmov %p3929_p3 }
  0xb3   : > { %3561 = vsyncadd (%p3930_p11), [#allocation9], 4294963184 }
  0xb4   : > { %3563 = dma.done.wait (%p3931_p12), [#allocation12], 16   ;;  %p3932_p13 = pmov %p3929_p3 }
  0xb5   : > { %v390_v1 = vld [vmem:[#allocation5 + $0x8] sm:$0xff]  ;;  %v392_v2 = vld [vmem:[#allocation5 + $0x18] sm:$0xff]  ;;  %v389_v6 = vld [vmem:[#allocation5] sm:$0xff]  ;;  %vm1185_vm0 = vcmask 523264   ;;  %p360_p0 = scmp.lt.s32.totalorder %s3657_s8, 1  ;;  %vm2248_vm1 = vcmask 7168  }
  0xb6   : > { %3565 = vsyncadd (%p3932_p13), [#allocation12], 4294967280  ;;  %v774_v3 = vld [vmem:[#allocation5 + $0xc08] sm:$0xff]  ;;  %v2420_v4 = vpack.c.bf16 %v392_v2, %v390_v1  ;;  %v776_v5 = vld [vmem:[#allocation5 + $0xc18] sm:$0xff] }
  0xb7   : > { %v391_v7 = vld [vmem:[#allocation5 + $0x10] sm:$0xff]  ;;  %v2804_v8 = vpack.c.bf16 %v776_v5, %v774_v3  ;;  %v773_v10 = vld [vmem:[#allocation5 + $0xc00] sm:$0xff]  ;;  %v394_v12 = vld [vmem:[#allocation5 + $0x28] sm:$0xff]  ;;  %s3938_s8 = smov (!%p360_p0, %s3657_s8), 1 }
  0xb8   : > { %v2422_v9 = vpack.c.bf16 %v391_v7, %v389_v6  ;;  %v775_v11 = vld [vmem:[#allocation5 + $0xc10] sm:$0xff]  ;;  %2421 = vmatprep.subr.bf16.mxu1 %v2420_v4  ;;  %v396_v14 = vld [vmem:[#allocation5 + $0x38] sm:$0xff]  ;;  %v778_v15 = vld [vmem:[#allocation5 + $0xc28] sm:$0xff]  ;;  %s2378_s9 = sshll.u32 %s3938_s8, 3 }
  0xb9   : > { %v2806_v13 = vpack.c.bf16 %v775_v11, %v773_v10  ;;  %v780_v16 = vld [vmem:[#allocation5 + $0xc38] sm:$0xff]  ;;  %2805 = vmatprep.subr.bf16.mxu0 %v2804_v8  ;;  %v2424_v17 = vpack.c.bf16 %v396_v14, %v394_v12  ;;  %v393_v19 = vld [vmem:[#allocation5 + $0x20] sm:$0xff]  ;;  %v395_v20 = vld [vmem:[#allocation5 + $0x30] sm:$0xff]  ;;  %s363_s26 = scalar_lea.vmem %s3917_s7, %s2378_s9 }
  0xba   : > { %2423 = vmatpush1.bf16.msra.mxu1 %v2422_v9  ;;  %v2808_v18 = vpack.c.bf16 %v780_v16, %v778_v15  ;;  %v777_v21 = vld [vmem:[#allocation5 + $0xc20] sm:$0xff]  ;;  %v2426_v22 = vpack.c.bf16 %v395_v20, %v393_v19  ;;  %v779_v23 = vld [vmem:[#allocation5 + $0xc30] sm:$0xff]  ;;  %v398_v24 = vld [vmem:[#allocation5 + $0x48] sm:$0xff] }
  0xbb   : > { %2807 = vmatpush1.bf16.msra.mxu0 %v2806_v13  ;;  %v400_v25 = vld [vmem:[#allocation5 + $0x58] sm:$0xff]  ;;  %2425 = vmatprep.subr.bf16.mxu1 %v2424_v17  ;;  %v2810_v26 = vpack.c.bf16 %v779_v23, %v777_v21  ;;  %v782_v28 = vld [vmem:[#allocation5 + $0xc48] sm:$0xff]  ;;  %v397_v30 = vld [vmem:[#allocation5 + $0x40] sm:$0xff] }
  0xbc   : > { %2809 = vmatprep.subr.bf16.mxu0 %v2808_v18  ;;  %v2428_v27 = vpack.c.bf16 %v400_v25, %v398_v24  ;;  %v784_v29 = vld [vmem:[#allocation5 + $0xc58] sm:$0xff]  ;;  %v399_v32 = vld [vmem:[#allocation5 + $0x50] sm:$0xff]  ;;  %v781_v33 = vld [vmem:[#allocation5 + $0xc40] sm:$0xff] }
  0xbd   : > { %v2812_v31 = vpack.c.bf16 %v784_v29, %v782_v28  ;;  %v783_v34 = vld [vmem:[#allocation5 + $0xc50] sm:$0xff]  ;;  %v2430_v35 = vpack.c.bf16 %v399_v32, %v397_v30  ;;  %v402_v36 = vld [vmem:[#allocation5 + $0x68] sm:$0xff]  ;;  %v404_v37 = vld [vmem:[#allocation5 + $0x78] sm:$0xff] }
  0xbe   : > { %2427 = vmatpush1.bf16.msra.mxu1 %v2426_v22  ;;  %v786_v38 = vld [vmem:[#allocation5 + $0xc68] sm:$0xff]  ;;  %v2814_v39 = vpack.c.bf16 %v783_v34, %v781_v33  ;;  %v2432_v40 = vpack.c.bf16 %v404_v37, %v402_v36  ;;  %v788_v41 = vld [vmem:[#allocation5 + $0xc78] sm:$0xff]  ;;  %v401_v42 = vld [vmem:[#allocation5 + $0x60] sm:$0xff] }
  0xbf   : > { %2811 = vmatpush1.bf16.msra.mxu0 %v2810_v26  ;;  %2429 = vmatprep.subr.bf16.mxu1 %v2428_v27  ;;  %v403_v43 = vld [vmem:[#allocation5 + $0x70] sm:$0xff]  ;;  %v2816_v44 = vpack.c.bf16 %v788_v41, %v786_v38  ;;  %v785_v45 = vld [vmem:[#allocation5 + $0xc60] sm:$0xff]  ;;  %v406_v47 = vld [vmem:[#allocation5 + $0x88] sm:$0xff] }
  0xc0   : > { %2813 = vmatprep.subr.bf16.mxu0 %v2812_v31  ;;  %v787_v46 = vld [vmem:[#allocation5 + $0xc70] sm:$0xff]  ;;  %v408_v48 = vld [vmem:[#allocation5 + $0x98] sm:$0xff]  ;;  %v790_v49 = vld [vmem:[#allocation5 + $0xc88] sm:$0xff]  ;;  %v2434_v51 = vpack.c.bf16 %v403_v43, %v401_v42 }
  0xc1   : > { %v792_v50 = vld [vmem:[#allocation5 + $0xc98] sm:$0xff]  ;;  %v2818_v52 = vpack.c.bf16 %v787_v46, %v785_v45  ;;  %v2436_v53 = vpack.c.bf16 %v408_v48, %v406_v47  ;;  %v405_v54 = vld [vmem:[#allocation5 + $0x80] sm:$0xff]  ;;  %v407_v55 = vld [vmem:[#allocation5 + $0x90] sm:$0xff] }
  0xc2   : > { %2431 = vmatpush1.bf16.msra.mxu1 %v2430_v35  ;;  %v789_v56 = vld [vmem:[#allocation5 + $0xc80] sm:$0xff]  ;;  %v2820_v57 = vpack.c.bf16 %v792_v50, %v790_v49  ;;  %v791_v58 = vld [vmem:[#allocation5 + $0xc90] sm:$0xff]  ;;  %v410_v59 = vld [vmem:[#allocation5 + $0xa8] sm:$0xff]  ;;  %v2438_v63 = vpack.c.bf16 %v407_v55, %v405_v54 }
  0xc3   : > { %2815 = vmatpush1.bf16.msra.mxu0 %v2814_v39  ;;  %2433 = vmatprep.subr.bf16.mxu1 %v2432_v40  ;;  %v412_v60 = vld [vmem:[#allocation5 + $0xb8] sm:$0xff]  ;;  %v794_v61 = vld [vmem:[#allocation5 + $0xca8] sm:$0xff]  ;;  %v2822_v0 = vpack.c.bf16 %v791_v58, %v789_v56  ;;  %v409_v2 = vld [vmem:[#allocation5 + $0xa0] sm:$0xff] }
  0xc4   : > { %2817 = vmatprep.subr.bf16.mxu0 %v2816_v44  ;;  %v796_v62 = vld [vmem:[#allocation5 + $0xcb8] sm:$0xff]  ;;  %v2440_v1 = vpack.c.bf16 %v412_v60, %v410_v59  ;;  %v411_v3 = vld [vmem:[#allocation5 + $0xb0] sm:$0xff]  ;;  %v793_v4 = vld [vmem:[#allocation5 + $0xca0] sm:$0xff] }
  0xc5   : > { %v2824_v5 = vpack.c.bf16 %v796_v62, %v794_v61  ;;  %v795_v6 = vld [vmem:[#allocation5 + $0xcb0] sm:$0xff]  ;;  %v414_v7 = vld [vmem:[#allocation5 + $0xc8] sm:$0xff]  ;;  %v416_v8 = vld [vmem:[#allocation5 + $0xd8] sm:$0xff]  ;;  %v2442_v11 = vpack.c.bf16 %v411_v3, %v409_v2 }
  0xc6   : > { %2435 = vmatpush1.bf16.msra.mxu1 %v2434_v51  ;;  %v798_v9 = vld [vmem:[#allocation5 + $0xcc8] sm:$0xff]  ;;  %v800_v10 = vld [vmem:[#allocation5 + $0xcd8] sm:$0xff]  ;;  %v2826_v12 = vpack.c.bf16 %v795_v6, %v793_v4  ;;  %v2444_v13 = vpack.c.bf16 %v416_v8, %v414_v7  ;;  %v413_v14 = vld [vmem:[#allocation5 + $0xc0] sm:$0xff] }
  0xc7   : > { %2819 = vmatpush1.bf16.msra.mxu0 %v2818_v52  ;;  %2437 = vmatprep.subr.bf16.mxu1 %v2436_v53  ;;  %v415_v15 = vld [vmem:[#allocation5 + $0xd0] sm:$0xff]  ;;  %v797_v16 = vld [vmem:[#allocation5 + $0xcc0] sm:$0xff]  ;;  %v2828_v17 = vpack.c.bf16 %v800_v10, %v798_v9  ;;  %v418_v19 = vld [vmem:[#allocation5 + $0xe8] sm:$0xff] }
  0xc8   : > { %2821 = vmatprep.subr.bf16.mxu0 %v2820_v57  ;;  %v799_v18 = vld [vmem:[#allocation5 + $0xcd0] sm:$0xff]  ;;  %v420_v20 = vld [vmem:[#allocation5 + $0xf8] sm:$0xff]  ;;  %v802_v21 = vld [vmem:[#allocation5 + $0xce8] sm:$0xff]  ;;  %v2446_v23 = vpack.c.bf16 %v415_v15, %v413_v14 }
  0xc9   : > { %v804_v22 = vld [vmem:[#allocation5 + $0xcf8] sm:$0xff]  ;;  %v2830_v24 = vpack.c.bf16 %v799_v18, %v797_v16  ;;  %v2448_v25 = vpack.c.bf16 %v420_v20, %v418_v19  ;;  %v417_v26 = vld [vmem:[#allocation5 + $0xe0] sm:$0xff]  ;;  %v419_v27 = vld [vmem:[#allocation5 + $0xf0] sm:$0xff] }
  0xca   : > { %2439 = vmatpush1.bf16.msra.mxu1 %v2438_v63  ;;  %v801_v28 = vld [vmem:[#allocation5 + $0xce0] sm:$0xff]  ;;  %v2832_v29 = vpack.c.bf16 %v804_v22, %v802_v21  ;;  %v803_v30 = vld [vmem:[#allocation5 + $0xcf0] sm:$0xff]  ;;  %v422_v31 = vld [vmem:[#allocation5 + $0x108] sm:$0xff]  ;;  %v2450_v35 = vpack.c.bf16 %v419_v27, %v417_v26 }
  0xcb   : > { %2823 = vmatpush1.bf16.msra.mxu0 %v2822_v0  ;;  %2441 = vmatprep.subr.bf16.mxu1 %v2440_v1  ;;  %v424_v32 = vld [vmem:[#allocation5 + $0x118] sm:$0xff]  ;;  %v806_v33 = vld [vmem:[#allocation5 + $0xd08] sm:$0xff]  ;;  %v2834_v36 = vpack.c.bf16 %v803_v30, %v801_v28  ;;  %v421_v38 = vld [vmem:[#allocation5 + $0x100] sm:$0xff] }
  0xcc   : > { %2825 = vmatprep.subr.bf16.mxu0 %v2824_v5  ;;  %v808_v34 = vld [vmem:[#allocation5 + $0xd18] sm:$0xff]  ;;  %v2452_v37 = vpack.c.bf16 %v424_v32, %v422_v31  ;;  %v423_v39 = vld [vmem:[#allocation5 + $0x110] sm:$0xff]  ;;  %v805_v40 = vld [vmem:[#allocation5 + $0xd00] sm:$0xff] }
  0xcd   : > { %v2836_v41 = vpack.c.bf16 %v808_v34, %v806_v33  ;;  %v807_v42 = vld [vmem:[#allocation5 + $0xd10] sm:$0xff]  ;;  %v426_v43 = vld [vmem:[#allocation5 + $0x128] sm:$0xff]  ;;  %v428_v44 = vld [vmem:[#allocation5 + $0x138] sm:$0xff]  ;;  %v2454_v47 = vpack.c.bf16 %v423_v39, %v421_v38 }
  0xce   : > { %2443 = vmatpush1.bf16.msra.mxu1 %v2442_v11  ;;  %v810_v45 = vld [vmem:[#allocation5 + $0xd28] sm:$0xff]  ;;  %v812_v46 = vld [vmem:[#allocation5 + $0xd38] sm:$0xff]  ;;  %v2838_v48 = vpack.c.bf16 %v807_v42, %v805_v40  ;;  %v2456_v49 = vpack.c.bf16 %v428_v44, %v426_v43  ;;  %v425_v50 = vld [vmem:[#allocation5 + $0x120] sm:$0xff] }
  0xcf   : > { %2827 = vmatpush1.bf16.msra.mxu0 %v2826_v12  ;;  %2445 = vmatprep.subr.bf16.mxu1 %v2444_v13  ;;  %v427_v51 = vld [vmem:[#allocation5 + $0x130] sm:$0xff]  ;;  %v809_v52 = vld [vmem:[#allocation5 + $0xd20] sm:$0xff]  ;;  %v2840_v53 = vpack.c.bf16 %v812_v46, %v810_v45  ;;  %v430_v55 = vld [vmem:[#allocation5 + $0x148] sm:$0xff] }
  0xd0   : > { %2829 = vmatprep.subr.bf16.mxu0 %v2828_v17  ;;  %v811_v54 = vld [vmem:[#allocation5 + $0xd30] sm:$0xff]  ;;  %v432_v56 = vld [vmem:[#allocation5 + $0x158] sm:$0xff]  ;;  %v814_v57 = vld [vmem:[#allocation5 + $0xd48] sm:$0xff]  ;;  %v2458_v59 = vpack.c.bf16 %v427_v51, %v425_v50 }
  0xd1   : > { %v816_v58 = vld [vmem:[#allocation5 + $0xd58] sm:$0xff]  ;;  %v2842_v60 = vpack.c.bf16 %v811_v54, %v809_v52  ;;  %v2460_v61 = vpack.c.bf16 %v432_v56, %v430_v55  ;;  %v429_v62 = vld [vmem:[#allocation5 + $0x140] sm:$0xff]  ;;  %v431_v63 = vld [vmem:[#allocation5 + $0x150] sm:$0xff] }
  0xd2   : > { %2447 = vmatpush1.bf16.msra.mxu1 %v2446_v23  ;;  %v813_v0 = vld [vmem:[#allocation5 + $0xd40] sm:$0xff]  ;;  %v2844_v1 = vpack.c.bf16 %v816_v58, %v814_v57  ;;  %v815_v2 = vld [vmem:[#allocation5 + $0xd50] sm:$0xff]  ;;  %v434_v3 = vld [vmem:[#allocation5 + $0x168] sm:$0xff]  ;;  %v2462_v7 = vpack.c.bf16 %v431_v63, %v429_v62 }
  0xd3   : > { %2831 = vmatpush1.bf16.msra.mxu0 %v2830_v24  ;;  %2449 = vmatprep.subr.bf16.mxu1 %v2448_v25  ;;  %v436_v4 = vld [vmem:[#allocation5 + $0x178] sm:$0xff]  ;;  %v818_v5 = vld [vmem:[#allocation5 + $0xd68] sm:$0xff]  ;;  %v433_v8 = vld [vmem:[#allocation5 + $0x160] sm:$0xff]  ;;  %v2846_v9 = vpack.c.bf16 %v815_v2, %v813_v0 }
  0xd4   : > { %2833 = vmatprep.subr.bf16.mxu0 %v2832_v29  ;;  %v820_v6 = vld [vmem:[#allocation5 + $0xd78] sm:$0xff]  ;;  %v2464_v10 = vpack.c.bf16 %v436_v4, %v434_v3  ;;  %v435_v11 = vld [vmem:[#allocation5 + $0x170] sm:$0xff]  ;;  %v817_v12 = vld [vmem:[#allocation5 + $0xd60] sm:$0xff] }
  0xd5   : > { %v819_v13 = vld [vmem:[#allocation5 + $0xd70] sm:$0xff]  ;;  %v2848_v14 = vpack.c.bf16 %v820_v6, %v818_v5  ;;  %v438_v15 = vld [vmem:[#allocation5 + $0x188] sm:$0xff]  ;;  %v440_v16 = vld [vmem:[#allocation5 + $0x198] sm:$0xff]  ;;  %v2466_v21 = vpack.c.bf16 %v435_v11, %v433_v8 }
  0xd6   : > { %2451 = vmatpush1.bf16.msra.mxu1 %v2450_v35  ;;  %v365_v17 = vld [vmem:[%s3849_s13 + $0x8] sm:$0xff]  ;;  %v822_v18 = vld [vmem:[#allocation5 + $0xd88] sm:$0xff]  ;;  %v2850_v22 = vpack.c.bf16 %v819_v13, %v817_v12  ;;  %v2468_v23 = vpack.c.bf16 %v440_v16, %v438_v15  ;;  %v439_v25 = vld [vmem:[#allocation5 + $0x190] sm:$0xff] }
  0xd7   : > { %2835 = vmatpush1.bf16.msra.mxu0 %v2834_v36  ;;  %2453 = vmatprep.subr.bf16.mxu1 %v2452_v37  ;;  %v824_v19 = vld [vmem:[#allocation5 + $0xd98] sm:$0xff]  ;;  %v437_v24 = vld [vmem:[#allocation5 + $0x180] sm:$0xff]  ;;  %v823_v28 = vld [vmem:[#allocation5 + $0xd90] sm:$0xff] }
  0xd8   : > { %2837 = vmatprep.subr.bf16.mxu0 %v2836_v41  ;;  %1253 = vmatprep.mubr.f32.mxu1 %v365_v17  ;;  %v377_v20 = vld [vmem:[%s3849_s13 + $0x68] sm:$0xff]  ;;  %v2852_v27 = vpack.c.bf16 %v824_v19, %v822_v18  ;;  %v442_v29 = vld [vmem:[#allocation5 + $0x1a8] sm:$0xff]  ;;  %v2470_v33 = vpack.c.bf16 %v439_v25, %v437_v24  ;;  %v443_v37 = vld [vmem:[#allocation5 + $0x1b0] sm:$0xff] }
  0xd9   : > { %1679 = vmatprep.mubr.f32.mxu0 %v377_v20  ;;  %v821_v26 = vld [vmem:[#allocation5 + $0xd80] sm:$0xff]  ;;  %v444_v30 = vld [vmem:[#allocation5 + $0x1b8] sm:$0xff]  ;;  %v826_v31 = vld [vmem:[#allocation5 + $0xda8] sm:$0xff] }
  0xda   : > { %2455 = vmatpush1.bf16.msra.mxu1 %v2454_v47  ;;  %v828_v32 = vld [vmem:[#allocation5 + $0xdb8] sm:$0xff]  ;;  %v2854_v34 = vpack.c.bf16 %v823_v28, %v821_v26  ;;  %v2472_v35 = vpack.c.bf16 %v444_v30, %v442_v29  ;;  %v441_v36 = vld [vmem:[#allocation5 + $0x1a0] sm:$0xff]  ;;  %v827_v40 = vld [vmem:[#allocation5 + $0xdb0] sm:$0xff] }
  0xdb   : > { %2839 = vmatpush1.bf16.msra.mxu0 %v2838_v48  ;;  %2457 = vmatprep.subr.bf16.mxu1 %v2456_v49  ;;  %v825_v38 = vld [vmem:[#allocation5 + $0xda0] sm:$0xff]  ;;  %v2856_v39 = vpack.c.bf16 %v828_v32, %v826_v31  ;;  %v446_v41 = vld [vmem:[#allocation5 + $0x1c8] sm:$0xff]  ;;  %v448_v42 = vld [vmem:[#allocation5 + $0x1d8] sm:$0xff]  ;;  %v2474_v45 = vpack.c.bf16 %v443_v37, %v441_v36 }
  0xdc   : > { %2841 = vmatprep.subr.bf16.mxu0 %v2840_v53  ;;  %v830_v43 = vld [vmem:[#allocation5 + $0xdc8] sm:$0xff]  ;;  %v832_v44 = vld [vmem:[#allocation5 + $0xdd8] sm:$0xff]  ;;  %v2858_v46 = vpack.c.bf16 %v827_v40, %v825_v38  ;;  %v2476_v47 = vpack.c.bf16 %v448_v42, %v446_v41  ;;  %v445_v48 = vld [vmem:[#allocation5 + $0x1c0] sm:$0xff] }
  0xdd   : > { %v447_v49 = vld [vmem:[#allocation5 + $0x1d0] sm:$0xff]  ;;  %v829_v50 = vld [vmem:[#allocation5 + $0xdc0] sm:$0xff]  ;;  %v2860_v51 = vpack.c.bf16 %v832_v44, %v830_v43  ;;  %v450_v53 = vld [vmem:[#allocation5 + $0x1e8] sm:$0xff] }
  0xde   : > { %2459 = vmatpush1.bf16.msra.mxu1 %v2458_v59  ;;  %v831_v52 = vld [vmem:[#allocation5 + $0xdd0] sm:$0xff]  ;;  %v452_v54 = vld [vmem:[#allocation5 + $0x1f8] sm:$0xff]  ;;  %v834_v55 = vld [vmem:[#allocation5 + $0xde8] sm:$0xff]  ;;  %v2478_v57 = vpack.c.bf16 %v447_v49, %v445_v48 }
  0xdf   : > { %2843 = vmatpush1.bf16.msra.mxu0 %v2842_v60  ;;  %2461 = vmatprep.subr.bf16.mxu1 %v2460_v61  ;;  %v836_v56 = vld [vmem:[#allocation5 + $0xdf8] sm:$0xff]  ;;  %v2862_v58 = vpack.c.bf16 %v831_v52, %v829_v50  ;;  %v2480_v59 = vpack.c.bf16 %v452_v54, %v450_v53  ;;  %v449_v60 = vld [vmem:[#allocation5 + $0x1e0] sm:$0xff]  ;;  %v451_v61 = vld [vmem:[#allocation5 + $0x1f0] sm:$0xff] }
  0xe0   : > { %2845 = vmatprep.subr.bf16.mxu0 %v2844_v1  ;;  %v833_v62 = vld [vmem:[#allocation5 + $0xde0] sm:$0xff]  ;;  %v2864_v63 = vpack.c.bf16 %v836_v56, %v834_v55  ;;  %v835_v0 = vld [vmem:[#allocation5 + $0xdf0] sm:$0xff]  ;;  %v454_v1 = vld [vmem:[#allocation5 + $0x208] sm:$0xff]  ;;  %v2482_v5 = vpack.c.bf16 %v451_v61, %v449_v60 }
  0xe1   : > { %v456_v2 = vld [vmem:[#allocation5 + $0x218] sm:$0xff]  ;;  %v838_v3 = vld [vmem:[#allocation5 + $0xe08] sm:$0xff]  ;;  %v2866_v6 = vpack.c.bf16 %v835_v0, %v833_v62  ;;  %v453_v8 = vld [vmem:[#allocation5 + $0x200] sm:$0xff] }
  0xe2   : > { %2463 = vmatpush1.bf16.msra.mxu1 %v2462_v7  ;;  %v840_v4 = vld [vmem:[#allocation5 + $0xe18] sm:$0xff]  ;;  %v2484_v7 = vpack.c.bf16 %v456_v2, %v454_v1  ;;  %v839_v12 = vld [vmem:[#allocation5 + $0xe10] sm:$0xff]  ;;  %v458_v13 = vld [vmem:[#allocation5 + $0x228] sm:$0xff] }
  0xe3   : > { %2847 = vmatpush1.bf16.msra.mxu0 %v2846_v9  ;;  %2465 = vmatprep.subr.bf16.mxu1 %v2464_v10  ;;  %v455_v9 = vld [vmem:[#allocation5 + $0x210] sm:$0xff]  ;;  %v837_v10 = vld [vmem:[#allocation5 + $0xe00] sm:$0xff]  ;;  %v2868_v11 = vpack.c.bf16 %v840_v4, %v838_v3  ;;  %v842_v15 = vld [vmem:[#allocation5 + $0xe28] sm:$0xff] }
  0xe4   : > { %2849 = vmatprep.subr.bf16.mxu0 %v2848_v14  ;;  %v460_v14 = vld [vmem:[#allocation5 + $0x238] sm:$0xff]  ;;  %v2486_v18 = vpack.c.bf16 %v455_v9, %v453_v8  ;;  %v2870_v20 = vpack.c.bf16 %v839_v12, %v837_v10  ;;  %v841_v24 = vld [vmem:[#allocation5 + $0xe20] sm:$0xff]  ;;  %v843_v26 = vld [vmem:[#allocation5 + $0xe30] sm:$0xff] }
  0xe5   : > { %v844_v16 = vld [vmem:[#allocation5 + $0xe38] sm:$0xff]  ;;  %v846_v29 = vld [vmem:[#allocation5 + $0xe48] sm:$0xff]  ;;  %v2874_v32 = vpack.c.bf16 %v843_v26, %v841_v24  ;;  %v845_v36 = vld [vmem:[#allocation5 + $0xe40] sm:$0xff] }
  0xe6   : > { %2467 = vmatpush1.bf16.msra.mxu1 %v2466_v21  ;;  %v364_v17 = vld [vmem:[%s3849_s13] sm:$0xff]  ;;  %v2488_v21 = vpack.c.bf16 %v460_v14, %v458_v13  ;;  %v2872_v25 = vpack.c.bf16 %v844_v16, %v842_v15  ;;  %v850_v41 = vld [vmem:[#allocation5 + $0xe68] sm:$0xff]  ;;  %v849_v48 = vld [vmem:[#allocation5 + $0xe60] sm:$0xff] }
  0xe7   : > { %2851 = vmatpush1.bf16.msra.mxu0 %v2850_v22  ;;  %2469 = vmatprep.subr.bf16.mxu1 %v2468_v23  ;;  %v376_v19 = vld [vmem:[%s3849_s13 + $0x60] sm:$0xff]  ;;  %v457_v22 = vld [vmem:[#allocation5 + $0x220] sm:$0xff]  ;;  %v854_v53 = vld [vmem:[#allocation5 + $0xe88] sm:$0xff] }
  0xe8   : > { %2853 = vmatprep.subr.bf16.mxu0 %v2852_v27  ;;  %v459_v23 = vld [vmem:[#allocation5 + $0x230] sm:$0xff]  ;;  %v462_v27 = vld [vmem:[#allocation5 + $0x248] sm:$0xff]  ;;  %v464_v28 = vld [vmem:[#allocation5 + $0x258] sm:$0xff] }
  0xe9   : > { %v848_v30 = vld [vmem:[#allocation5 + $0xe58] sm:$0xff]  ;;  %v2490_v31 = vpack.c.bf16 %v459_v23, %v457_v22  ;;  %v847_v38 = vld [vmem:[#allocation5 + $0xe50] sm:$0xff]  ;;  %v853_v60 = vld [vmem:[#allocation5 + $0xe80] sm:$0xff] }
  0xea   : > { %2471 = vmatpush1.bf16.msra.mxu1 %v2470_v33  ;;  %v2492_v33 = vpack.c.bf16 %v464_v28, %v462_v27  ;;  %v2876_v37 = vpack.c.bf16 %v848_v30, %v846_v29  ;;  %v468_v40 = vld [vmem:[#allocation5 + $0x278] sm:$0xff]  ;;  %v2878_v44 = vpack.c.bf16 %v847_v38, %v845_v36  ;;  %v851_v50 = vld [vmem:[#allocation5 + $0xe70] sm:$0xff]  ;;  %v858_v1 = vld [vmem:[#allocation5 + $0xea8] sm:$0xff] }
  0xeb   : > { %2855 = vmatpush1.bf16.msra.mxu0 %v2854_v34  ;;  %2473 = vmatprep.subr.bf16.mxu1 %v2472_v35  ;;  %v461_v34 = vld [vmem:[#allocation5 + $0x240] sm:$0xff]  ;;  %v463_v35 = vld [vmem:[#allocation5 + $0x250] sm:$0xff]  ;;  %v852_v42 = vld [vmem:[#allocation5 + $0xe78] sm:$0xff]  ;;  %v2882_v56 = vpack.c.bf16 %v851_v50, %v849_v48 }
  0xec   : > { %2857 = vmatprep.subr.bf16.mxu0 %v2856_v39  ;;  %v466_v39 = vld [vmem:[#allocation5 + $0x268] sm:$0xff]  ;;  %v2494_v43 = vpack.c.bf16 %v463_v35, %v461_v34  ;;  %v2880_v49 = vpack.c.bf16 %v852_v42, %v850_v41  ;;  %v472_v52 = vld [vmem:[#allocation5 + $0x298] sm:$0xff]  ;;  %v855_v62 = vld [vmem:[#allocation5 + $0xe90] sm:$0xff] }
  0xed   : > { %v856_v54 = vld [vmem:[#allocation5 + $0xe98] sm:$0xff]  ;;  %v2886_v4 = vpack.c.bf16 %v855_v62, %v853_v60  ;;  %v857_v8 = vld [vmem:[#allocation5 + $0xea0] sm:$0xff]  ;;  %v859_v10 = vld [vmem:[#allocation5 + $0xeb0] sm:$0xff] }
  0xee   : > { %2475 = vmatpush1.bf16.msra.mxu1 %v2474_v45  ;;  %v2496_v45 = vpack.c.bf16 %v468_v40, %v466_v39  ;;  %v2884_v61 = vpack.c.bf16 %v856_v54, %v854_v53  ;;  %v476_v0 = vld [vmem:[#allocation5 + $0x2b8] sm:$0xff]  ;;  %v862_v13 = vld [vmem:[#allocation5 + $0xec8] sm:$0xff]  ;;  %v477_v16 = vld [vmem:[#allocation5 + $0x2c0] sm:$0xff] }
  0xef   : > { %2859 = vmatpush1.bf16.msra.mxu0 %v2858_v46  ;;  %2477 = vmatprep.subr.bf16.mxu1 %v2476_v47  ;;  %v465_v46 = vld [vmem:[#allocation5 + $0x260] sm:$0xff]  ;;  %v467_v47 = vld [vmem:[#allocation5 + $0x270] sm:$0xff]  ;;  %v860_v2 = vld [vmem:[#allocation5 + $0xeb8] sm:$0xff] }
  0xf0   : > { %2861 = vmatprep.subr.bf16.mxu0 %v2860_v51  ;;  %v470_v51 = vld [vmem:[#allocation5 + $0x288] sm:$0xff]  ;;  %v2498_v55 = vpack.c.bf16 %v467_v47, %v465_v46  ;;  %v2888_v9 = vpack.c.bf16 %v860_v2, %v858_v1  ;;  %v480_v12 = vld [vmem:[#allocation5 + $0x2d8] sm:$0xff]  ;;  %v865_v34 = vld [vmem:[#allocation5 + $0xee0] sm:$0xff] }
  0xf1   : > { %v864_v14 = vld [vmem:[#allocation5 + $0xed8] sm:$0xff]  ;;  %v482_v23 = vld [vmem:[#allocation5 + $0x2e8] sm:$0xff]  ;;  %v867_v36 = vld [vmem:[#allocation5 + $0xef0] sm:$0xff] }
  0xf2   : > { %2479 = vmatpush1.bf16.msra.mxu1 %v2478_v57  ;;  %v2500_v57 = vpack.c.bf16 %v472_v52, %v470_v51  ;;  %v2892_v22 = vpack.c.bf16 %v864_v14, %v862_v13  ;;  %v484_v24 = vld [vmem:[#allocation5 + $0x2f8] sm:$0xff]  ;;  %v866_v26 = vld [vmem:[#allocation5 + $0xee8] sm:$0xff]  ;;  %v2898_v42 = vpack.c.bf16 %v867_v36, %v865_v34  ;;  %v869_v46 = vld [vmem:[#allocation5 + $0xf00] sm:$0xff] }
  0xf3   : > { %2863 = vmatpush1.bf16.msra.mxu0 %v2862_v58  ;;  %2481 = vmatprep.subr.bf16.mxu1 %v2480_v59  ;;  %v469_v58 = vld [vmem:[#allocation5 + $0x280] sm:$0xff]  ;;  %v471_v59 = vld [vmem:[#allocation5 + $0x290] sm:$0xff]  ;;  %v868_v27 = vld [vmem:[#allocation5 + $0xef8] sm:$0xff] }
  0xf4   : > { %2865 = vmatprep.subr.bf16.mxu0 %v2864_v63  ;;  %v474_v63 = vld [vmem:[#allocation5 + $0x2a8] sm:$0xff]  ;;  %v2502_v3 = vpack.c.bf16 %v471_v59, %v469_v58  ;;  %v2896_v35 = vpack.c.bf16 %v868_v27, %v866_v26  ;;  %v488_v38 = vld [vmem:[#allocation5 + $0x318] sm:$0xff]  ;;  %v871_v48 = vld [vmem:[#allocation5 + $0xf10] sm:$0xff] }
  0xf5   : > { %v379_v28 = vld [vmem:[%s3849_s13 + $0x78] sm:$0xff]  ;;  %v872_v40 = vld [vmem:[#allocation5 + $0xf18] sm:$0xff]  ;;  %v2902_v54 = vpack.c.bf16 %v871_v48, %v869_v46  ;;  %v873_v58 = vld [vmem:[#allocation5 + $0xf20] sm:$0xff] }
  0xf6   : > { %2483 = vmatpush1.bf16.msra.mxu1 %v2482_v5  ;;  %v2504_v5 = vpack.c.bf16 %v476_v0, %v474_v63  ;;  %v870_v39 = vld [vmem:[#allocation5 + $0xf08] sm:$0xff]  ;;  %v492_v50 = vld [vmem:[#allocation5 + $0x338] sm:$0xff]  ;;  %v875_v60 = vld [vmem:[#allocation5 + $0xf30] sm:$0xff] }
  0xf7   : > { %2867 = vmatpush1.bf16.msra.mxu0 %v2866_v6  ;;  %2485 = vmatprep.subr.bf16.mxu1 %v2484_v7  ;;  %v473_v6 = vld [vmem:[#allocation5 + $0x2a0] sm:$0xff]  ;;  %v475_v7 = vld [vmem:[#allocation5 + $0x2b0] sm:$0xff]  ;;  %v2900_v47 = vpack.c.bf16 %v872_v40, %v870_v39  ;;  %v874_v51 = vld [vmem:[#allocation5 + $0xf28] sm:$0xff]  ;;  %v2906_v2 = vpack.c.bf16 %v875_v60, %v873_v58 }
  0xf8   : > { %2869 = vmatprep.subr.bf16.mxu0 %v2868_v11  ;;  %v478_v11 = vld [vmem:[#allocation5 + $0x2c8] sm:$0xff]  ;;  %v2506_v15 = vpack.c.bf16 %v475_v7, %v473_v6  ;;  %v876_v52 = vld [vmem:[#allocation5 + $0xf38] sm:$0xff]  ;;  %v877_v6 = vld [vmem:[#allocation5 + $0xf40] sm:$0xff] }
  0xf9   : > { %1254 = vmatmul.mubr.f32.vlgmr.msra.gmra.mrb[0].mxu1 %v364_v17  ;;  %v2890_v17 = vpack.c.bf16 %v859_v10, %v857_v8  ;;  %v2904_v59 = vpack.c.bf16 %v876_v52, %v874_v51  ;;  %v496_v62 = vld [vmem:[#allocation5 + $0x358] sm:$0xff]  ;;  %v878_v63 = vld [vmem:[#allocation5 + $0xf48] sm:$0xff]  ;;  %v879_v8 = vld [vmem:[#allocation5 + $0xf50] sm:$0xff] }
  0xfa   : > { %2487 = vmatpush1.bf16.msra.mxu1 %v2486_v18  ;;  %1680 = vmatmul.mubr.f32.vlgmr.msra.gmra.mrb[0].mxu0 %v376_v19  ;;  %v2508_v18 = vpack.c.bf16 %v480_v12, %v478_v11  ;;  %v479_v19 = vld [vmem:[#allocation5 + $0x2d0] sm:$0xff]  ;;  %v880_v0 = vld [vmem:[#allocation5 + $0xf58] sm:$0xff]  ;;  %v882_v11 = vld [vmem:[#allocation5 + $0xf68] sm:$0xff]  ;;  %v2910_v14 = vpack.c.bf16 %v879_v8, %v877_v6 }
  0xfb   : > { %2871 = vmatpush1.bf16.msra.mxu0 %v2870_v20  ;;  %2489 = vmatprep.subr.bf16.mxu1 %v2488_v21  ;;  %v861_v20 = vld [vmem:[#allocation5 + $0xec0] sm:$0xff]  ;;  %v863_v21 = vld [vmem:[#allocation5 + $0xed0] sm:$0xff]  ;;  %v2510_v29 = vpack.c.bf16 %v479_v19, %v477_v16  ;;  %v2908_v7 = vpack.c.bf16 %v880_v0, %v878_v63  ;;  %v500_v10 = vld [vmem:[#allocation5 + $0x378] sm:$0xff] }
  0xfc   : > { %2873 = vmatprep.subr.bf16.mxu0 %v2872_v25  ;;  %v367_v25 = vld [vmem:[%s3849_s13 + $0x18] sm:$0xff]  ;;  %1750 = vmatprep.mubr.f32.mxu0 %v379_v28  ;;  %v2894_v30 = vpack.c.bf16 %v863_v21, %v861_v20  ;;  %v884_v12 = vld [vmem:[#allocation5 + $0xf78] sm:$0xff]  ;;  %v497_v16 = vld [vmem:[#allocation5 + $0x360] sm:$0xff] }
  0xfd   : > { %1324 = vmatprep.mubr.f32.mxu1 %v367_v25  ;;  %v2912_v19 = vpack.c.bf16 %v884_v12, %v882_v11  ;;  %v883_v20 = vld [vmem:[#allocation5 + $0xf70] sm:$0xff]  ;;  %v502_v21 = vld [vmem:[#allocation5 + $0x388] sm:$0xff]  ;;  %v501_v28 = vld [vmem:[#allocation5 + $0x380] sm:$0xff] }
  0xfe   : > { %2491 = vmatpush1.bf16.msra.mxu1 %v2490_v31  ;;  %v2512_v31 = vpack.c.bf16 %v484_v24, %v482_v23  ;;  %v886_v23 = vld [vmem:[#allocation5 + $0xf88] sm:$0xff]  ;;  %v888_v24 = vld [vmem:[#allocation5 + $0xf98] sm:$0xff]  ;;  %v505_v40 = vld [vmem:[#allocation5 + $0x3a0] sm:$0xff] }
  0xff   : > { %2875 = vmatpush1.bf16.msra.mxu0 %v2874_v32  ;;  %2493 = vmatprep.subr.bf16.mxu1 %v2492_v33  ;;  %v481_v32 = vld [vmem:[#allocation5 + $0x2e0] sm:$0xff]  ;;  %v483_v33 = vld [vmem:[#allocation5 + $0x2f0] sm:$0xff]  ;;  %v508_v34 = vld [vmem:[#allocation5 + $0x3b8] sm:$0xff] }
 0x100   : > { %2877 = vmatprep.subr.bf16.mxu0 %v2876_v37  ;;  %v486_v37 = vld [vmem:[#allocation5 + $0x308] sm:$0xff]  ;;  %v2514_v41 = vpack.c.bf16 %v483_v33, %v481_v32  ;;  %v887_v32 = vld [vmem:[#allocation5 + $0xf90] sm:$0xff]  ;;  %v892_v36 = vld [vmem:[#allocation5 + $0xfb8] sm:$0xff] }
 0x101   : > { %v506_v33 = vld [vmem:[#allocation5 + $0x3a8] sm:$0xff]  ;;  %v512_v46 = vld [vmem:[#allocation5 + $0x3d8] sm:$0xff]  ;;  %v509_v52 = vld [vmem:[#allocation5 + $0x3c0] sm:$0xff] }
 0x102   : > { %2495 = vmatpush1.bf16.msra.mxu1 %v2494_v43  ;;  %v2516_v43 = vpack.c.bf16 %v488_v38, %v486_v37  ;;  %v2536_v39 = vpack.c.bf16 %v508_v34, %v506_v33  ;;  %v896_v48 = vld [vmem:[#allocation5 + $0xfd8] sm:$0xff]  ;;  %v513_v0 = vld [vmem:[#allocation5 + $0x3e0] sm:$0xff]  ;;  %v910_v33 = vld [vmem:[#allocation5 + $0x1048] sm:$0xff] }
 0x103   : > { %2879 = vmatpush1.bf16.msra.mxu0 %v2878_v44  ;;  %2497 = vmatprep.subr.bf16.mxu1 %v2496_v45  ;;  %v485_v44 = vld [vmem:[#allocation5 + $0x300] sm:$0xff]  ;;  %v487_v45 = vld [vmem:[#allocation5 + $0x310] sm:$0xff]  ;;  %v516_v58 = vld [vmem:[#allocation5 + $0x3f8] sm:$0xff] }
 0x104   : > { %2881 = vmatprep.subr.bf16.mxu0 %v2880_v49  ;;  %v490_v49 = vld [vmem:[#allocation5 + $0x328] sm:$0xff]  ;;  %v2518_v53 = vpack.c.bf16 %v487_v45, %v485_v44  ;;  %v891_v44 = vld [vmem:[#allocation5 + $0xfb0] sm:$0xff]  ;;  %v900_v60 = vld [vmem:[#allocation5 + $0xff8] sm:$0xff] }
 0x105   : > { %v510_v45 = vld [vmem:[#allocation5 + $0x3c8] sm:$0xff]  ;;  %v520_v6 = vld [vmem:[#allocation5 + $0x418] sm:$0xff]  ;;  %v517_v12 = vld [vmem:[#allocation5 + $0x400] sm:$0xff] }
 0x106   : > { %2499 = vmatpush1.bf16.msra.mxu1 %v2498_v55  ;;  %v2520_v55 = vpack.c.bf16 %v492_v50, %v490_v49  ;;  %v2540_v51 = vpack.c.bf16 %v512_v46, %v510_v45  ;;  %v904_v8 = vld [vmem:[#allocation5 + $0x1018] sm:$0xff]  ;;  %v530_v45 = vld [vmem:[#allocation5 + $0x468] sm:$0xff] }
 0x107   : > { %2883 = vmatpush1.bf16.msra.mxu0 %v2882_v56  ;;  %2501 = vmatprep.subr.bf16.mxu1 %v2500_v57  ;;  %v489_v56 = vld [vmem:[#allocation5 + $0x320] sm:$0xff]  ;;  %v491_v57 = vld [vmem:[#allocation5 + $0x330] sm:$0xff]  ;;  %v912_v34 = vld [vmem:[#allocation5 + $0x1058] sm:$0xff] }
 0x108   : > { %2885 = vmatprep.subr.bf16.mxu0 %v2884_v61  ;;  %v494_v61 = vld [vmem:[#allocation5 + $0x348] sm:$0xff]  ;;  %v2522_v1 = vpack.c.bf16 %v491_v57, %v489_v56  ;;  %v895_v56 = vld [vmem:[#allocation5 + $0xfd0] sm:$0xff]  ;;  %v532_v46 = vld [vmem:[#allocation5 + $0x478] sm:$0xff] }
 0x109   : > { %v514_v57 = vld [vmem:[#allocation5 + $0x3e8] sm:$0xff] }
 0x10a   : > { %2503 = vmatpush1.bf16.msra.mxu1 %v2502_v3  ;;  %v2524_v3 = vpack.c.bf16 %v496_v62, %v494_v61  ;;  %v2544_v63 = vpack.c.bf16 %v516_v58, %v514_v57  ;;  %v534_v57 = vld [vmem:[#allocation5 + $0x488] sm:$0xff]  ;;  %v536_v58 = vld [vmem:[#allocation5 + $0x498] sm:$0xff] }
 0x10b   : > { %2887 = vmatpush1.bf16.msra.mxu0 %v2886_v4  ;;  %2505 = vmatprep.subr.bf16.mxu1 %v2504_v5  ;;  %v493_v4 = vld [vmem:[#allocation5 + $0x340] sm:$0xff]  ;;  %v495_v5 = vld [vmem:[#allocation5 + $0x350] sm:$0xff] }
 0x10c   : > { %2889 = vmatprep.subr.bf16.mxu0 %v2888_v9  ;;  %v498_v9 = vld [vmem:[#allocation5 + $0x368] sm:$0xff]  ;;  %v2526_v13 = vpack.c.bf16 %v495_v5, %v493_v4  ;;  %v899_v4 = vld [vmem:[#allocation5 + $0xff0] sm:$0xff] }
 0x10d   : > { %v518_v5 = vld [vmem:[#allocation5 + $0x408] sm:$0xff] }
 0x10e   : > { %2507 = vmatpush1.bf16.msra.mxu1 %v2506_v15  ;;  %v2528_v15 = vpack.c.bf16 %v500_v10, %v498_v9  ;;  %v2548_v11 = vpack.c.bf16 %v520_v6, %v518_v5  ;;  %v538_v5 = vld [vmem:[#allocation5 + $0x4a8] sm:$0xff]  ;;  %v540_v6 = vld [vmem:[#allocation5 + $0x4b8] sm:$0xff] }
 0x10f   : > { %2891 = vmatpush1.bf16.msra.mxu0 %v2890_v17  ;;  %2509 = vmatprep.subr.bf16.mxu1 %v2508_v18  ;;  %v499_v17 = vld [vmem:[#allocation5 + $0x370] sm:$0xff]  ;;  %v881_v18 = vld [vmem:[#allocation5 + $0xf60] sm:$0xff] }
 0x110   : > { %2893 = vmatprep.subr.bf16.mxu0 %v2892_v22  ;;  %v504_v22 = vld [vmem:[#allocation5 + $0x398] sm:$0xff]  ;;  %v2530_v25 = vpack.c.bf16 %v499_v17, %v497_v16  ;;  %v2914_v26 = vpack.c.bf16 %v883_v20, %v881_v18  ;;  %v903_v16 = vld [vmem:[#allocation5 + $0x1010] sm:$0xff]  ;;  %v522_v17 = vld [vmem:[#allocation5 + $0x428] sm:$0xff] }
 0x111   : > { %v2532_v27 = vpack.c.bf16 %v504_v22, %v502_v21  ;;  %v524_v18 = vld [vmem:[#allocation5 + $0x438] sm:$0xff]  ;;  %v366_v21 = vld [vmem:[%s3849_s13 + $0x10] sm:$0xff] }
 0x112   : > { %2511 = vmatpush1.bf16.msra.mxu1 %v2510_v29  ;;  %v503_v29 = vld [vmem:[#allocation5 + $0x390] sm:$0xff]  ;;  %v908_v20 = vld [vmem:[#allocation5 + $0x1038] sm:$0xff] }
 0x113   : > { %2895 = vmatpush1.bf16.msra.mxu0 %v2894_v30  ;;  %2513 = vmatprep.subr.bf16.mxu1 %v2512_v31  ;;  %v885_v30 = vld [vmem:[#allocation5 + $0xf80] sm:$0xff]  ;;  %v2916_v31 = vpack.c.bf16 %v888_v24, %v886_v23  ;;  %v2534_v37 = vpack.c.bf16 %v503_v29, %v501_v28 }
 0x114   : > { %2897 = vmatprep.subr.bf16.mxu0 %v2896_v35  ;;  %v890_v35 = vld [vmem:[#allocation5 + $0xfa8] sm:$0xff]  ;;  %v2918_v38 = vpack.c.bf16 %v887_v32, %v885_v30  ;;  %v905_v28 = vld [vmem:[#allocation5 + $0x1020] sm:$0xff]  ;;  %v907_v30 = vld [vmem:[#allocation5 + $0x1030] sm:$0xff] }
 0x115   : > { %v378_v23 = vld [vmem:[%s3849_s13 + $0x70] sm:$0xff]  ;;  %v528_v32 = vld [vmem:[#allocation5 + $0x458] sm:$0xff] }
 0x116   : > { %2515 = vmatpush1.bf16.msra.mxu1 %v2514_v41  ;;  %v507_v41 = vld [vmem:[#allocation5 + $0x3b0] sm:$0xff] }
 0x117   : > { %2899 = vmatpush1.bf16.msra.mxu0 %v2898_v42  ;;  %2517 = vmatprep.subr.bf16.mxu1 %v2516_v43  ;;  %v889_v42 = vld [vmem:[#allocation5 + $0xfa0] sm:$0xff]  ;;  %v2920_v43 = vpack.c.bf16 %v892_v36, %v890_v35  ;;  %v2538_v49 = vpack.c.bf16 %v507_v41, %v505_v40  ;;  %v527_v41 = vld [vmem:[#allocation5 + $0x450] sm:$0xff] }
 0x118   : > { %2901 = vmatprep.subr.bf16.mxu0 %v2900_v47  ;;  %v894_v47 = vld [vmem:[#allocation5 + $0xfc8] sm:$0xff]  ;;  %v2922_v50 = vpack.c.bf16 %v891_v44, %v889_v42  ;;  %v369_v35 = vld [vmem:[%s3849_s13 + $0x28] sm:$0xff]  ;;  %v911_v44 = vld [vmem:[#allocation5 + $0x1050] sm:$0xff] }
 0x119   : > { %v525_v40 = vld [vmem:[#allocation5 + $0x440] sm:$0xff] }
 0x11a   : > { %2519 = vmatpush1.bf16.msra.mxu1 %v2518_v53  ;;  %v511_v53 = vld [vmem:[#allocation5 + $0x3d0] sm:$0xff]  ;;  %v909_v42 = vld [vmem:[#allocation5 + $0x1040] sm:$0xff] }
 0x11b   : > { %2903 = vmatpush1.bf16.msra.mxu0 %v2902_v54  ;;  %2521 = vmatprep.subr.bf16.mxu1 %v2520_v55  ;;  %v893_v54 = vld [vmem:[#allocation5 + $0xfc0] sm:$0xff]  ;;  %v2924_v55 = vpack.c.bf16 %v896_v48, %v894_v47  ;;  %v2542_v61 = vpack.c.bf16 %v511_v53, %v509_v52  ;;  %v914_v47 = vld [vmem:[#allocation5 + $0x1068] sm:$0xff]  ;;  %v916_v48 = vld [vmem:[#allocation5 + $0x1078] sm:$0xff] }
 0x11c   : > { %2905 = vmatprep.subr.bf16.mxu0 %v2904_v59  ;;  %v898_v59 = vld [vmem:[#allocation5 + $0xfe8] sm:$0xff]  ;;  %v2926_v62 = vpack.c.bf16 %v895_v56, %v893_v54  ;;  %v529_v52 = vld [vmem:[#allocation5 + $0x460] sm:$0xff]  ;;  %v531_v53 = vld [vmem:[#allocation5 + $0x470] sm:$0xff] }
 0x11d   : > { %v913_v54 = vld [vmem:[#allocation5 + $0x1060] sm:$0xff]  ;;  %v915_v56 = vld [vmem:[#allocation5 + $0x1070] sm:$0xff] }
 0x11e   : > { %2523 = vmatpush1.bf16.msra.mxu1 %v2522_v1  ;;  %v515_v1 = vld [vmem:[#allocation5 + $0x3f0] sm:$0xff] }
 0x11f   : > { %2907 = vmatpush1.bf16.msra.mxu0 %v2906_v2  ;;  %2525 = vmatprep.subr.bf16.mxu1 %v2524_v3  ;;  %v897_v2 = vld [vmem:[#allocation5 + $0xfe0] sm:$0xff]  ;;  %v2928_v3 = vpack.c.bf16 %v900_v60, %v898_v59  ;;  %v2546_v9 = vpack.c.bf16 %v515_v1, %v513_v0  ;;  %v918_v59 = vld [vmem:[#allocation5 + $0x1088] sm:$0xff]  ;;  %v920_v60 = vld [vmem:[#allocation5 + $0x1098] sm:$0xff] }
 0x120   : > { %2909 = vmatprep.subr.bf16.mxu0 %v2908_v7  ;;  %v902_v7 = vld [vmem:[#allocation5 + $0x1008] sm:$0xff]  ;;  %v2930_v10 = vpack.c.bf16 %v899_v4, %v897_v2  ;;  %v533_v0 = vld [vmem:[#allocation5 + $0x480] sm:$0xff]  ;;  %v535_v1 = vld [vmem:[#allocation5 + $0x490] sm:$0xff] }
 0x121   : > { %v917_v2 = vld [vmem:[#allocation5 + $0x1080] sm:$0xff]  ;;  %v919_v4 = vld [vmem:[#allocation5 + $0x1090] sm:$0xff] }
 0x122   : > { %2527 = vmatpush1.bf16.msra.mxu1 %v2526_v13  ;;  %v519_v13 = vld [vmem:[#allocation5 + $0x410] sm:$0xff] }
 0x123   : > { %2911 = vmatpush1.bf16.msra.mxu0 %v2910_v14  ;;  %2529 = vmatprep.subr.bf16.mxu1 %v2528_v15  ;;  %v901_v14 = vld [vmem:[#allocation5 + $0x1000] sm:$0xff]  ;;  %v2932_v15 = vpack.c.bf16 %v904_v8, %v902_v7  ;;  %v2550_v22 = vpack.c.bf16 %v519_v13, %v517_v12  ;;  %v922_v7 = vld [vmem:[#allocation5 + $0x10a8] sm:$0xff]  ;;  %v924_v8 = vld [vmem:[#allocation5 + $0x10b8] sm:$0xff] }
 0x124   : > { %2913 = vmatprep.subr.bf16.mxu0 %v2912_v19  ;;  %v906_v19 = vld [vmem:[#allocation5 + $0x1028] sm:$0xff]  ;;  %v2934_v24 = vpack.c.bf16 %v903_v16, %v901_v14  ;;  %v537_v12 = vld [vmem:[#allocation5 + $0x4a0] sm:$0xff]  ;;  %v539_v13 = vld [vmem:[#allocation5 + $0x4b0] sm:$0xff] }
 0x125   : > { %v2936_v29 = vpack.c.bf16 %v908_v20, %v906_v19  ;;  %v921_v14 = vld [vmem:[#allocation5 + $0x10a0] sm:$0xff]  ;;  %v923_v16 = vld [vmem:[#allocation5 + $0x10b0] sm:$0xff]  ;;  %v926_v19 = vld [vmem:[#allocation5 + $0x10c8] sm:$0xff] }
 0x126   : > { %2531 = vmatpush1.bf16.msra.mxu1 %v2530_v25  ;;  %v2552_v25 = vpack.c.bf16 %v524_v18, %v522_v17  ;;  %v542_v17 = vld [vmem:[#allocation5 + $0x4c8] sm:$0xff]  ;;  %v544_v18 = vld [vmem:[#allocation5 + $0x4d8] sm:$0xff] }
 0x127   : > { %2915 = vmatpush1.bf16.msra.mxu0 %v2914_v26  ;;  %2533 = vmatprep.subr.bf16.mxu1 %v2532_v27  ;;  %v521_v26 = vld [vmem:[#allocation5 + $0x420] sm:$0xff]  ;;  %v523_v27 = vld [vmem:[#allocation5 + $0x430] sm:$0xff]  ;;  %v928_v20 = vld [vmem:[#allocation5 + $0x10d8] sm:$0xff] }
 0x128   : > { %2917 = vmatprep.subr.bf16.mxu0 %v2916_v31  ;;  %v526_v31 = vld [vmem:[#allocation5 + $0x448] sm:$0xff]  ;;  %v2554_v36 = vpack.c.bf16 %v523_v27, %v521_v26  ;;  %v925_v26 = vld [vmem:[#allocation5 + $0x10c0] sm:$0xff]  ;;  %v2956_v27 = vpack.c.bf16 %v928_v20, %v926_v19 }
 0x129   : > { %v561_v20 = vld [vmem:[#allocation5 + $0x560] sm:$0xff] }
 0x12a   : > { %2535 = vmatpush1.bf16.msra.mxu1 %v2534_v37  ;;  %v381_v37 = vld [vmem:[%s3849_s13 + $0x88] sm:$0xff] }
 0x12b   : > { %2919 = vmatpush1.bf16.msra.mxu0 %v2918_v38  ;;  %2537 = vmatprep.subr.bf16.mxu1 %v2536_v39  ;;  %v2938_v38 = vpack.c.bf16 %v907_v30, %v905_v28  ;;  %v2556_v39 = vpack.c.bf16 %v528_v32, %v526_v31  ;;  %v927_v28 = vld [vmem:[#allocation5 + $0x10d0] sm:$0xff]  ;;  %v548_v30 = vld [vmem:[#allocation5 + $0x4f8] sm:$0xff]  ;;  %v930_v31 = vld [vmem:[#allocation5 + $0x10e8] sm:$0xff] }
 0x12c   : > { %2921 = vmatprep.subr.bf16.mxu0 %v2920_v43  ;;  %v2940_v43 = vpack.c.bf16 %v912_v34, %v910_v33  ;;  %v932_v32 = vld [vmem:[#allocation5 + $0x10f8] sm:$0xff]  ;;  %v2958_v34 = vpack.c.bf16 %v927_v28, %v925_v26 }
 0x12d   : > { %v568_v26 = vld [vmem:[#allocation5 + $0x598] sm:$0xff] }
 0x12e   : > { %2539 = vmatpush1.bf16.msra.mxu1 %v2538_v49  ;;  %v2558_v49 = vpack.c.bf16 %v527_v41, %v525_v40  ;;  %v931_v40 = vld [vmem:[#allocation5 + $0x10f0] sm:$0xff]  ;;  %v550_v41 = vld [vmem:[#allocation5 + $0x508] sm:$0xff]  ;;  %v952_v28 = vld [vmem:[#allocation5 + $0x1198] sm:$0xff] }
 0x12f   : > { %2923 = vmatpush1.bf16.msra.mxu0 %v2922_v50  ;;  %2541 = vmatprep.subr.bf16.mxu1 %v2540_v51  ;;  %v2942_v50 = vpack.c.bf16 %v911_v44, %v909_v42  ;;  %v2560_v51 = vpack.c.bf16 %v532_v46, %v530_v45  ;;  %v552_v42 = vld [vmem:[#allocation5 + $0x518] sm:$0xff] }
 0x130   : > { %2925 = vmatprep.subr.bf16.mxu0 %v2924_v55  ;;  %v2944_v55 = vpack.c.bf16 %v916_v48, %v914_v47  ;;  %v936_v44 = vld [vmem:[#allocation5 + $0x1118] sm:$0xff]  ;;  %v2580_v47 = vpack.c.bf16 %v552_v42, %v550_v41  ;;  %v549_v48 = vld [vmem:[#allocation5 + $0x500] sm:$0xff] }
 0x132   : > { %2543 = vmatpush1.bf16.msra.mxu1 %v2542_v61  ;;  %v2562_v61 = vpack.c.bf16 %v531_v53, %v529_v52  ;;  %v935_v52 = vld [vmem:[#allocation5 + $0x1110] sm:$0xff]  ;;  %v554_v53 = vld [vmem:[#allocation5 + $0x528] sm:$0xff] }
 0x133   : > { %2927 = vmatpush1.bf16.msra.mxu0 %v2926_v62  ;;  %2545 = vmatprep.subr.bf16.mxu1 %v2544_v63  ;;  %v2946_v62 = vpack.c.bf16 %v915_v56, %v913_v54  ;;  %v2564_v63 = vpack.c.bf16 %v536_v58, %v534_v57  ;;  %v556_v54 = vld [vmem:[#allocation5 + $0x538] sm:$0xff] }
 0x134   : > { %2929 = vmatprep.subr.bf16.mxu0 %v2928_v3  ;;  %v2948_v3 = vpack.c.bf16 %v920_v60, %v918_v59  ;;  %v940_v56 = vld [vmem:[#allocation5 + $0x1138] sm:$0xff]  ;;  %v2584_v59 = vpack.c.bf16 %v556_v54, %v554_v53  ;;  %v553_v60 = vld [vmem:[#allocation5 + $0x520] sm:$0xff] }
 0x136   : > { %2547 = vmatpush1.bf16.msra.mxu1 %v2546_v9  ;;  %v2566_v9 = vpack.c.bf16 %v535_v1, %v533_v0  ;;  %v939_v0 = vld [vmem:[#allocation5 + $0x1130] sm:$0xff]  ;;  %v558_v1 = vld [vmem:[#allocation5 + $0x548] sm:$0xff] }
 0x137   : > { %2931 = vmatpush1.bf16.msra.mxu0 %v2930_v10  ;;  %2549 = vmatprep.subr.bf16.mxu1 %v2548_v11  ;;  %v2950_v10 = vpack.c.bf16 %v919_v4, %v917_v2  ;;  %v2568_v11 = vpack.c.bf16 %v540_v6, %v538_v5  ;;  %v560_v2 = vld [vmem:[#allocation5 + $0x558] sm:$0xff] }
 0x138   : > { %2933 = vmatprep.subr.bf16.mxu0 %v2932_v15  ;;  %v2952_v15 = vpack.c.bf16 %v924_v8, %v922_v7  ;;  %v944_v4 = vld [vmem:[#allocation5 + $0x1158] sm:$0xff]  ;;  %v2588_v7 = vpack.c.bf16 %v560_v2, %v558_v1  ;;  %v557_v8 = vld [vmem:[#allocation5 + $0x540] sm:$0xff] }
 0x139   : > { %1325 = vmatmul.mubr.f32.vlgmr.msra.gmra.mrb[0].mxu1 %v366_v21  ;;  %v2570_v21 = vpack.c.bf16 %v539_v13, %v537_v12  ;;  %v943_v12 = vld [vmem:[#allocation5 + $0x1150] sm:$0xff]  ;;  %v562_v13 = vld [vmem:[#allocation5 + $0x568] sm:$0xff] }
 0x13a   : > { %2551 = vmatpush1.bf16.msra.mxu1 %v2550_v22  ;;  %1751 = vmatmul.mubr.f32.vlgmr.msra.gmra.mrb[0].mxu0 %v378_v23  ;;  %v2954_v22 = vpack.c.bf16 %v923_v16, %v921_v14  ;;  %v2572_v23 = vpack.c.bf16 %v544_v18, %v542_v17  ;;  %v564_v14 = vld [vmem:[#allocation5 + $0x578] sm:$0xff] }
 0x13b   : > { %2935 = vmatpush1.bf16.msra.mxu0 %v2934_v24  ;;  %2553 = vmatprep.subr.bf16.mxu1 %v2552_v25  ;;  %v541_v24 = vld [vmem:[#allocation5 + $0x4c0] sm:$0xff]  ;;  %v543_v25 = vld [vmem:[#allocation5 + $0x4d0] sm:$0xff]  ;;  %v948_v16 = vld [vmem:[#allocation5 + $0x1178] sm:$0xff]  ;;  %v2592_v19 = vpack.c.bf16 %v564_v14, %v562_v13 }
 0x13c   : > { %2937 = vmatprep.subr.bf16.mxu0 %v2936_v29  ;;  %1395 = vmatprep.mubr.f32.mxu1 %v369_v35  ;;  %v546_v29 = vld [vmem:[#allocation5 + $0x4e8] sm:$0xff]  ;;  %v2574_v33 = vpack.c.bf16 %v543_v25, %v541_v24  ;;  %v947_v24 = vld [vmem:[#allocation5 + $0x1170] sm:$0xff] }
 0x13d   : > { %1821 = vmatprep.mubr.f32.mxu0 %v381_v37  ;;  %v2576_v35 = vpack.c.bf16 %v548_v30, %v546_v29  ;;  %v547_v37 = vld [vmem:[#allocation5 + $0x4f0] sm:$0xff]  ;;  %v566_v25 = vld [vmem:[#allocation5 + $0x588] sm:$0xff] }
 0x13e   : > { %2555 = vmatpush1.bf16.msra.mxu1 %v2554_v36  ;;  %v545_v36 = vld [vmem:[#allocation5 + $0x4e0] sm:$0xff] }
 0x13f   : > { %2939 = vmatpush1.bf16.msra.mxu0 %v2938_v38  ;;  %2557 = vmatprep.subr.bf16.mxu1 %v2556_v39  ;;  %v929_v38 = vld [vmem:[#allocation5 + $0x10e0] sm:$0xff]  ;;  %v2960_v39 = vpack.c.bf16 %v932_v32, %v930_v31  ;;  %v2578_v45 = vpack.c.bf16 %v547_v37, %v545_v36  ;;  %v2596_v31 = vpack.c.bf16 %v568_v26, %v566_v25  ;;  %v951_v36 = vld [vmem:[#allocation5 + $0x1190] sm:$0xff]  ;;  %v570_v37 = vld [vmem:[#allocation5 + $0x5a8] sm:$0xff] }
 0x140   : > { %2941 = vmatprep.subr.bf16.mxu0 %v2940_v43  ;;  %v934_v43 = vld [vmem:[#allocation5 + $0x1108] sm:$0xff]  ;;  %v2962_v46 = vpack.c.bf16 %v931_v40, %v929_v38  ;;  %v565_v32 = vld [vmem:[#allocation5 + $0x580] sm:$0xff]  ;;  %v572_v38 = vld [vmem:[#allocation5 + $0x5b8] sm:$0xff] }
 0x141   : > { %v956_v40 = vld [vmem:[#allocation5 + $0x11b8] sm:$0xff] }
 0x142   : > { %2559 = vmatpush1.bf16.msra.mxu1 %v2558_v49  ;;  %v551_v49 = vld [vmem:[#allocation5 + $0x510] sm:$0xff] }
 0x143   : > { %2943 = vmatpush1.bf16.msra.mxu0 %v2942_v50  ;;  %2561 = vmatprep.subr.bf16.mxu1 %v2560_v51  ;;  %v933_v50 = vld [vmem:[#allocation5 + $0x1100] sm:$0xff]  ;;  %v2964_v51 = vpack.c.bf16 %v936_v44, %v934_v43  ;;  %v2582_v57 = vpack.c.bf16 %v551_v49, %v549_v48  ;;  %v2600_v43 = vpack.c.bf16 %v572_v38, %v570_v37  ;;  %v955_v48 = vld [vmem:[#allocation5 + $0x11b0] sm:$0xff]  ;;  %v574_v49 = vld [vmem:[#allocation5 + $0x5c8] sm:$0xff] }
 0x144   : > { %2945 = vmatprep.subr.bf16.mxu0 %v2944_v55  ;;  %v938_v55 = vld [vmem:[#allocation5 + $0x1128] sm:$0xff]  ;;  %v2966_v58 = vpack.c.bf16 %v935_v52, %v933_v50  ;;  %v569_v44 = vld [vmem:[#allocation5 + $0x5a0] sm:$0xff]  ;;  %v576_v50 = vld [vmem:[#allocation5 + $0x5d8] sm:$0xff] }
 0x145   : > { %v960_v52 = vld [vmem:[#allocation5 + $0x11d8] sm:$0xff]  ;;  %v974_v37 = vld [vmem:[#allocation5 + $0x1248] sm:$0xff] }
 0x146   : > { %2563 = vmatpush1.bf16.msra.mxu1 %v2562_v61  ;;  %v555_v61 = vld [vmem:[#allocation5 + $0x530] sm:$0xff]  ;;  %v976_v38 = vld [vmem:[#allocation5 + $0x1258] sm:$0xff] }
 0x147   : > { %2947 = vmatpush1.bf16.msra.mxu0 %v2946_v62  ;;  %2565 = vmatprep.subr.bf16.mxu1 %v2564_v63  ;;  %v937_v62 = vld [vmem:[#allocation5 + $0x1120] sm:$0xff]  ;;  %v2968_v63 = vpack.c.bf16 %v940_v56, %v938_v55  ;;  %v2586_v5 = vpack.c.bf16 %v555_v61, %v553_v60  ;;  %v2604_v55 = vpack.c.bf16 %v576_v50, %v574_v49  ;;  %v959_v60 = vld [vmem:[#allocation5 + $0x11d0] sm:$0xff]  ;;  %v578_v61 = vld [vmem:[#allocation5 + $0x5e8] sm:$0xff] }
 0x148   : > { %2949 = vmatprep.subr.bf16.mxu0 %v2948_v3  ;;  %v942_v3 = vld [vmem:[#allocation5 + $0x1148] sm:$0xff]  ;;  %v2970_v6 = vpack.c.bf16 %v939_v0, %v937_v62  ;;  %v573_v56 = vld [vmem:[#allocation5 + $0x5c0] sm:$0xff]  ;;  %v580_v62 = vld [vmem:[#allocation5 + $0x5f8] sm:$0xff] }
 0x149   : > { %v964_v0 = vld [vmem:[#allocation5 + $0x11f8] sm:$0xff]  ;;  %v594_v49 = vld [vmem:[#allocation5 + $0x668] sm:$0xff] }
 0x14a   : > { %2567 = vmatpush1.bf16.msra.mxu1 %v2566_v9  ;;  %v559_v9 = vld [vmem:[#allocation5 + $0x550] sm:$0xff]  ;;  %v596_v50 = vld [vmem:[#allocation5 + $0x678] sm:$0xff] }
 0x14b   : > { %2951 = vmatpush1.bf16.msra.mxu0 %v2950_v10  ;;  %2569 = vmatprep.subr.bf16.mxu1 %v2568_v11  ;;  %v941_v10 = vld [vmem:[#allocation5 + $0x1140] sm:$0xff]  ;;  %v2972_v11 = vpack.c.bf16 %v944_v4, %v942_v3  ;;  %v2590_v17 = vpack.c.bf16 %v559_v9, %v557_v8  ;;  %v2608_v3 = vpack.c.bf16 %v580_v62, %v578_v61  ;;  %v963_v8 = vld [vmem:[#allocation5 + $0x11f0] sm:$0xff]  ;;  %v582_v9 = vld [vmem:[#allocation5 + $0x608] sm:$0xff] }
 0x14c   : > { %2953 = vmatprep.subr.bf16.mxu0 %v2952_v15  ;;  %v946_v15 = vld [vmem:[#allocation5 + $0x1168] sm:$0xff]  ;;  %v2974_v18 = vpack.c.bf16 %v943_v12, %v941_v10  ;;  %v577_v4 = vld [vmem:[#allocation5 + $0x5e0] sm:$0xff]  ;;  %v584_v10 = vld [vmem:[#allocation5 + $0x618] sm:$0xff] }
 0x14d   : > { %v968_v12 = vld [vmem:[#allocation5 + $0x1218] sm:$0xff]  ;;  %v598_v61 = vld [vmem:[#allocation5 + $0x688] sm:$0xff] }
 0x14e   : > { %2571 = vmatpush1.bf16.msra.mxu1 %v2570_v21  ;;  %v563_v21 = vld [vmem:[#allocation5 + $0x570] sm:$0xff]  ;;  %v600_v62 = vld [vmem:[#allocation5 + $0x698] sm:$0xff] }
 0x14f   : > { %2955 = vmatpush1.bf16.msra.mxu0 %v2954_v22  ;;  %2573 = vmatprep.subr.bf16.mxu1 %v2572_v23  ;;  %v945_v22 = vld [vmem:[#allocation5 + $0x1160] sm:$0xff]  ;;  %v2976_v23 = vpack.c.bf16 %v948_v16, %v946_v15  ;;  %v2594_v29 = vpack.c.bf16 %v563_v21, %v561_v20  ;;  %v2612_v15 = vpack.c.bf16 %v584_v10, %v582_v9  ;;  %v967_v20 = vld [vmem:[#allocation5 + $0x1210] sm:$0xff]  ;;  %v586_v21 = vld [vmem:[#allocation5 + $0x628] sm:$0xff] }
 0x150   : > { %2957 = vmatprep.subr.bf16.mxu0 %v2956_v27  ;;  %v950_v27 = vld [vmem:[#allocation5 + $0x1188] sm:$0xff]  ;;  %v2978_v30 = vpack.c.bf16 %v947_v24, %v945_v22  ;;  %v581_v16 = vld [vmem:[#allocation5 + $0x600] sm:$0xff]  ;;  %v588_v22 = vld [vmem:[#allocation5 + $0x638] sm:$0xff] }
 0x151   : > { %v972_v24 = vld [vmem:[#allocation5 + $0x1238] sm:$0xff]  ;;  %v602_v9 = vld [vmem:[#allocation5 + $0x6a8] sm:$0xff] }
 0x152   : > { %2575 = vmatpush1.bf16.msra.mxu1 %v2574_v33  ;;  %v567_v33 = vld [vmem:[#allocation5 + $0x590] sm:$0xff]  ;;  %v604_v10 = vld [vmem:[#allocation5 + $0x6b8] sm:$0xff] }
 0x153   : > { %2959 = vmatpush1.bf16.msra.mxu0 %v2958_v34  ;;  %2577 = vmatprep.subr.bf16.mxu1 %v2576_v35  ;;  %v949_v34 = vld [vmem:[#allocation5 + $0x1180] sm:$0xff]  ;;  %v2980_v35 = vpack.c.bf16 %v952_v28, %v950_v27  ;;  %v2598_v41 = vpack.c.bf16 %v567_v33, %v565_v32  ;;  %v368_v25 = vld [vmem:[%s3849_s13 + $0x20] sm:$0xff] }
 0x154   : > { %2961 = vmatprep.subr.bf16.mxu0 %v2960_v39  ;;  %v954_v39 = vld [vmem:[#allocation5 + $0x11a8] sm:$0xff]  ;;  %v2982_v42 = vpack.c.bf16 %v951_v36, %v949_v34  ;;  %v380_v27 = vld [vmem:[%s3849_s13 + $0x80] sm:$0xff]  ;;  %v969_v32 = vld [vmem:[#allocation5 + $0x1220] sm:$0xff] }
 0x155   : > { %v971_v34 = vld [vmem:[#allocation5 + $0x1230] sm:$0xff]  ;;  %v592_v36 = vld [vmem:[#allocation5 + $0x658] sm:$0xff] }
 0x156   : > { %2579 = vmatpush1.bf16.msra.mxu1 %v2578_v45  ;;  %v571_v45 = vld [vmem:[#allocation5 + $0x5b0] sm:$0xff] }
 0x157   : > { %2963 = vmatpush1.bf16.msra.mxu0 %v2962_v46  ;;  %2581 = vmatprep.subr.bf16.mxu1 %v2580_v47  ;;  %v953_v46 = vld [vmem:[#allocation5 + $0x11a0] sm:$0xff]  ;;  %v2984_v47 = vpack.c.bf16 %v956_v40, %v954_v39  ;;  %v2602_v53 = vpack.c.bf16 %v571_v45, %v569_v44  ;;  %v371_v39 = vld [vmem:[%s3849_s13 + $0x38] sm:$0xff] }
 0x158   : > { %2965 = vmatprep.subr.bf16.mxu0 %v2964_v51  ;;  %v958_v51 = vld [vmem:[#allocation5 + $0x11c8] sm:$0xff]  ;;  %v2986_v54 = vpack.c.bf16 %v955_v48, %v953_v46  ;;  %v589_v44 = vld [vmem:[#allocation5 + $0x640] sm:$0xff]  ;;  %v591_v45 = vld [vmem:[#allocation5 + $0x650] sm:$0xff] }
 0x159   : > { %v973_v46 = vld [vmem:[#allocation5 + $0x1240] sm:$0xff]  ;;  %v975_v48 = vld [vmem:[#allocation5 + $0x1250] sm:$0xff] }
 0x15a   : > { %2583 = vmatpush1.bf16.msra.mxu1 %v2582_v57  ;;  %v575_v57 = vld [vmem:[#allocation5 + $0x5d0] sm:$0xff] }
 0x15b   : > { %2967 = vmatpush1.bf16.msra.mxu0 %v2966_v58  ;;  %2585 = vmatprep.subr.bf16.mxu1 %v2584_v59  ;;  %v957_v58 = vld [vmem:[#allocation5 + $0x11c0] sm:$0xff]  ;;  %v2988_v59 = vpack.c.bf16 %v960_v52, %v958_v51  ;;  %v2606_v1 = vpack.c.bf16 %v575_v57, %v573_v56  ;;  %v978_v51 = vld [vmem:[#allocation5 + $0x1268] sm:$0xff]  ;;  %v980_v52 = vld [vmem:[#allocation5 + $0x1278] sm:$0xff] }
 0x15c   : > { %2969 = vmatprep.subr.bf16.mxu0 %v2968_v63  ;;  %v962_v63 = vld [vmem:[#allocation5 + $0x11e8] sm:$0xff]  ;;  %v2990_v2 = vpack.c.bf16 %v959_v60, %v957_v58  ;;  %v593_v56 = vld [vmem:[#allocation5 + $0x660] sm:$0xff]  ;;  %v595_v57 = vld [vmem:[#allocation5 + $0x670] sm:$0xff] }
 0x15d   : > { %v977_v58 = vld [vmem:[#allocation5 + $0x1260] sm:$0xff]  ;;  %v979_v60 = vld [vmem:[#allocation5 + $0x1270] sm:$0xff] }
 0x15e   : > { %2587 = vmatpush1.bf16.msra.mxu1 %v2586_v5  ;;  %v579_v5 = vld [vmem:[#allocation5 + $0x5f0] sm:$0xff] }
 0x15f   : > { %2971 = vmatpush1.bf16.msra.mxu0 %v2970_v6  ;;  %2589 = vmatprep.subr.bf16.mxu1 %v2588_v7  ;;  %v961_v6 = vld [vmem:[#allocation5 + $0x11e0] sm:$0xff]  ;;  %v2992_v7 = vpack.c.bf16 %v964_v0, %v962_v63  ;;  %v2610_v13 = vpack.c.bf16 %v579_v5, %v577_v4  ;;  %v982_v63 = vld [vmem:[#allocation5 + $0x1288] sm:$0xff]  ;;  %v984_v0 = vld [vmem:[#allocation5 + $0x1298] sm:$0xff] }
 0x160   : > { %2973 = vmatprep.subr.bf16.mxu0 %v2972_v11  ;;  %v966_v11 = vld [vmem:[#allocation5 + $0x1208] sm:$0xff]  ;;  %v2994_v14 = vpack.c.bf16 %v963_v8, %v961_v6  ;;  %v597_v4 = vld [vmem:[#allocation5 + $0x680] sm:$0xff]  ;;  %v599_v5 = vld [vmem:[#allocation5 + $0x690] sm:$0xff] }
 0x161   : > { %v981_v6 = vld [vmem:[#allocation5 + $0x1280] sm:$0xff]  ;;  %v983_v8 = vld [vmem:[#allocation5 + $0x1290] sm:$0xff] }
 0x162   : > { %2591 = vmatpush1.bf16.msra.mxu1 %v2590_v17  ;;  %v583_v17 = vld [vmem:[#allocation5 + $0x610] sm:$0xff] }
 0x163   : > { %2975 = vmatpush1.bf16.msra.mxu0 %v2974_v18  ;;  %2593 = vmatprep.subr.bf16.mxu1 %v2592_v19  ;;  %v965_v18 = vld [vmem:[#allocation5 + $0x1200] sm:$0xff]  ;;  %v2996_v19 = vpack.c.bf16 %v968_v12, %v966_v11  ;;  %v2614_v26 = vpack.c.bf16 %v583_v17, %v581_v16  ;;  %v986_v11 = vld [vmem:[#allocation5 + $0x12a8] sm:$0xff]  ;;  %v988_v12 = vld [vmem:[#allocation5 + $0x12b8] sm:$0xff] }
 0x164   : > { %2977 = vmatprep.subr.bf16.mxu0 %v2976_v23  ;;  %v970_v23 = vld [vmem:[#allocation5 + $0x1228] sm:$0xff]  ;;  %v2998_v28 = vpack.c.bf16 %v967_v20, %v965_v18  ;;  %v601_v16 = vld [vmem:[#allocation5 + $0x6a0] sm:$0xff]  ;;  %v603_v17 = vld [vmem:[#allocation5 + $0x6b0] sm:$0xff] }
 0x165   : > { %v3000_v33 = vpack.c.bf16 %v972_v24, %v970_v23  ;;  %v985_v18 = vld [vmem:[#allocation5 + $0x12a0] sm:$0xff]  ;;  %v987_v20 = vld [vmem:[#allocation5 + $0x12b0] sm:$0xff]  ;;  %v990_v23 = vld [vmem:[#allocation5 + $0x12c8] sm:$0xff] }
 0x166   : > { %2595 = vmatpush1.bf16.msra.mxu1 %v2594_v29  ;;  %v2616_v29 = vpack.c.bf16 %v588_v22, %v586_v21  ;;  %v606_v21 = vld [vmem:[#allocation5 + $0x6c8] sm:$0xff]  ;;  %v608_v22 = vld [vmem:[#allocation5 + $0x6d8] sm:$0xff] }
 0x167   : > { %2979 = vmatpush1.bf16.msra.mxu0 %v2978_v30  ;;  %2597 = vmatprep.subr.bf16.mxu1 %v2596_v31  ;;  %v585_v30 = vld [vmem:[#allocation5 + $0x620] sm:$0xff]  ;;  %v587_v31 = vld [vmem:[#allocation5 + $0x630] sm:$0xff]  ;;  %v992_v24 = vld [vmem:[#allocation5 + $0x12d8] sm:$0xff] }
 0x168   : > { %2981 = vmatprep.subr.bf16.mxu0 %v2980_v35  ;;  %v590_v35 = vld [vmem:[#allocation5 + $0x648] sm:$0xff]  ;;  %v2618_v40 = vpack.c.bf16 %v587_v31, %v585_v30  ;;  %v989_v30 = vld [vmem:[#allocation5 + $0x12c0] sm:$0xff]  ;;  %v3020_v31 = vpack.c.bf16 %v992_v24, %v990_v23 }
 0x169   : > { %v625_v24 = vld [vmem:[#allocation5 + $0x760] sm:$0xff] }
 0x16a   : > { %2599 = vmatpush1.bf16.msra.mxu1 %v2598_v41  ;;  %v383_v41 = vld [vmem:[%s3849_s13 + $0x98] sm:$0xff] }
 0x16b   : > { %2983 = vmatpush1.bf16.msra.mxu0 %v2982_v42  ;;  %2601 = vmatprep.subr.bf16.mxu1 %v2600_v43  ;;  %v3002_v42 = vpack.c.bf16 %v971_v34, %v969_v32  ;;  %v2620_v43 = vpack.c.bf16 %v592_v36, %v590_v35  ;;  %v991_v32 = vld [vmem:[#allocation5 + $0x12d0] sm:$0xff]  ;;  %v612_v34 = vld [vmem:[#allocation5 + $0x6f8] sm:$0xff]  ;;  %v994_v35 = vld [vmem:[#allocation5 + $0x12e8] sm:$0xff] }
 0x16c   : > { %2985 = vmatprep.subr.bf16.mxu0 %v2984_v47  ;;  %v3004_v47 = vpack.c.bf16 %v976_v38, %v974_v37  ;;  %v996_v36 = vld [vmem:[#allocation5 + $0x12f8] sm:$0xff]  ;;  %v3022_v38 = vpack.c.bf16 %v991_v32, %v989_v30 }
 0x16d   : > { %v632_v30 = vld [vmem:[#allocation5 + $0x798] sm:$0xff] }
 0x16e   : > { %2603 = vmatpush1.bf16.msra.mxu1 %v2602_v53  ;;  %v2622_v53 = vpack.c.bf16 %v591_v45, %v589_v44  ;;  %v995_v44 = vld [vmem:[#allocation5 + $0x12f0] sm:$0xff]  ;;  %v614_v45 = vld [vmem:[#allocation5 + $0x708] sm:$0xff]  ;;  %v1016_v32 = vld [vmem:[#allocation5 + $0x1398] sm:$0xff] }
 0x16f   : > { %2987 = vmatpush1.bf16.msra.mxu0 %v2986_v54  ;;  %2605 = vmatprep.subr.bf16.mxu1 %v2604_v55  ;;  %v3006_v54 = vpack.c.bf16 %v975_v48, %v973_v46  ;;  %v2624_v55 = vpack.c.bf16 %v596_v50, %v594_v49  ;;  %v616_v46 = vld [vmem:[#allocation5 + $0x718] sm:$0xff] }
 0x170   : > { %2989 = vmatprep.subr.bf16.mxu0 %v2988_v59  ;;  %v3008_v59 = vpack.c.bf16 %v980_v52, %v978_v51  ;;  %v1000_v48 = vld [vmem:[#allocation5 + $0x1318] sm:$0xff]  ;;  %v2644_v51 = vpack.c.bf16 %v616_v46, %v614_v45  ;;  %v613_v52 = vld [vmem:[#allocation5 + $0x700] sm:$0xff] }
 0x172   : > { %2607 = vmatpush1.bf16.msra.mxu1 %v2606_v1  ;;  %v2626_v1 = vpack.c.bf16 %v595_v57, %v593_v56  ;;  %v999_v56 = vld [vmem:[#allocation5 + $0x1310] sm:$0xff]  ;;  %v618_v57 = vld [vmem:[#allocation5 + $0x728] sm:$0xff] }
 0x173   : > { %2991 = vmatpush1.bf16.msra.mxu0 %v2990_v2  ;;  %2609 = vmatprep.subr.bf16.mxu1 %v2608_v3  ;;  %v3010_v2 = vpack.c.bf16 %v979_v60, %v977_v58  ;;  %v2628_v3 = vpack.c.bf16 %v600_v62, %v598_v61  ;;  %v620_v58 = vld [vmem:[#allocation5 + $0x738] sm:$0xff] }
 0x174   : > { %2993 = vmatprep.subr.bf16.mxu0 %v2992_v7  ;;  %v3012_v7 = vpack.c.bf16 %v984_v0, %v982_v63  ;;  %v1004_v60 = vld [vmem:[#allocation5 + $0x1338] sm:$0xff]  ;;  %v2648_v63 = vpack.c.bf16 %v620_v58, %v618_v57  ;;  %v617_v0 = vld [vmem:[#allocation5 + $0x720] sm:$0xff] }
 0x176   : > { %2611 = vmatpush1.bf16.msra.mxu1 %v2610_v13  ;;  %v2630_v13 = vpack.c.bf16 %v599_v5, %v597_v4  ;;  %v1003_v4 = vld [vmem:[#allocation5 + $0x1330] sm:$0xff]  ;;  %v622_v5 = vld [vmem:[#allocation5 + $0x748] sm:$0xff] }
 0x177   : > { %2995 = vmatpush1.bf16.msra.mxu0 %v2994_v14  ;;  %2613 = vmatprep.subr.bf16.mxu1 %v2612_v15  ;;  %v3014_v14 = vpack.c.bf16 %v983_v8, %v981_v6  ;;  %v2632_v15 = vpack.c.bf16 %v604_v10, %v602_v9  ;;  %v624_v6 = vld [vmem:[#allocation5 + $0x758] sm:$0xff] }
 0x178   : > { %2997 = vmatprep.subr.bf16.mxu0 %v2996_v19  ;;  %v3016_v19 = vpack.c.bf16 %v988_v12, %v986_v11  ;;  %v1008_v8 = vld [vmem:[#allocation5 + $0x1358] sm:$0xff]  ;;  %v2652_v11 = vpack.c.bf16 %v624_v6, %v622_v5  ;;  %v621_v12 = vld [vmem:[#allocation5 + $0x740] sm:$0xff] }
 0x179   : > { %1396 = vmatmul.mubr.f32.vlgmr.msra.gmra.mrb[0].mxu1 %v368_v25  ;;  %v2634_v25 = vpack.c.bf16 %v603_v17, %v601_v16  ;;  %v1007_v16 = vld [vmem:[#allocation5 + $0x1350] sm:$0xff]  ;;  %v626_v17 = vld [vmem:[#allocation5 + $0x768] sm:$0xff] }
 0x17a   : > { %2615 = vmatpush1.bf16.msra.mxu1 %v2614_v26  ;;  %1822 = vmatmul.mubr.f32.vlgmr.msra.gmra.mrb[0].mxu0 %v380_v27  ;;  %v3018_v26 = vpack.c.bf16 %v987_v20, %v985_v18  ;;  %v2636_v27 = vpack.c.bf16 %v608_v22, %v606_v21  ;;  %v628_v18 = vld [vmem:[#allocation5 + $0x778] sm:$0xff] }
 0x17b   : > { %2999 = vmatpush1.bf16.msra.mxu0 %v2998_v28  ;;  %2617 = vmatprep.subr.bf16.mxu1 %v2616_v29  ;;  %v605_v28 = vld [vmem:[#allocation5 + $0x6c0] sm:$0xff]  ;;  %v607_v29 = vld [vmem:[#allocation5 + $0x6d0] sm:$0xff]  ;;  %v1012_v20 = vld [vmem:[#allocation5 + $0x1378] sm:$0xff]  ;;  %v2656_v23 = vpack.c.bf16 %v628_v18, %v626_v17 }
 0x17c   : > { %3001 = vmatprep.subr.bf16.mxu0 %v3000_v33  ;;  %1466 = vmatprep.mubr.f32.mxu1 %v371_v39  ;;  %v610_v33 = vld [vmem:[#allocation5 + $0x6e8] sm:$0xff]  ;;  %v2638_v37 = vpack.c.bf16 %v607_v29, %v605_v28  ;;  %v1011_v28 = vld [vmem:[#allocation5 + $0x1370] sm:$0xff] }
 0x17d   : > { %1892 = vmatprep.mubr.f32.mxu0 %v383_v41  ;;  %v2640_v39 = vpack.c.bf16 %v612_v34, %v610_v33  ;;  %v611_v41 = vld [vmem:[#allocation5 + $0x6f0] sm:$0xff]  ;;  %v630_v29 = vld [vmem:[#allocation5 + $0x788] sm:$0xff] }
 0x17e   : > { %2619 = vmatpush1.bf16.msra.mxu1 %v2618_v40  ;;  %v609_v40 = vld [vmem:[#allocation5 + $0x6e0] sm:$0xff] }
 0x17f   : > { %3003 = vmatpush1.bf16.msra.mxu0 %v3002_v42  ;;  %2621 = vmatprep.subr.bf16.mxu1 %v2620_v43  ;;  %v993_v42 = vld [vmem:[#allocation5 + $0x12e0] sm:$0xff]  ;;  %v3024_v43 = vpack.c.bf16 %v996_v36, %v994_v35  ;;  %v2642_v49 = vpack.c.bf16 %v611_v41, %v609_v40  ;;  %v2660_v35 = vpack.c.bf16 %v632_v30, %v630_v29  ;;  %v1015_v40 = vld [vmem:[#allocation5 + $0x1390] sm:$0xff]  ;;  %v634_v41 = vld [vmem:[#allocation5 + $0x7a8] sm:$0xff] }
 0x180   : > { %3005 = vmatprep.subr.bf16.mxu0 %v3004_v47  ;;  %v998_v47 = vld [vmem:[#allocation5 + $0x1308] sm:$0xff]  ;;  %v3026_v50 = vpack.c.bf16 %v995_v44, %v993_v42  ;;  %v629_v36 = vld [vmem:[#allocation5 + $0x780] sm:$0xff]  ;;  %v636_v42 = vld [vmem:[#allocation5 + $0x7b8] sm:$0xff] }
 0x181   : > { %v1020_v44 = vld [vmem:[#allocation5 + $0x13b8] sm:$0xff]  ;;  %v370_v29 = vld [vmem:[%s3849_s13 + $0x30] sm:$0xff] }
 0x182   : > { %2623 = vmatpush1.bf16.msra.mxu1 %v2622_v53  ;;  %v615_v53 = vld [vmem:[#allocation5 + $0x710] sm:$0xff] }
 0x183   : > { %3007 = vmatpush1.bf16.msra.mxu0 %v3006_v54  ;;  %2625 = vmatprep.subr.bf16.mxu1 %v2624_v55  ;;  %v997_v54 = vld [vmem:[#allocation5 + $0x1300] sm:$0xff]  ;;  %v3028_v55 = vpack.c.bf16 %v1000_v48, %v998_v47  ;;  %v2646_v61 = vpack.c.bf16 %v615_v53, %v613_v52  ;;  %v2664_v47 = vpack.c.bf16 %v636_v42, %v634_v41  ;;  %v1019_v52 = vld [vmem:[#allocation5 + $0x13b0] sm:$0xff]  ;;  %v638_v53 = vld [vmem:[#allocation5 + $0x7c8] sm:$0xff] }
 0x184   : > { %3009 = vmatprep.subr.bf16.mxu0 %v3008_v59  ;;  %v1002_v59 = vld [vmem:[#allocation5 + $0x1328] sm:$0xff]  ;;  %v3030_v62 = vpack.c.bf16 %v999_v56, %v997_v54  ;;  %v633_v48 = vld [vmem:[#allocation5 + $0x7a0] sm:$0xff]  ;;  %v640_v54 = vld [vmem:[#allocation5 + $0x7d8] sm:$0xff] }
 0x185   : > { %v1024_v56 = vld [vmem:[#allocation5 + $0x13d8] sm:$0xff]  ;;  %v1038_v41 = vld [vmem:[#allocation5 + $0x1448] sm:$0xff] }
 0x186   : > { %2627 = vmatpush1.bf16.msra.mxu1 %v2626_v1  ;;  %v619_v1 = vld [vmem:[#allocation5 + $0x730] sm:$0xff]  ;;  %v1040_v42 = vld [vmem:[#allocation5 + $0x1458] sm:$0xff] }
 0x187   : > { %3011 = vmatpush1.bf16.msra.mxu0 %v3010_v2  ;;  %2629 = vmatprep.subr.bf16.mxu1 %v2628_v3  ;;  %v1001_v2 = vld [vmem:[#allocation5 + $0x1320] sm:$0xff]  ;;  %v3032_v3 = vpack.c.bf16 %v1004_v60, %v1002_v59  ;;  %v2650_v9 = vpack.c.bf16 %v619_v1, %v617_v0  ;;  %v2668_v59 = vpack.c.bf16 %v640_v54, %v638_v53  ;;  %v1023_v0 = vld [vmem:[#allocation5 + $0x13d0] sm:$0xff]  ;;  %v642_v1 = vld [vmem:[#allocation5 + $0x7e8] sm:$0xff] }
 0x188   : > { %3013 = vmatprep.subr.bf16.mxu0 %v3012_v7  ;;  %v1006_v7 = vld [vmem:[#allocation5 + $0x1348] sm:$0xff]  ;;  %v3034_v10 = vpack.c.bf16 %v1003_v4, %v1001_v2  ;;  %v637_v60 = vld [vmem:[#allocation5 + $0x7c0] sm:$0xff]  ;;  %v644_v2 = vld [vmem:[#allocation5 + $0x7f8] sm:$0xff] }
 0x189   : > { %v1028_v4 = vld [vmem:[#allocation5 + $0x13f8] sm:$0xff]  ;;  %v658_v53 = vld [vmem:[#allocation5 + $0x868] sm:$0xff] }
 0x18a   : > { %2631 = vmatpush1.bf16.msra.mxu1 %v2630_v13  ;;  %v623_v13 = vld [vmem:[#allocation5 + $0x750] sm:$0xff]  ;;  %v660_v54 = vld [vmem:[#allocation5 + $0x878] sm:$0xff] }
 0x18b   : > { %3015 = vmatpush1.bf16.msra.mxu0 %v3014_v14  ;;  %2633 = vmatprep.subr.bf16.mxu1 %v2632_v15  ;;  %v1005_v14 = vld [vmem:[#allocation5 + $0x1340] sm:$0xff]  ;;  %v3036_v15 = vpack.c.bf16 %v1008_v8, %v1006_v7  ;;  %v2654_v21 = vpack.c.bf16 %v623_v13, %v621_v12  ;;  %v2672_v7 = vpack.c.bf16 %v644_v2, %v642_v1  ;;  %v1027_v12 = vld [vmem:[#allocation5 + $0x13f0] sm:$0xff]  ;;  %v646_v13 = vld [vmem:[#allocation5 + $0x808] sm:$0xff] }
 0x18c   : > { %3017 = vmatprep.subr.bf16.mxu0 %v3016_v19  ;;  %v1010_v19 = vld [vmem:[#allocation5 + $0x1368] sm:$0xff]  ;;  %v3038_v22 = vpack.c.bf16 %v1007_v16, %v1005_v14  ;;  %v641_v8 = vld [vmem:[#allocation5 + $0x7e0] sm:$0xff]  ;;  %v648_v14 = vld [vmem:[#allocation5 + $0x818] sm:$0xff] }
 0x18d   : > { %v1032_v16 = vld [vmem:[#allocation5 + $0x1418] sm:$0xff]  ;;  %v662_v1 = vld [vmem:[#allocation5 + $0x888] sm:$0xff] }
 0x18e   : > { %2635 = vmatpush1.bf16.msra.mxu1 %v2634_v25  ;;  %v627_v25 = vld [vmem:[#allocation5 + $0x770] sm:$0xff]  ;;  %v664_v2 = vld [vmem:[#allocation5 + $0x898] sm:$0xff] }
 0x18f   : > { %3019 = vmatpush1.bf16.msra.mxu0 %v3018_v26  ;;  %2637 = vmatprep.subr.bf16.mxu1 %v2636_v27  ;;  %v1009_v26 = vld [vmem:[#allocation5 + $0x1360] sm:$0xff]  ;;  %v3040_v27 = vpack.c.bf16 %v1012_v20, %v1010_v19  ;;  %v2658_v33 = vpack.c.bf16 %v627_v25, %v625_v24  ;;  %v2676_v19 = vpack.c.bf16 %v648_v14, %v646_v13  ;;  %v1031_v24 = vld [vmem:[#allocation5 + $0x1410] sm:$0xff]  ;;  %v650_v25 = vld [vmem:[#allocation5 + $0x828] sm:$0xff] }
 0x190   : > { %3021 = vmatprep.subr.bf16.mxu0 %v3020_v31  ;;  %v1014_v31 = vld [vmem:[#allocation5 + $0x1388] sm:$0xff]  ;;  %v3042_v34 = vpack.c.bf16 %v1011_v28, %v1009_v26  ;;  %v645_v20 = vld [vmem:[#allocation5 + $0x800] sm:$0xff]  ;;  %v652_v26 = vld [vmem:[#allocation5 + $0x838] sm:$0xff] }
 0x191   : > { %v1036_v28 = vld [vmem:[#allocation5 + $0x1438] sm:$0xff]  ;;  %v666_v13 = vld [vmem:[#allocation5 + $0x8a8] sm:$0xff] }
 0x192   : > { %2639 = vmatpush1.bf16.msra.mxu1 %v2638_v37  ;;  %v631_v37 = vld [vmem:[#allocation5 + $0x790] sm:$0xff]  ;;  %v668_v14 = vld [vmem:[#allocation5 + $0x8b8] sm:$0xff] }
 0x193   : > { %3023 = vmatpush1.bf16.msra.mxu0 %v3022_v38  ;;  %2641 = vmatprep.subr.bf16.mxu1 %v2640_v39  ;;  %v1013_v38 = vld [vmem:[#allocation5 + $0x1380] sm:$0xff]  ;;  %v3044_v39 = vpack.c.bf16 %v1016_v32, %v1014_v31  ;;  %v2662_v45 = vpack.c.bf16 %v631_v37, %v629_v36 }
 0x194   : > { %3025 = vmatprep.subr.bf16.mxu0 %v3024_v43  ;;  %v1018_v43 = vld [vmem:[#allocation5 + $0x13a8] sm:$0xff]  ;;  %v3046_v46 = vpack.c.bf16 %v1015_v40, %v1013_v38  ;;  %v1033_v36 = vld [vmem:[#allocation5 + $0x1420] sm:$0xff]  ;;  %v1035_v38 = vld [vmem:[#allocation5 + $0x1430] sm:$0xff] }
 0x195   : > { %v382_v31 = vld [vmem:[%s3849_s13 + $0x90] sm:$0xff]  ;;  %v656_v40 = vld [vmem:[#allocation5 + $0x858] sm:$0xff] }
 0x196   : > { %2643 = vmatpush1.bf16.msra.mxu1 %v2642_v49  ;;  %v635_v49 = vld [vmem:[#allocation5 + $0x7b0] sm:$0xff] }
 0x197   : > { %3027 = vmatpush1.bf16.msra.mxu0 %v3026_v50  ;;  %2645 = vmatprep.subr.bf16.mxu1 %v2644_v51  ;;  %v1017_v50 = vld [vmem:[#allocation5 + $0x13a0] sm:$0xff]  ;;  %v3048_v51 = vpack.c.bf16 %v1020_v44, %v1018_v43  ;;  %v2666_v57 = vpack.c.bf16 %v635_v49, %v633_v48  ;;  %v655_v49 = vld [vmem:[#allocation5 + $0x850] sm:$0xff] }
 0x198   : > { %3029 = vmatprep.subr.bf16.mxu0 %v3028_v55  ;;  %v1022_v55 = vld [vmem:[#allocation5 + $0x13c8] sm:$0xff]  ;;  %v3050_v58 = vpack.c.bf16 %v1019_v52, %v1017_v50  ;;  %v373_v43 = vld [vmem:[%s3849_s13 + $0x48] sm:$0xff]  ;;  %v1039_v52 = vld [vmem:[#allocation5 + $0x1450] sm:$0xff] }
 0x199   : > { %v653_v48 = vld [vmem:[#allocation5 + $0x840] sm:$0xff] }
 0x19a   : > { %2647 = vmatpush1.bf16.msra.mxu1 %v2646_v61  ;;  %v639_v61 = vld [vmem:[#allocation5 + $0x7d0] sm:$0xff]  ;;  %v1037_v50 = vld [vmem:[#allocation5 + $0x1440] sm:$0xff] }
 0x19b   : > { %3031 = vmatpush1.bf16.msra.mxu0 %v3030_v62  ;;  %2649 = vmatprep.subr.bf16.mxu1 %v2648_v63  ;;  %v1021_v62 = vld [vmem:[#allocation5 + $0x13c0] sm:$0xff]  ;;  %v3052_v63 = vpack.c.bf16 %v1024_v56, %v1022_v55  ;;  %v2670_v5 = vpack.c.bf16 %v639_v61, %v637_v60  ;;  %v1042_v55 = vld [vmem:[#allocation5 + $0x1468] sm:$0xff]  ;;  %v1044_v56 = vld [vmem:[#allocation5 + $0x1478] sm:$0xff] }
 0x19c   : > { %3033 = vmatprep.subr.bf16.mxu0 %v3032_v3  ;;  %v1026_v3 = vld [vmem:[#allocation5 + $0x13e8] sm:$0xff]  ;;  %v3054_v6 = vpack.c.bf16 %v1023_v0, %v1021_v62  ;;  %v657_v60 = vld [vmem:[#allocation5 + $0x860] sm:$0xff]  ;;  %v659_v61 = vld [vmem:[#allocation5 + $0x870] sm:$0xff] }
 0x19d   : > { %v1041_v62 = vld [vmem:[#allocation5 + $0x1460] sm:$0xff]  ;;  %v1043_v0 = vld [vmem:[#allocation5 + $0x1470] sm:$0xff] }
 0x19e   : > { %2651 = vmatpush1.bf16.msra.mxu1 %v2650_v9  ;;  %v643_v9 = vld [vmem:[#allocation5 + $0x7f0] sm:$0xff] }
 0x19f   : > { %3035 = vmatpush1.bf16.msra.mxu0 %v3034_v10  ;;  %2653 = vmatprep.subr.bf16.mxu1 %v2652_v11  ;;  %v1025_v10 = vld [vmem:[#allocation5 + $0x13e0] sm:$0xff]  ;;  %v3056_v11 = vpack.c.bf16 %v1028_v4, %v1026_v3  ;;  %v2674_v17 = vpack.c.bf16 %v643_v9, %v641_v8  ;;  %v1046_v3 = vld [vmem:[#allocation5 + $0x1488] sm:$0xff]  ;;  %v1048_v4 = vld [vmem:[#allocation5 + $0x1498] sm:$0xff] }
 0x1a0   : > { %3037 = vmatprep.subr.bf16.mxu0 %v3036_v15  ;;  %v1030_v15 = vld [vmem:[#allocation5 + $0x1408] sm:$0xff]  ;;  %v3058_v18 = vpack.c.bf16 %v1027_v12, %v1025_v10  ;;  %v661_v8 = vld [vmem:[#allocation5 + $0x880] sm:$0xff]  ;;  %v663_v9 = vld [vmem:[#allocation5 + $0x890] sm:$0xff] }
 0x1a1   : > { %v1045_v10 = vld [vmem:[#allocation5 + $0x1480] sm:$0xff]  ;;  %v1047_v12 = vld [vmem:[#allocation5 + $0x1490] sm:$0xff] }
 0x1a2   : > { %2655 = vmatpush1.bf16.msra.mxu1 %v2654_v21  ;;  %v647_v21 = vld [vmem:[#allocation5 + $0x810] sm:$0xff] }
 0x1a3   : > { %3039 = vmatpush1.bf16.msra.mxu0 %v3038_v22  ;;  %2657 = vmatprep.subr.bf16.mxu1 %v2656_v23  ;;  %v1029_v22 = vld [vmem:[#allocation5 + $0x1400] sm:$0xff]  ;;  %v3060_v23 = vpack.c.bf16 %v1032_v16, %v1030_v15  ;;  %v2678_v30 = vpack.c.bf16 %v647_v21, %v645_v20  ;;  %v1050_v15 = vld [vmem:[#allocation5 + $0x14a8] sm:$0xff]  ;;  %v1052_v16 = vld [vmem:[#allocation5 + $0x14b8] sm:$0xff] }
 0x1a4   : > { %3041 = vmatprep.subr.bf16.mxu0 %v3040_v27  ;;  %v1034_v27 = vld [vmem:[#allocation5 + $0x1428] sm:$0xff]  ;;  %v3062_v32 = vpack.c.bf16 %v1031_v24, %v1029_v22  ;;  %v665_v20 = vld [vmem:[#allocation5 + $0x8a0] sm:$0xff]  ;;  %v667_v21 = vld [vmem:[#allocation5 + $0x8b0] sm:$0xff] }
 0x1a5   : > { %v3064_v37 = vpack.c.bf16 %v1036_v28, %v1034_v27  ;;  %v1049_v22 = vld [vmem:[#allocation5 + $0x14a0] sm:$0xff]  ;;  %v1051_v24 = vld [vmem:[#allocation5 + $0x14b0] sm:$0xff]  ;;  %v1054_v27 = vld [vmem:[#allocation5 + $0x14c8] sm:$0xff] }
 0x1a6   : > { %2659 = vmatpush1.bf16.msra.mxu1 %v2658_v33  ;;  %v2680_v33 = vpack.c.bf16 %v652_v26, %v650_v25  ;;  %v670_v25 = vld [vmem:[#allocation5 + $0x8c8] sm:$0xff]  ;;  %v672_v26 = vld [vmem:[#allocation5 + $0x8d8] sm:$0xff] }
 0x1a7   : > { %3043 = vmatpush1.bf16.msra.mxu0 %v3042_v34  ;;  %2661 = vmatprep.subr.bf16.mxu1 %v2660_v35  ;;  %v649_v34 = vld [vmem:[#allocation5 + $0x820] sm:$0xff]  ;;  %v651_v35 = vld [vmem:[#allocation5 + $0x830] sm:$0xff]  ;;  %v1056_v28 = vld [vmem:[#allocation5 + $0x14d8] sm:$0xff] }
 0x1a8   : > { %3045 = vmatprep.subr.bf16.mxu0 %v3044_v39  ;;  %v654_v39 = vld [vmem:[#allocation5 + $0x848] sm:$0xff]  ;;  %v2682_v44 = vpack.c.bf16 %v651_v35, %v649_v34  ;;  %v1053_v34 = vld [vmem:[#allocation5 + $0x14c0] sm:$0xff]  ;;  %v3084_v35 = vpack.c.bf16 %v1056_v28, %v1054_v27 }
 0x1a9   : > { %v689_v28 = vld [vmem:[#allocation5 + $0x960] sm:$0xff] }
 0x1aa   : > { %2663 = vmatpush1.bf16.msra.mxu1 %v2662_v45  ;;  %v385_v45 = vld [vmem:[%s3849_s13 + $0xa8] sm:$0xff] }
 0x1ab   : > { %3047 = vmatpush1.bf16.msra.mxu0 %v3046_v46  ;;  %2665 = vmatprep.subr.bf16.mxu1 %v2664_v47  ;;  %v3066_v46 = vpack.c.bf16 %v1035_v38, %v1033_v36  ;;  %v2684_v47 = vpack.c.bf16 %v656_v40, %v654_v39  ;;  %v1055_v36 = vld [vmem:[#allocation5 + $0x14d0] sm:$0xff]  ;;  %v676_v38 = vld [vmem:[#allocation5 + $0x8f8] sm:$0xff]  ;;  %v1058_v39 = vld [vmem:[#allocation5 + $0x14e8] sm:$0xff] }
 0x1ac   : > { %3049 = vmatprep.subr.bf16.mxu0 %v3048_v51  ;;  %v3068_v51 = vpack.c.bf16 %v1040_v42, %v1038_v41  ;;  %v1060_v40 = vld [vmem:[#allocation5 + $0x14f8] sm:$0xff]  ;;  %v3086_v42 = vpack.c.bf16 %v1055_v36, %v1053_v34 }
 0x1ad   : > { %v696_v34 = vld [vmem:[#allocation5 + $0x998] sm:$0xff] }
 0x1ae   : > { %2667 = vmatpush1.bf16.msra.mxu1 %v2666_v57  ;;  %v2686_v57 = vpack.c.bf16 %v655_v49, %v653_v48  ;;  %v1059_v48 = vld [vmem:[#allocation5 + $0x14f0] sm:$0xff]  ;;  %v678_v49 = vld [vmem:[#allocation5 + $0x908] sm:$0xff]  ;;  %v1080_v36 = vld [vmem:[#allocation5 + $0x1598] sm:$0xff] }
 0x1af   : > { %3051 = vmatpush1.bf16.msra.mxu0 %v3050_v58  ;;  %2669 = vmatprep.subr.bf16.mxu1 %v2668_v59  ;;  %v3070_v58 = vpack.c.bf16 %v1039_v52, %v1037_v50  ;;  %v2688_v59 = vpack.c.bf16 %v660_v54, %v658_v53  ;;  %v680_v50 = vld [vmem:[#allocation5 + $0x918] sm:$0xff] }
 0x1b0   : > { %3053 = vmatprep.subr.bf16.mxu0 %v3052_v63  ;;  %v3072_v63 = vpack.c.bf16 %v1044_v56, %v1042_v55  ;;  %v1064_v52 = vld [vmem:[#allocation5 + $0x1518] sm:$0xff]  ;;  %v2708_v55 = vpack.c.bf16 %v680_v50, %v678_v49  ;;  %v677_v56 = vld [vmem:[#allocation5 + $0x900] sm:$0xff] }
 0x1b2   : > { %2671 = vmatpush1.bf16.msra.mxu1 %v2670_v5  ;;  %v2690_v5 = vpack.c.bf16 %v659_v61, %v657_v60  ;;  %v1063_v60 = vld [vmem:[#allocation5 + $0x1510] sm:$0xff]  ;;  %v682_v61 = vld [vmem:[#allocation5 + $0x928] sm:$0xff] }
 0x1b3   : > { %3055 = vmatpush1.bf16.msra.mxu0 %v3054_v6  ;;  %2673 = vmatprep.subr.bf16.mxu1 %v2672_v7  ;;  %v3074_v6 = vpack.c.bf16 %v1043_v0, %v1041_v62  ;;  %v2692_v7 = vpack.c.bf16 %v664_v2, %v662_v1  ;;  %v684_v62 = vld [vmem:[#allocation5 + $0x938] sm:$0xff] }
 0x1b4   : > { %3057 = vmatprep.subr.bf16.mxu0 %v3056_v11  ;;  %v3076_v11 = vpack.c.bf16 %v1048_v4, %v1046_v3  ;;  %v1068_v0 = vld [vmem:[#allocation5 + $0x1538] sm:$0xff]  ;;  %v2712_v3 = vpack.c.bf16 %v684_v62, %v682_v61  ;;  %v681_v4 = vld [vmem:[#allocation5 + $0x920] sm:$0xff] }
 0x1b6   : > { %2675 = vmatpush1.bf16.msra.mxu1 %v2674_v17  ;;  %v2694_v17 = vpack.c.bf16 %v663_v9, %v661_v8  ;;  %v1067_v8 = vld [vmem:[#allocation5 + $0x1530] sm:$0xff]  ;;  %v686_v9 = vld [vmem:[#allocation5 + $0x948] sm:$0xff] }
 0x1b7   : > { %3059 = vmatpush1.bf16.msra.mxu0 %v3058_v18  ;;  %2677 = vmatprep.subr.bf16.mxu1 %v2676_v19  ;;  %v3078_v18 = vpack.c.bf16 %v1047_v12, %v1045_v10  ;;  %v2696_v19 = vpack.c.bf16 %v668_v14, %v666_v13  ;;  %v688_v10 = vld [vmem:[#allocation5 + $0x958] sm:$0xff] }
 0x1b8   : > { %3061 = vmatprep.subr.bf16.mxu0 %v3060_v23  ;;  %v3080_v23 = vpack.c.bf16 %v1052_v16, %v1050_v15  ;;  %v1072_v12 = vld [vmem:[#allocation5 + $0x1558] sm:$0xff]  ;;  %v2716_v15 = vpack.c.bf16 %v688_v10, %v686_v9  ;;  %v685_v16 = vld [vmem:[#allocation5 + $0x940] sm:$0xff] }
 0x1b9   : > { %1467 = vmatmul.mubr.f32.vlgmr.msra.gmra.mrb[0].mxu1 %v370_v29  ;;  %v2698_v29 = vpack.c.bf16 %v667_v21, %v665_v20  ;;  %v1071_v20 = vld [vmem:[#allocation5 + $0x1550] sm:$0xff]  ;;  %v690_v21 = vld [vmem:[#allocation5 + $0x968] sm:$0xff] }
 0x1ba   : > { %2679 = vmatpush1.bf16.msra.mxu1 %v2678_v30  ;;  %1893 = vmatmul.mubr.f32.vlgmr.msra.gmra.mrb[0].mxu0 %v382_v31  ;;  %v3082_v30 = vpack.c.bf16 %v1051_v24, %v1049_v22  ;;  %v2700_v31 = vpack.c.bf16 %v672_v26, %v670_v25  ;;  %v692_v22 = vld [vmem:[#allocation5 + $0x978] sm:$0xff] }
 0x1bb   : > { %3063 = vmatpush1.bf16.msra.mxu0 %v3062_v32  ;;  %2681 = vmatprep.subr.bf16.mxu1 %v2680_v33  ;;  %v669_v32 = vld [vmem:[#allocation5 + $0x8c0] sm:$0xff]  ;;  %v671_v33 = vld [vmem:[#allocation5 + $0x8d0] sm:$0xff]  ;;  %v1076_v24 = vld [vmem:[#allocation5 + $0x1578] sm:$0xff]  ;;  %v2720_v27 = vpack.c.bf16 %v692_v22, %v690_v21 }
 0x1bc   : > { %3065 = vmatprep.subr.bf16.mxu0 %v3064_v37  ;;  %1537 = vmatprep.mubr.f32.mxu1 %v373_v43  ;;  %v674_v37 = vld [vmem:[#allocation5 + $0x8e8] sm:$0xff]  ;;  %v2702_v41 = vpack.c.bf16 %v671_v33, %v669_v32  ;;  %v1075_v32 = vld [vmem:[#allocation5 + $0x1570] sm:$0xff] }
 0x1bd   : > { %1963 = vmatprep.mubr.f32.mxu0 %v385_v45  ;;  %v2704_v43 = vpack.c.bf16 %v676_v38, %v674_v37  ;;  %v675_v45 = vld [vmem:[#allocation5 + $0x8f0] sm:$0xff]  ;;  %v694_v33 = vld [vmem:[#allocation5 + $0x988] sm:$0xff] }
 0x1be   : > { %2683 = vmatpush1.bf16.msra.mxu1 %v2682_v44  ;;  %v673_v44 = vld [vmem:[#allocation5 + $0x8e0] sm:$0xff] }
 0x1bf   : > { %3067 = vmatpush1.bf16.msra.mxu0 %v3066_v46  ;;  %2685 = vmatprep.subr.bf16.mxu1 %v2684_v47  ;;  %v1057_v46 = vld [vmem:[#allocation5 + $0x14e0] sm:$0xff]  ;;  %v3088_v47 = vpack.c.bf16 %v1060_v40, %v1058_v39  ;;  %v2706_v53 = vpack.c.bf16 %v675_v45, %v673_v44  ;;  %v2724_v39 = vpack.c.bf16 %v696_v34, %v694_v33  ;;  %v1079_v44 = vld [vmem:[#allocation5 + $0x1590] sm:$0xff]  ;;  %v698_v45 = vld [vmem:[#allocation5 + $0x9a8] sm:$0xff] }
 0x1c0   : > { %3069 = vmatprep.subr.bf16.mxu0 %v3068_v51  ;;  %v1062_v51 = vld [vmem:[#allocation5 + $0x1508] sm:$0xff]  ;;  %v3090_v54 = vpack.c.bf16 %v1059_v48, %v1057_v46  ;;  %v693_v40 = vld [vmem:[#allocation5 + $0x980] sm:$0xff]  ;;  %v700_v46 = vld [vmem:[#allocation5 + $0x9b8] sm:$0xff] }
 0x1c1   : > { %v1084_v48 = vld [vmem:[#allocation5 + $0x15b8] sm:$0xff] }
 0x1c2   : > { %2687 = vmatpush1.bf16.msra.mxu1 %v2686_v57  ;;  %v679_v57 = vld [vmem:[#allocation5 + $0x910] sm:$0xff] }
 0x1c3   : > { %3071 = vmatpush1.bf16.msra.mxu0 %v3070_v58  ;;  %2689 = vmatprep.subr.bf16.mxu1 %v2688_v59  ;;  %v1061_v58 = vld [vmem:[#allocation5 + $0x1500] sm:$0xff]  ;;  %v3092_v59 = vpack.c.bf16 %v1064_v52, %v1062_v51  ;;  %v2710_v1 = vpack.c.bf16 %v679_v57, %v677_v56  ;;  %v2728_v51 = vpack.c.bf16 %v700_v46, %v698_v45  ;;  %v1083_v56 = vld [vmem:[#allocation5 + $0x15b0] sm:$0xff]  ;;  %v702_v57 = vld [vmem:[#allocation5 + $0x9c8] sm:$0xff] }
 0x1c4   : > { %3073 = vmatprep.subr.bf16.mxu0 %v3072_v63  ;;  %v1066_v63 = vld [vmem:[#allocation5 + $0x1528] sm:$0xff]  ;;  %v3094_v2 = vpack.c.bf16 %v1063_v60, %v1061_v58  ;;  %v697_v52 = vld [vmem:[#allocation5 + $0x9a0] sm:$0xff]  ;;  %v704_v58 = vld [vmem:[#allocation5 + $0x9d8] sm:$0xff] }
 0x1c5   : > { %v1088_v60 = vld [vmem:[#allocation5 + $0x15d8] sm:$0xff]  ;;  %v1102_v45 = vld [vmem:[#allocation5 + $0x1648] sm:$0xff] }
 0x1c6   : > { %2691 = vmatpush1.bf16.msra.mxu1 %v2690_v5  ;;  %v683_v5 = vld [vmem:[#allocation5 + $0x930] sm:$0xff]  ;;  %v1104_v46 = vld [vmem:[#allocation5 + $0x1658] sm:$0xff] }
 0x1c7   : > { %3075 = vmatpush1.bf16.msra.mxu0 %v3074_v6  ;;  %2693 = vmatprep.subr.bf16.mxu1 %v2692_v7  ;;  %v1065_v6 = vld [vmem:[#allocation5 + $0x1520] sm:$0xff]  ;;  %v3096_v7 = vpack.c.bf16 %v1068_v0, %v1066_v63  ;;  %v2714_v13 = vpack.c.bf16 %v683_v5, %v681_v4  ;;  %v2732_v63 = vpack.c.bf16 %v704_v58, %v702_v57  ;;  %v1087_v4 = vld [vmem:[#allocation5 + $0x15d0] sm:$0xff]  ;;  %v706_v5 = vld [vmem:[#allocation5 + $0x9e8] sm:$0xff] }
 0x1c8   : > { %3077 = vmatprep.subr.bf16.mxu0 %v3076_v11  ;;  %v1070_v11 = vld [vmem:[#allocation5 + $0x1548] sm:$0xff]  ;;  %v3098_v14 = vpack.c.bf16 %v1067_v8, %v1065_v6  ;;  %v701_v0 = vld [vmem:[#allocation5 + $0x9c0] sm:$0xff]  ;;  %v708_v6 = vld [vmem:[#allocation5 + $0x9f8] sm:$0xff] }
 0x1c9   : > { %v1092_v8 = vld [vmem:[#allocation5 + $0x15f8] sm:$0xff]  ;;  %v722_v57 = vld [vmem:[#allocation5 + $0xa68] sm:$0xff] }
 0x1ca   : > { %2695 = vmatpush1.bf16.msra.mxu1 %v2694_v17  ;;  %v687_v17 = vld [vmem:[#allocation5 + $0x950] sm:$0xff]  ;;  %v724_v58 = vld [vmem:[#allocation5 + $0xa78] sm:$0xff] }
 0x1cb   : > { %3079 = vmatpush1.bf16.msra.mxu0 %v3078_v18  ;;  %2697 = vmatprep.subr.bf16.mxu1 %v2696_v19  ;;  %v1069_v18 = vld [vmem:[#allocation5 + $0x1540] sm:$0xff]  ;;  %v3100_v19 = vpack.c.bf16 %v1072_v12, %v1070_v11  ;;  %v2718_v25 = vpack.c.bf16 %v687_v17, %v685_v16  ;;  %v2736_v11 = vpack.c.bf16 %v708_v6, %v706_v5  ;;  %v1091_v16 = vld [vmem:[#allocation5 + $0x15f0] sm:$0xff]  ;;  %v710_v17 = vld [vmem:[#allocation5 + $0xa08] sm:$0xff] }
 0x1cc   : > { %3081 = vmatprep.subr.bf16.mxu0 %v3080_v23  ;;  %v1074_v23 = vld [vmem:[#allocation5 + $0x1568] sm:$0xff]  ;;  %v3102_v26 = vpack.c.bf16 %v1071_v20, %v1069_v18  ;;  %v705_v12 = vld [vmem:[#allocation5 + $0x9e0] sm:$0xff]  ;;  %v712_v18 = vld [vmem:[#allocation5 + $0xa18] sm:$0xff] }
 0x1cd   : > { %v1096_v20 = vld [vmem:[#allocation5 + $0x1618] sm:$0xff]  ;;  %v726_v5 = vld [vmem:[#allocation5 + $0xa88] sm:$0xff] }
 0x1ce   : > { %2699 = vmatpush1.bf16.msra.mxu1 %v2698_v29  ;;  %v691_v29 = vld [vmem:[#allocation5 + $0x970] sm:$0xff]  ;;  %v728_v6 = vld [vmem:[#allocation5 + $0xa98] sm:$0xff] }
 0x1cf   : > { %3083 = vmatpush1.bf16.msra.mxu0 %v3082_v30  ;;  %2701 = vmatprep.subr.bf16.mxu1 %v2700_v31  ;;  %v1073_v30 = vld [vmem:[#allocation5 + $0x1560] sm:$0xff]  ;;  %v3104_v31 = vpack.c.bf16 %v1076_v24, %v1074_v23  ;;  %v2722_v37 = vpack.c.bf16 %v691_v29, %v689_v28  ;;  %v2740_v23 = vpack.c.bf16 %v712_v18, %v710_v17  ;;  %v1095_v28 = vld [vmem:[#allocation5 + $0x1610] sm:$0xff]  ;;  %v714_v29 = vld [vmem:[#allocation5 + $0xa28] sm:$0xff] }
 0x1d0   : > { %3085 = vmatprep.subr.bf16.mxu0 %v3084_v35  ;;  %v1078_v35 = vld [vmem:[#allocation5 + $0x1588] sm:$0xff]  ;;  %v3106_v38 = vpack.c.bf16 %v1075_v32, %v1073_v30  ;;  %v709_v24 = vld [vmem:[#allocation5 + $0xa00] sm:$0xff]  ;;  %v716_v30 = vld [vmem:[#allocation5 + $0xa38] sm:$0xff] }
 0x1d1   : > { %v1100_v32 = vld [vmem:[#allocation5 + $0x1638] sm:$0xff]  ;;  %v730_v17 = vld [vmem:[#allocation5 + $0xaa8] sm:$0xff] }
 0x1d2   : > { %2703 = vmatpush1.bf16.msra.mxu1 %v2702_v41  ;;  %v695_v41 = vld [vmem:[#allocation5 + $0x990] sm:$0xff]  ;;  %v732_v18 = vld [vmem:[#allocation5 + $0xab8] sm:$0xff] }
 0x1d3   : > { %3087 = vmatpush1.bf16.msra.mxu0 %v3086_v42  ;;  %2705 = vmatprep.subr.bf16.mxu1 %v2704_v43  ;;  %v1077_v42 = vld [vmem:[#allocation5 + $0x1580] sm:$0xff]  ;;  %v3108_v43 = vpack.c.bf16 %v1080_v36, %v1078_v35  ;;  %v2726_v49 = vpack.c.bf16 %v695_v41, %v693_v40  ;;  %v372_v33 = vld [vmem:[%s3849_s13 + $0x40] sm:$0xff] }
 0x1d4   : > { %3089 = vmatprep.subr.bf16.mxu0 %v3088_v47  ;;  %v1082_v47 = vld [vmem:[#allocation5 + $0x15a8] sm:$0xff]  ;;  %v3110_v50 = vpack.c.bf16 %v1079_v44, %v1077_v42  ;;  %v384_v35 = vld [vmem:[%s3849_s13 + $0xa0] sm:$0xff]  ;;  %v1097_v40 = vld [vmem:[#allocation5 + $0x1620] sm:$0xff] }
 0x1d5   : > { %v1099_v42 = vld [vmem:[#allocation5 + $0x1630] sm:$0xff]  ;;  %v720_v44 = vld [vmem:[#allocation5 + $0xa58] sm:$0xff] }
 0x1d6   : > { %2707 = vmatpush1.bf16.msra.mxu1 %v2706_v53  ;;  %v699_v53 = vld [vmem:[#allocation5 + $0x9b0] sm:$0xff] }
 0x1d7   : > { %3091 = vmatpush1.bf16.msra.mxu0 %v3090_v54  ;;  %2709 = vmatprep.subr.bf16.mxu1 %v2708_v55  ;;  %v1081_v54 = vld [vmem:[#allocation5 + $0x15a0] sm:$0xff]  ;;  %v3112_v55 = vpack.c.bf16 %v1084_v48, %v1082_v47  ;;  %v2730_v61 = vpack.c.bf16 %v699_v53, %v697_v52  ;;  %v375_v47 = vld [vmem:[%s3849_s13 + $0x58] sm:$0xff] }
 0x1d8   : > { %3093 = vmatprep.subr.bf16.mxu0 %v3092_v59  ;;  %v1086_v59 = vld [vmem:[#allocation5 + $0x15c8] sm:$0xff]  ;;  %v3114_v62 = vpack.c.bf16 %v1083_v56, %v1081_v54  ;;  %v717_v52 = vld [vmem:[#allocation5 + $0xa40] sm:$0xff]  ;;  %v719_v53 = vld [vmem:[#allocation5 + $0xa50] sm:$0xff] }
 0x1d9   : > { %v1101_v54 = vld [vmem:[#allocation5 + $0x1640] sm:$0xff]  ;;  %v1103_v56 = vld [vmem:[#allocation5 + $0x1650] sm:$0xff] }
 0x1da   : > { %2711 = vmatpush1.bf16.msra.mxu1 %v2710_v1  ;;  %v703_v1 = vld [vmem:[#allocation5 + $0x9d0] sm:$0xff] }
 0x1db   : > { %3095 = vmatpush1.bf16.msra.mxu0 %v3094_v2  ;;  %2713 = vmatprep.subr.bf16.mxu1 %v2712_v3  ;;  %v1085_v2 = vld [vmem:[#allocation5 + $0x15c0] sm:$0xff]  ;;  %v3116_v3 = vpack.c.bf16 %v1088_v60, %v1086_v59  ;;  %v2734_v9 = vpack.c.bf16 %v703_v1, %v701_v0  ;;  %v1106_v59 = vld [vmem:[#allocation5 + $0x1668] sm:$0xff]  ;;  %v1108_v60 = vld [vmem:[#allocation5 + $0x1678] sm:$0xff] }
 0x1dc   : > { %3097 = vmatprep.subr.bf16.mxu0 %v3096_v7  ;;  %v1090_v7 = vld [vmem:[#allocation5 + $0x15e8] sm:$0xff]  ;;  %v3118_v10 = vpack.c.bf16 %v1087_v4, %v1085_v2  ;;  %v721_v0 = vld [vmem:[#allocation5 + $0xa60] sm:$0xff]  ;;  %v723_v1 = vld [vmem:[#allocation5 + $0xa70] sm:$0xff] }
 0x1dd   : > { %v1105_v2 = vld [vmem:[#allocation5 + $0x1660] sm:$0xff]  ;;  %v1107_v4 = vld [vmem:[#allocation5 + $0x1670] sm:$0xff] }
 0x1de   : > { %2715 = vmatpush1.bf16.msra.mxu1 %v2714_v13  ;;  %v707_v13 = vld [vmem:[#allocation5 + $0x9f0] sm:$0xff] }
 0x1df   : > { %3099 = vmatpush1.bf16.msra.mxu0 %v3098_v14  ;;  %2717 = vmatprep.subr.bf16.mxu1 %v2716_v15  ;;  %v1089_v14 = vld [vmem:[#allocation5 + $0x15e0] sm:$0xff]  ;;  %v3120_v15 = vpack.c.bf16 %v1092_v8, %v1090_v7  ;;  %v2738_v21 = vpack.c.bf16 %v707_v13, %v705_v12  ;;  %v1110_v7 = vld [vmem:[#allocation5 + $0x1688] sm:$0xff]  ;;  %v1112_v8 = vld [vmem:[#allocation5 + $0x1698] sm:$0xff] }
 0x1e0   : > { %3101 = vmatprep.subr.bf16.mxu0 %v3100_v19  ;;  %v1094_v19 = vld [vmem:[#allocation5 + $0x1608] sm:$0xff]  ;;  %v3122_v22 = vpack.c.bf16 %v1091_v16, %v1089_v14  ;;  %v725_v12 = vld [vmem:[#allocation5 + $0xa80] sm:$0xff]  ;;  %v727_v13 = vld [vmem:[#allocation5 + $0xa90] sm:$0xff] }
 0x1e1   : > { %v1109_v14 = vld [vmem:[#allocation5 + $0x1680] sm:$0xff]  ;;  %v1111_v16 = vld [vmem:[#allocation5 + $0x1690] sm:$0xff] }
 0x1e2   : > { %2719 = vmatpush1.bf16.msra.mxu1 %v2718_v25  ;;  %v711_v25 = vld [vmem:[#allocation5 + $0xa10] sm:$0xff] }
 0x1e3   : > { %3103 = vmatpush1.bf16.msra.mxu0 %v3102_v26  ;;  %2721 = vmatprep.subr.bf16.mxu1 %v2720_v27  ;;  %v1093_v26 = vld [vmem:[#allocation5 + $0x1600] sm:$0xff]  ;;  %v3124_v27 = vpack.c.bf16 %v1096_v20, %v1094_v19  ;;  %v2742_v34 = vpack.c.bf16 %v711_v25, %v709_v24  ;;  %v1114_v19 = vld [vmem:[#allocation5 + $0x16a8] sm:$0xff]  ;;  %v1116_v20 = vld [vmem:[#allocation5 + $0x16b8] sm:$0xff] }
 0x1e4   : > { %3105 = vmatprep.subr.bf16.mxu0 %v3104_v31  ;;  %v1098_v31 = vld [vmem:[#allocation5 + $0x1628] sm:$0xff]  ;;  %v3126_v36 = vpack.c.bf16 %v1095_v28, %v1093_v26  ;;  %v729_v24 = vld [vmem:[#allocation5 + $0xaa0] sm:$0xff]  ;;  %v731_v25 = vld [vmem:[#allocation5 + $0xab0] sm:$0xff] }
 0x1e5   : > { %v3128_v41 = vpack.c.bf16 %v1100_v32, %v1098_v31  ;;  %v1113_v26 = vld [vmem:[#allocation5 + $0x16a0] sm:$0xff]  ;;  %v1115_v28 = vld [vmem:[#allocation5 + $0x16b0] sm:$0xff]  ;;  %v1118_v31 = vld [vmem:[#allocation5 + $0x16c8] sm:$0xff] }
 0x1e6   : > { %2723 = vmatpush1.bf16.msra.mxu1 %v2722_v37  ;;  %v2744_v37 = vpack.c.bf16 %v716_v30, %v714_v29  ;;  %v734_v29 = vld [vmem:[#allocation5 + $0xac8] sm:$0xff]  ;;  %v736_v30 = vld [vmem:[#allocation5 + $0xad8] sm:$0xff] }
 0x1e7   : > { %3107 = vmatpush1.bf16.msra.mxu0 %v3106_v38  ;;  %2725 = vmatprep.subr.bf16.mxu1 %v2724_v39  ;;  %v713_v38 = vld [vmem:[#allocation5 + $0xa20] sm:$0xff]  ;;  %v715_v39 = vld [vmem:[#allocation5 + $0xa30] sm:$0xff]  ;;  %v1120_v32 = vld [vmem:[#allocation5 + $0x16d8] sm:$0xff] }
 0x1e8   : > { %3109 = vmatprep.subr.bf16.mxu0 %v3108_v43  ;;  %v718_v43 = vld [vmem:[#allocation5 + $0xa48] sm:$0xff]  ;;  %v2746_v48 = vpack.c.bf16 %v715_v39, %v713_v38  ;;  %v1117_v38 = vld [vmem:[#allocation5 + $0x16c0] sm:$0xff]  ;;  %v3148_v39 = vpack.c.bf16 %v1120_v32, %v1118_v31 }
 0x1e9   : > { %v753_v32 = vld [vmem:[#allocation5 + $0xb60] sm:$0xff] }
 0x1ea   : > { %2727 = vmatpush1.bf16.msra.mxu1 %v2726_v49  ;;  %v387_v49 = vld [vmem:[%s3849_s13 + $0xb8] sm:$0xff] }
 0x1eb   : > { %3111 = vmatpush1.bf16.msra.mxu0 %v3110_v50  ;;  %2729 = vmatprep.subr.bf16.mxu1 %v2728_v51  ;;  %v3130_v50 = vpack.c.bf16 %v1099_v42, %v1097_v40  ;;  %v2748_v51 = vpack.c.bf16 %v720_v44, %v718_v43  ;;  %v1119_v40 = vld [vmem:[#allocation5 + $0x16d0] sm:$0xff]  ;;  %v740_v42 = vld [vmem:[#allocation5 + $0xaf8] sm:$0xff]  ;;  %v1122_v43 = vld [vmem:[#allocation5 + $0x16e8] sm:$0xff] }
 0x1ec   : > { %3113 = vmatprep.subr.bf16.mxu0 %v3112_v55  ;;  %v3132_v55 = vpack.c.bf16 %v1104_v46, %v1102_v45  ;;  %v1124_v44 = vld [vmem:[#allocation5 + $0x16f8] sm:$0xff]  ;;  %v3150_v46 = vpack.c.bf16 %v1119_v40, %v1117_v38 }
 0x1ed   : > { %v760_v38 = vld [vmem:[#allocation5 + $0xb98] sm:$0xff] }
 0x1ee   : > { %2731 = vmatpush1.bf16.msra.mxu1 %v2730_v61  ;;  %v2750_v61 = vpack.c.bf16 %v719_v53, %v717_v52  ;;  %v1123_v52 = vld [vmem:[#allocation5 + $0x16f0] sm:$0xff]  ;;  %v742_v53 = vld [vmem:[#allocation5 + $0xb08] sm:$0xff]  ;;  %v1144_v40 = vld [vmem:[#allocation5 + $0x1798] sm:$0xff] }
 0x1ef   : > { %3115 = vmatpush1.bf16.msra.mxu0 %v3114_v62  ;;  %2733 = vmatprep.subr.bf16.mxu1 %v2732_v63  ;;  %v3134_v62 = vpack.c.bf16 %v1103_v56, %v1101_v54  ;;  %v2752_v63 = vpack.c.bf16 %v724_v58, %v722_v57  ;;  %v744_v54 = vld [vmem:[#allocation5 + $0xb18] sm:$0xff] }
 0x1f0   : > { %3117 = vmatprep.subr.bf16.mxu0 %v3116_v3  ;;  %v3136_v3 = vpack.c.bf16 %v1108_v60, %v1106_v59  ;;  %v1128_v56 = vld [vmem:[#allocation5 + $0x1718] sm:$0xff]  ;;  %v2772_v59 = vpack.c.bf16 %v744_v54, %v742_v53  ;;  %v741_v60 = vld [vmem:[#allocation5 + $0xb00] sm:$0xff] }
 0x1f2   : > { %2735 = vmatpush1.bf16.msra.mxu1 %v2734_v9  ;;  %v2754_v9 = vpack.c.bf16 %v723_v1, %v721_v0  ;;  %v1127_v0 = vld [vmem:[#allocation5 + $0x1710] sm:$0xff]  ;;  %v746_v1 = vld [vmem:[#allocation5 + $0xb28] sm:$0xff] }
 0x1f3   : > { %3119 = vmatpush1.bf16.msra.mxu0 %v3118_v10  ;;  %2737 = vmatprep.subr.bf16.mxu1 %v2736_v11  ;;  %v3138_v10 = vpack.c.bf16 %v1107_v4, %v1105_v2  ;;  %v2756_v11 = vpack.c.bf16 %v728_v6, %v726_v5  ;;  %v748_v2 = vld [vmem:[#allocation5 + $0xb38] sm:$0xff] }
 0x1f4   : > { %3121 = vmatprep.subr.bf16.mxu0 %v3120_v15  ;;  %v3140_v15 = vpack.c.bf16 %v1112_v8, %v1110_v7  ;;  %v1132_v4 = vld [vmem:[#allocation5 + $0x1738] sm:$0xff]  ;;  %v2776_v7 = vpack.c.bf16 %v748_v2, %v746_v1  ;;  %v745_v8 = vld [vmem:[#allocation5 + $0xb20] sm:$0xff] }
 0x1f6   : > { %2739 = vmatpush1.bf16.msra.mxu1 %v2738_v21  ;;  %v2758_v21 = vpack.c.bf16 %v727_v13, %v725_v12  ;;  %v1131_v12 = vld [vmem:[#allocation5 + $0x1730] sm:$0xff]  ;;  %v750_v13 = vld [vmem:[#allocation5 + $0xb48] sm:$0xff] }
 0x1f7   : > { %3123 = vmatpush1.bf16.msra.mxu0 %v3122_v22  ;;  %2741 = vmatprep.subr.bf16.mxu1 %v2740_v23  ;;  %v3142_v22 = vpack.c.bf16 %v1111_v16, %v1109_v14  ;;  %v2760_v23 = vpack.c.bf16 %v732_v18, %v730_v17  ;;  %v752_v14 = vld [vmem:[#allocation5 + $0xb58] sm:$0xff] }
 0x1f8   : > { %3125 = vmatprep.subr.bf16.mxu0 %v3124_v27  ;;  %v3144_v27 = vpack.c.bf16 %v1116_v20, %v1114_v19  ;;  %v1136_v16 = vld [vmem:[#allocation5 + $0x1758] sm:$0xff]  ;;  %v2780_v19 = vpack.c.bf16 %v752_v14, %v750_v13  ;;  %v749_v20 = vld [vmem:[#allocation5 + $0xb40] sm:$0xff] }
 0x1f9   : > { %1538 = vmatmul.mubr.f32.vlgmr.msra.gmra.mrb[0].mxu1 %v372_v33  ;;  %v2762_v33 = vpack.c.bf16 %v731_v25, %v729_v24  ;;  %v1135_v24 = vld [vmem:[#allocation5 + $0x1750] sm:$0xff]  ;;  %v754_v25 = vld [vmem:[#allocation5 + $0xb68] sm:$0xff] }
 0x1fa   : > { %2743 = vmatpush1.bf16.msra.mxu1 %v2742_v34  ;;  %1964 = vmatmul.mubr.f32.vlgmr.msra.gmra.mrb[0].mxu0 %v384_v35  ;;  %v3146_v34 = vpack.c.bf16 %v1115_v28, %v1113_v26  ;;  %v2764_v35 = vpack.c.bf16 %v736_v30, %v734_v29  ;;  %v756_v26 = vld [vmem:[#allocation5 + $0xb78] sm:$0xff] }
 0x1fb   : > { %3127 = vmatpush1.bf16.msra.mxu0 %v3126_v36  ;;  %2745 = vmatprep.subr.bf16.mxu1 %v2744_v37  ;;  %v733_v36 = vld [vmem:[#allocation5 + $0xac0] sm:$0xff]  ;;  %v735_v37 = vld [vmem:[#allocation5 + $0xad0] sm:$0xff]  ;;  %v1140_v28 = vld [vmem:[#allocation5 + $0x1778] sm:$0xff]  ;;  %v2784_v31 = vpack.c.bf16 %v756_v26, %v754_v25 }
 0x1fc   : > { %3129 = vmatprep.subr.bf16.mxu0 %v3128_v41  ;;  %1608 = vmatprep.mubr.f32.mxu1 %v375_v47  ;;  %v738_v41 = vld [vmem:[#allocation5 + $0xae8] sm:$0xff]  ;;  %v2766_v45 = vpack.c.bf16 %v735_v37, %v733_v36  ;;  %v1139_v36 = vld [vmem:[#allocation5 + $0x1770] sm:$0xff] }
 0x1fd   : > { %2034 = vmatprep.mubr.f32.mxu0 %v387_v49  ;;  %v2768_v47 = vpack.c.bf16 %v740_v42, %v738_v41  ;;  %v739_v49 = vld [vmem:[#allocation5 + $0xaf0] sm:$0xff]  ;;  %v758_v37 = vld [vmem:[#allocation5 + $0xb88] sm:$0xff] }
 0x1fe   : > { %2747 = vmatpush1.bf16.msra.mxu1 %v2746_v48  ;;  %v737_v48 = vld [vmem:[#allocation5 + $0xae0] sm:$0xff] }
 0x1ff   : > { %3131 = vmatpush1.bf16.msra.mxu0 %v3130_v50  ;;  %2749 = vmatprep.subr.bf16.mxu1 %v2748_v51  ;;  %v1121_v50 = vld [vmem:[#allocation5 + $0x16e0] sm:$0xff]  ;;  %v3152_v51 = vpack.c.bf16 %v1124_v44, %v1122_v43  ;;  %v2770_v57 = vpack.c.bf16 %v739_v49, %v737_v48  ;;  %v2788_v43 = vpack.c.bf16 %v760_v38, %v758_v37  ;;  %v1143_v48 = vld [vmem:[#allocation5 + $0x1790] sm:$0xff]  ;;  %v762_v49 = vld [vmem:[#allocation5 + $0xba8] sm:$0xff] }
 0x200   : > { %3133 = vmatprep.subr.bf16.mxu0 %v3132_v55  ;;  %v1126_v55 = vld [vmem:[#allocation5 + $0x1708] sm:$0xff]  ;;  %v3154_v58 = vpack.c.bf16 %v1123_v52, %v1121_v50  ;;  %v757_v44 = vld [vmem:[#allocation5 + $0xb80] sm:$0xff]  ;;  %v764_v50 = vld [vmem:[#allocation5 + $0xbb8] sm:$0xff] }
 0x201   : > { %v1148_v52 = vld [vmem:[#allocation5 + $0x17b8] sm:$0xff]  ;;  %v374_v37 = vld [vmem:[%s3849_s13 + $0x50] sm:$0xff] }
 0x202   : > { %2751 = vmatpush1.bf16.msra.mxu1 %v2750_v61  ;;  %v743_v61 = vld [vmem:[#allocation5 + $0xb10] sm:$0xff]  ;;  %v386_v38 = vld [vmem:[%s3849_s13 + $0xb0] sm:$0xff] }
 0x203   : > { %3135 = vmatpush1.bf16.msra.mxu0 %v3134_v62  ;;  %2753 = vmatprep.subr.bf16.mxu1 %v2752_v63  ;;  %v1125_v62 = vld [vmem:[#allocation5 + $0x1700] sm:$0xff]  ;;  %v3156_v63 = vpack.c.bf16 %v1128_v56, %v1126_v55  ;;  %v2774_v5 = vpack.c.bf16 %v743_v61, %v741_v60  ;;  %v2792_v55 = vpack.c.bf16 %v764_v50, %v762_v49  ;;  %v1147_v60 = vld [vmem:[#allocation5 + $0x17b0] sm:$0xff]  ;;  %v766_v61 = vld [vmem:[#allocation5 + $0xbc8] sm:$0xff] }
 0x204   : > { %3137 = vmatprep.subr.bf16.mxu0 %v3136_v3  ;;  %v1130_v3 = vld [vmem:[#allocation5 + $0x1728] sm:$0xff]  ;;  %v3158_v6 = vpack.c.bf16 %v1127_v0, %v1125_v62  ;;  %v761_v56 = vld [vmem:[#allocation5 + $0xba0] sm:$0xff]  ;;  %v768_v62 = vld [vmem:[#allocation5 + $0xbd8] sm:$0xff] }
 0x205   : > { %v1152_v0 = vld [vmem:[#allocation5 + $0x17d8] sm:$0xff]  ;;  %v1166_v49 = vld [vmem:[#allocation5 + $0x1848] sm:$0xff] }
 0x206   : > { %2755 = vmatpush1.bf16.msra.mxu1 %v2754_v9  ;;  %v747_v9 = vld [vmem:[#allocation5 + $0xb30] sm:$0xff]  ;;  %v1168_v50 = vld [vmem:[#allocation5 + $0x1858] sm:$0xff] }
 0x207   : > { %3139 = vmatpush1.bf16.msra.mxu0 %v3138_v10  ;;  %2757 = vmatprep.subr.bf16.mxu1 %v2756_v11  ;;  %v1129_v10 = vld [vmem:[#allocation5 + $0x1720] sm:$0xff]  ;;  %v3160_v11 = vpack.c.bf16 %v1132_v4, %v1130_v3  ;;  %v2778_v17 = vpack.c.bf16 %v747_v9, %v745_v8  ;;  %v2796_v3 = vpack.c.bf16 %v768_v62, %v766_v61  ;;  %v1151_v8 = vld [vmem:[#allocation5 + $0x17d0] sm:$0xff]  ;;  %v770_v9 = vld [vmem:[#allocation5 + $0xbe8] sm:$0xff] }
 0x208   : > { %3141 = vmatprep.subr.bf16.mxu0 %v3140_v15  ;;  %v1134_v15 = vld [vmem:[#allocation5 + $0x1748] sm:$0xff]  ;;  %v3162_v18 = vpack.c.bf16 %v1131_v12, %v1129_v10  ;;  %v765_v4 = vld [vmem:[#allocation5 + $0xbc0] sm:$0xff]  ;;  %v772_v10 = vld [vmem:[#allocation5 + $0xbf8] sm:$0xff] }
 0x209   : > { %v1156_v12 = vld [vmem:[#allocation5 + $0x17f8] sm:$0xff]  ;;  %v1169_v62 = vld [vmem:[#allocation5 + $0x1860] sm:$0xff] }
 0x20a   : > { %2759 = vmatpush1.bf16.msra.mxu1 %v2758_v21  ;;  %v751_v21 = vld [vmem:[#allocation5 + $0xb50] sm:$0xff] }
 0x20b   : > { %3143 = vmatpush1.bf16.msra.mxu0 %v3142_v22  ;;  %2761 = vmatprep.subr.bf16.mxu1 %v2760_v23  ;;  %v1133_v22 = vld [vmem:[#allocation5 + $0x1740] sm:$0xff]  ;;  %v3164_v23 = vpack.c.bf16 %v1136_v16, %v1134_v15  ;;  %v2782_v29 = vpack.c.bf16 %v751_v21, %v749_v20  ;;  %v2800_v15 = vpack.c.bf16 %v772_v10, %v770_v9  ;;  %v1155_v20 = vld [vmem:[#allocation5 + $0x17f0] sm:$0xff] }
 0x20c   : > { %3145 = vmatprep.subr.bf16.mxu0 %v3144_v27  ;;  %v1138_v27 = vld [vmem:[#allocation5 + $0x1768] sm:$0xff]  ;;  %v3166_v30 = vpack.c.bf16 %v1135_v24, %v1133_v22  ;;  %v769_v16 = vld [vmem:[#allocation5 + $0xbe0] sm:$0xff]  ;;  %v1160_v24 = vld [vmem:[#allocation5 + $0x1818] sm:$0xff] }
 0x20d   : > { %v2130_v21 = vld [vmem:[#allocation8 + $0x80] sm:$0xff]  ;;  %v2131_v22 = vld [vmem:[#allocation8 + $0x88] sm:$0xff]  ;;  %v2121_v9 = vld [vmem:[#allocation8 + $0x38] sm:$0xff] }
 0x20e   : > { %2763 = vmatpush1.bf16.msra.mxu1 %v2762_v33  ;;  %v755_v33 = vld [vmem:[#allocation5 + $0xb70] sm:$0xff]  ;;  %v2138_v10 = vld [vmem:[#allocation8 + $0xc0] sm:$0xff] }
 0x20f   : > { %3147 = vmatpush1.bf16.msra.mxu0 %v3146_v34  ;;  %2765 = vmatprep.subr.bf16.mxu1 %v2764_v35  ;;  %v1137_v34 = vld [vmem:[#allocation5 + $0x1760] sm:$0xff]  ;;  %v3168_v35 = vpack.c.bf16 %v1140_v28, %v1138_v27  ;;  %v2786_v41 = vpack.c.bf16 %v755_v33, %v753_v32  ;;  %v3204_v27 = vpack.c.bf16 %v2131_v22, %v2130_v21  ;;  %v1159_v32 = vld [vmem:[#allocation5 + $0x1810] sm:$0xff]  ;;  %v1162_v33 = vld [vmem:[#allocation5 + $0x1828] sm:$0xff] }
 0x210   : > { %3149 = vmatprep.subr.bf16.mxu0 %v3148_v39  ;;  %v1142_v39 = vld [vmem:[#allocation5 + $0x1788] sm:$0xff]  ;;  %v3170_v42 = vpack.c.bf16 %v1139_v36, %v1137_v34  ;;  %v1164_v34 = vld [vmem:[#allocation5 + $0x1838] sm:$0xff] }
 0x211   : > { %v2114_v28 = vld [vmem:[#allocation8] sm:$0xff]  ;;  %v2133_v36 = vld [vmem:[#allocation8 + $0x98] sm:$0xff] }
 0x212   : > { %2767 = vmatpush1.bf16.msra.mxu1 %v2766_v45  ;;  %v759_v45 = vld [vmem:[#allocation5 + $0xb90] sm:$0xff]  ;;  %v2125_v21 = vld [vmem:[#allocation8 + $0x58] sm:$0xff]  ;;  %v2142_v22 = vld [vmem:[#allocation8 + $0xe0] sm:$0xff] }
 0x213   : > { %3151 = vmatpush1.bf16.msra.mxu0 %v3150_v46  ;;  %2769 = vmatprep.subr.bf16.mxu1 %v2768_v47  ;;  %v1141_v46 = vld [vmem:[#allocation5 + $0x1780] sm:$0xff]  ;;  %v3172_v47 = vpack.c.bf16 %v1144_v40, %v1142_v39  ;;  %v2790_v53 = vpack.c.bf16 %v759_v45, %v757_v44  ;;  %v3192_v44 = vpack.c.bf16 %v1164_v34, %v1162_v33  ;;  %v1163_v45 = vld [vmem:[#allocation5 + $0x1830] sm:$0xff] }
 0x214   : > { %3153 = vmatprep.subr.bf16.mxu0 %v3152_v51  ;;  %v1146_v51 = vld [vmem:[#allocation5 + $0x17a8] sm:$0xff]  ;;  %v3174_v54 = vpack.c.bf16 %v1143_v48, %v1141_v46  ;;  %v2129_v33 = vld [vmem:[#allocation8 + $0x78] sm:$0xff] }
 0x215   : > { %v2135_v48 = vld [vmem:[#allocation8 + $0xa8] sm:$0xff] }
 0x216   : > { %2771 = vmatpush1.bf16.msra.mxu1 %v2770_v57  ;;  %v763_v57 = vld [vmem:[#allocation5 + $0xbb0] sm:$0xff] }
 0x217   : > { %3155 = vmatpush1.bf16.msra.mxu0 %v3154_v58  ;;  %2773 = vmatprep.subr.bf16.mxu1 %v2772_v59  ;;  %v1145_v58 = vld [vmem:[#allocation5 + $0x17a0] sm:$0xff]  ;;  %v3176_v59 = vpack.c.bf16 %v1148_v52, %v1146_v51  ;;  %v2794_v1 = vpack.c.bf16 %v763_v57, %v761_v56  ;;  %v1167_v57 = vld [vmem:[#allocation5 + $0x1850] sm:$0xff] }
 0x218   : > { %3157 = vmatprep.subr.bf16.mxu0 %v3156_v63  ;;  %v1150_v63 = vld [vmem:[#allocation5 + $0x17c8] sm:$0xff]  ;;  %v3178_v2 = vpack.c.bf16 %v1147_v60, %v1145_v58  ;;  %v1165_v56 = vld [vmem:[#allocation5 + $0x1840] sm:$0xff] }
 0x219   : > { %v1170_v58 = vld [vmem:[#allocation5 + $0x1868] sm:$0xff]  ;;  %v3198_v60 = vpack.c.bf16 %v1167_v57, %v1165_v56  ;;  %v2381_v57 = vld [vmem:[#allocation11] ss:$0 sm:$0xff] }
 0x21a   : > { %2775 = vmatpush1.bf16.msra.mxu1 %v2774_v5  ;;  %v767_v5 = vld [vmem:[#allocation5 + $0xbd0] sm:$0xff] }
 0x21b   : > { %3159 = vmatpush1.bf16.msra.mxu0 %v3158_v6  ;;  %2777 = vmatprep.subr.bf16.mxu1 %v2776_v7  ;;  %v1149_v6 = vld [vmem:[#allocation5 + $0x17c0] sm:$0xff]  ;;  %v3180_v7 = vpack.c.bf16 %v1152_v0, %v1150_v63  ;;  %v2798_v13 = vpack.c.bf16 %v767_v5, %v765_v4  ;;  %v1171_v63 = vld [vmem:[#allocation5 + $0x1870] sm:$0xff] }
 0x21c   : > { %3161 = vmatprep.subr.bf16.mxu0 %v3160_v11  ;;  %v1154_v11 = vld [vmem:[#allocation5 + $0x17e8] sm:$0xff]  ;;  %v3182_v14 = vpack.c.bf16 %v1151_v8, %v1149_v6  ;;  %v3202_v0 = vpack.c.bf16 %v1171_v63, %v1169_v62  ;;  %v2136_v5 = vld [vmem:[#allocation8 + $0xb0] sm:$0xff]  ;;  %v2137_v6 = vld [vmem:[#allocation8 + $0xb8] sm:$0xff] }
 0x21d   : > { %v2120_v8 = vld [vmem:[#allocation8 + $0x30] sm:$0xff] }
 0x21e   : > { %2779 = vmatpush1.bf16.msra.mxu1 %v2778_v17  ;;  %v771_v17 = vld [vmem:[#allocation5 + $0xbf0] sm:$0xff] }
 0x21f   : > { %3163 = vmatpush1.bf16.msra.mxu0 %v3162_v18  ;;  %2781 = vmatprep.subr.bf16.mxu1 %v2780_v19  ;;  %v1153_v18 = vld [vmem:[#allocation5 + $0x17e0] sm:$0xff]  ;;  %v3184_v19 = vpack.c.bf16 %v1156_v12, %v1154_v11  ;;  %v2802_v25 = vpack.c.bf16 %v771_v17, %v769_v16  ;;  %v3218_v11 = vpack.c.bf16 %v2121_v9, %v2120_v8  ;;  %v2139_v12 = vld [vmem:[#allocation8 + $0xc8] sm:$0xff]  ;;  %v2140_v16 = vld [vmem:[#allocation8 + $0xd0] sm:$0xff] }
 0x220   : > { %3165 = vmatprep.subr.bf16.mxu0 %v3164_v23  ;;  %v1158_v23 = vld [vmem:[#allocation5 + $0x1808] sm:$0xff]  ;;  %v3186_v26 = vpack.c.bf16 %v1155_v20, %v1153_v18  ;;  %v2141_v17 = vld [vmem:[#allocation8 + $0xd8] sm:$0xff]  ;;  %v2124_v20 = vld [vmem:[#allocation8 + $0x50] sm:$0xff] }
 0x222   : > { %2783 = vmatpush1.bf16.msra.mxu1 %v2782_v29  ;;  %v2115_v29 = vld [vmem:[#allocation8 + $0x8] sm:$0xff] }
 0x223   : > { %3167 = vmatpush1.bf16.msra.mxu0 %v3166_v30  ;;  %2785 = vmatprep.subr.bf16.mxu1 %v2784_v31  ;;  %v3188_v30 = vpack.c.bf16 %v1160_v24, %v1158_v23  ;;  %v1157_v31 = vld [vmem:[#allocation5 + $0x1800] sm:$0xff]  ;;  %v3206_v39 = vpack.c.bf16 %v2115_v29, %v2114_v28  ;;  %v2143_v23 = vld [vmem:[#allocation8 + $0xe8] sm:$0xff]  ;;  %v3226_v24 = vpack.c.bf16 %v2125_v21, %v2124_v20  ;;  %v2144_v29 = vld [vmem:[#allocation8 + $0xf0] sm:$0xff] }
 0x224   : > { %3169 = vmatprep.subr.bf16.mxu0 %v3168_v35  ;;  %v2132_v35 = vld [vmem:[#allocation8 + $0x90] sm:$0xff]  ;;  %v3190_v40 = vpack.c.bf16 %v1159_v32, %v1157_v31 }
 0x225   : > { %v3208_v46 = vpack.c.bf16 %v2133_v36, %v2132_v35  ;;  %v2128_v32 = vld [vmem:[#allocation8 + $0x70] sm:$0xff]  ;;  %v1175_v35 = vlaneseq }
 0x226   : > { %2787 = vmatpush1.bf16.msra.mxu1 %v2786_v41  ;;  %v1161_v41 = vld [vmem:[#allocation5 + $0x1820] sm:$0xff]  ;;  %v3234_v34 = vpack.c.bf16 %v2129_v33, %v2128_v32 }
 0x227   : > { %3171 = vmatpush1.bf16.msra.mxu0 %v3170_v42  ;;  %2789 = vmatprep.subr.bf16.mxu1 %v2788_v43  ;;  %v2116_v42 = vld [vmem:[#allocation8 + $0x10] sm:$0xff]  ;;  %v2117_v43 = vld [vmem:[#allocation8 + $0x18] sm:$0xff]  ;;  %v3194_v52 = vpack.c.bf16 %v1163_v45, %v1161_v41 }
 0x228   : > { %3173 = vmatprep.subr.bf16.mxu0 %v3172_v47  ;;  %v2134_v47 = vld [vmem:[#allocation8 + $0xa0] sm:$0xff]  ;;  %v3210_v51 = vpack.c.bf16 %v2117_v43, %v2116_v42 }
 0x22a   : > { %2791 = vmatpush1.bf16.msra.mxu1 %v2790_v53  ;;  %v3592_v53 = vmov 0.0  }
 0x22b   : > { %3175 = vmatpush1.bf16.msra.mxu0 %v3174_v54  ;;  %2793 = vmatprep.subr.bf16.mxu1 %v2792_v55  ;;  %v3212_v54 = vpack.c.bf16 %v2135_v48, %v2134_v47  ;;  %v3196_v55 = vpack.c.bf16 %v1168_v50, %v1166_v49 }
 0x22c   : > { %3177 = vmatprep.subr.bf16.mxu0 %v3176_v59  ;;  %v1172_v59 = vld [vmem:[#allocation5 + $0x1878] sm:$0xff] }
 0x22d   : > { %v3200_v61 = vpack.c.bf16 %v1172_v59, %v1170_v58 }
 0x22e   : > { %2795 = vmatpush1.bf16.msra.mxu1 %v2794_v1  ;;  %v388_v1 = vld [vmem:[%s3849_s13 + $0xc0] sm:$0xff] }
 0x22f   : > { %3179 = vmatpush1.bf16.msra.mxu0 %v3178_v2  ;;  %2797 = vmatprep.subr.bf16.mxu1 %v2796_v3  ;;  %v2118_v2 = vld [vmem:[#allocation8 + $0x20] sm:$0xff]  ;;  %v2119_v3 = vld [vmem:[#allocation8 + $0x28] sm:$0xff] }
 0x230   : > { %3181 = vmatprep.subr.bf16.mxu0 %v3180_v7  ;;  %v3214_v4 = vpack.c.bf16 %v2119_v3, %v2118_v2  ;;  %v3216_v7 = vpack.c.bf16 %v2137_v6, %v2136_v5 }
 0x232   : > { %2799 = vmatpush1.bf16.msra.mxu1 %v2798_v13  ;;  %v2122_v13 = vld [vmem:[#allocation8 + $0x40] sm:$0xff] }
 0x233   : > { %3183 = vmatpush1.bf16.msra.mxu0 %v3182_v14  ;;  %2801 = vmatprep.subr.bf16.mxu1 %v2800_v15  ;;  %v2123_v14 = vld [vmem:[#allocation8 + $0x48] sm:$0xff]  ;;  %v3220_v15 = vpack.c.bf16 %v2139_v12, %v2138_v10 }
 0x234   : > { %3185 = vmatprep.subr.bf16.mxu0 %v3184_v19  ;;  %v3222_v18 = vpack.c.bf16 %v2123_v14, %v2122_v13  ;;  %v3224_v19 = vpack.c.bf16 %v2141_v17, %v2140_v16 }
 0x236   : > { %2803 = vmatpush1.bf16.msra.mxu1 %v2802_v25  ;;  %v3228_v25 = vpack.c.bf16 %v2143_v23, %v2142_v22 }
 0x237   : > { %3187 = vmatpush1.bf16.msra.mxu0 %v3186_v26  ;;  %3205 = vmatprep.subr.bf16.mxu1 %v3204_v27  ;;  %v2126_v26 = vld [vmem:[#allocation8 + $0x60] sm:$0xff]  ;;  %v2127_v27 = vld [vmem:[#allocation8 + $0x68] sm:$0xff] }
 0x238   : > { %3189 = vmatprep.subr.bf16.mxu0 %v3188_v30  ;;  %v3230_v28 = vpack.c.bf16 %v2127_v27, %v2126_v26  ;;  %v2145_v30 = vld [vmem:[#allocation8 + $0xf8] sm:$0xff] }
 0x239   : > { %1609 = vmatmul.mubr.f32.vlgmr.msra.gmra.mrb[0].mxu1 %v374_v37  ;;  %v3232_v31 = vpack.c.bf16 %v2145_v30, %v2144_v29 }
 0x23a   : > { %2035 = vmatmul.mubr.f32.vlgmr.msra.gmra.mrb[0].mxu0 %v386_v38  ;;  %3207 = vmatpush3.bf16.msra.mxu1 %v3206_v39  ;;  %v1176_v38 = vshrl.u32 %v1175_v35, 7 }
 0x23b   : > { %3191 = vmatpush1.bf16.msra.mxu0 %v3190_v40  ;;  %2105 = vmatprep.mubr.f32.mxu0 %v3592_v53  ;;  %v1173_v40 = vld [vmem:[#allocation7] sm:$0x3] }
 0x23c   : > { %3193 = vmatprep.subr.bf16.mxu0 %v3192_v44  ;;  %3209 = vmatprep.subr.bf16.mxu1 %v3208_v46  ;;  %v1177_v39 = vsub.s32 0, %v1176_v38  ;;  %v1181_v41 = vsub.s32 1, %v1176_v38 }
 0x23e   : > { %3211 = vmatpush3.bf16.msra.mxu1 %v3210_v51  ;;  %v1178_v42 = vrot.slane %v1173_v40, %v1177_v39  ;;  %v1182_v43 = vrot.slane %v1173_v40, %v1181_v41 }
 0x23f   : > { %3195 = vmatpush1.bf16.msra.mxu0 %v3194_v52  ;;  %3213 = vmatprep.subr.bf16.mxu1 %v3212_v54  ;;  %v2380_v54 = vld [vmem:[#allocation10] ss:$0 sm:$0xff] }
 0x240   : > { %3197 = vmatprep.subr.bf16.mxu0 %v3196_v55 }
 0x242   : > { %3215 = vmatpush3.bf16.msra.mxu1 %v3214_v4 }
 0x243   : > { %3199 = vmatpush1.bf16.msra.mxu0 %v3198_v60  ;;  %3217 = vmatprep.subr.bf16.mxu1 %v3216_v7  ;;  %v2382_v60 = vld [vmem:[#allocation2] ss:$0 sm:$0xff] }
 0x244   : > { %3201 = vmatprep.subr.bf16.mxu0 %v3200_v61 }
 0x246   : > { %3219 = vmatpush3.bf16.msra.mxu1 %v3218_v11 }
 0x247   : > { %3203 = vmatpush1.bf16.msra.mxu0 %v3202_v0  ;;  %3221 = vmatprep.subr.bf16.mxu1 %v3220_v15 }
 0x24a   : > { %2379 = vmatmul.mubr.msk.f32.vlgmr.msra.gmra.mrb[0].mxu0 %vm1185_vm0, %v388_v1  ;;  %3223 = vmatpush3.bf16.msra.mxu1 %v3222_v18 }
 0x24b   : > { %3225 = vmatprep.subr.bf16.mxu1 %v3224_v19 }
 0x24e   : > { %3227 = vmatpush3.bf16.msra.mxu1 %v3226_v24 }
 0x24f   : > { %3229 = vmatprep.subr.bf16.mxu1 %v3228_v25 }
 0x252   : > { %3231 = vmatpush3.bf16.msra.mxu1 %v3230_v28 }
 0x253   : > { %3233 = vmatprep.subr.bf16.mxu1 %v3232_v31 }
 0x256   : > { %3235 = vmatpush3.bf16.msra.mxu1 %v3234_v34 }
 0x30c   : > { %v1610_v36 = vpop.f32.mrb[0].mxu1 }
 0x30d   : > { %v1612_v37 = vpop.f32.mrb[1].mxu1  ;;  %v3236_v44 = vadd.f32 %v1610_v36, %v1178_v42 }
 0x30e   : > { %v3238_v45 = vadd.f32 %v1612_v37, %v1182_v43 }
 0x31d   : > { %v2107_v46 = vpop.f32.mrb[0].mxu0 }
 0x31e   : > { %v3237_v47 = vadd.f32 %v3236_v44, %v2107_v46  ;;  %v2109_v48 = vpop.f32.mrb[1].mxu0 }
 0x31f   : > { %v3239_v49 = vadd.f32 %v3238_v45, %v2109_v48 }
 0x320   : > { %v2112_v51 = vmax.f32 %v3237_v47, 0.0 }
 0x321   : > { %v2113_v50 = vmax.f32 %v3239_v49, 0.0 }
 0x323   : > { %2217 = vmatprep.mubr.f32.mxu1 %v2113_v50 }
 0x324   : > { %2218 = vmatmul.mubr.f32.vlgmr.msra.gmra.mrb[2].mxu1 %v2112_v51 }
 0x3f7   : > { %v2417_v52 = vpop.f32.mrb[2].mxu1 }
 0x3f8   : > { %v2418_v53 = vpop.f32.mrb[3].mxu1 }
 0x3f9   : > { %v2419_v55 = vadd.f32 %v2418_v53, %v2417_v52 }
 0x3fb   : > { %v2220_v56 = vadd.f32 %v2419_v55, %v2380_v54 }
 0x3fd   : > { %v2223_v58 = vmax.f32 %v2220_v56, 0.0 }
 0x3ff   : > { %v2231_v59 = vmul.f32 %v2381_v57, %v2223_v58 }
 0x401   : > { %2232 = vadd.xlane.f32.xlu0 %v2231_v59 }
 0x48e   : > { %v2233_v61 = vpop.xlane.xlu0 %2232 }
 0x48f   : > { %v2241_v62 = vadd.f32 %v2382_v60, %v2233_v61 }
 0x491   : > { %v2242_v63 = vsub.f32 0.0, %v2241_v62 }
 0x493   : > { %v2243_v0 = vmul.f32 1.442695, %v2242_v63 }
 0x495   : > { %3360 = vpow2.f32 %v2243_v0 }
 0x49f   : > { %v3361_v1 = vpop.eup %3360 }
 0x4a0   : > { %v2245_v2 = vadd.f32 1.0, %v3361_v1 }
 0x4a2   : > { %3362 = vrcp.f32 %v2245_v2 }
 0x4ac   : > { %v3363_v3 = vpop.eup %3362 }
 0x4ad   : > { %2249 = vst.msk [vmem:[%s363_s26] sm:$0xff] %vm2248_vm1, %v3363_v3 }
 0x4ae PF: > { %p22_p2 = scmp.ge.s32.totalorder %s3788_s20, 4   ;;  %s3933_s26 = smov %s3572_s27 }
 0x4af   : > { %s3934_s27 = smov %s3576_s28  ;;  %s3935_s28 = smov %s3799_s18 }
 0x4b0   : > { %s3936_s29 = smov %s3788_s20  ;;  %24 = sbr.rel (!%p22_p2) target bundleno = 9 (0x9), region = 108 }
 0x4b7   :  { %2269 = vsyncpa [#allocation4], 1 }
 0x4b8   :  { %2271 = vsyncpa [#allocation4 + $0x1], 1 }
 0x4b9   :  { %2272 = vsyncpa [#allocation6], 1 }
 0x4ba   :  { %2273 = vsyncpa [#allocation9], 1 }
 0x4bb   :  { %2274 = vsyncpa [#allocation12], 1 }

</bundles_post_ra>
